<compile_context>
chip_gen: v5e
topology: v5e:2x2
jax: 0.10.0
libtpu: 0.0.40
codegen_flags: <defaults>
</compile_context>

<pallas_src>
import functools

import jax
import jax.numpy as jnp
import numpy as np
from jax import lax
from jax.experimental import pallas as pl
from jax.experimental.pallas import tpu as pltpu

DROPOUT_RATE = 0.5
_KEEP_SCALE = 1.0 / (1.0 - DROPOUT_RATE)
# keep element iff hashed int32 >= threshold  =>  P(keep) = 1 - DROPOUT_RATE
_DROP_THRESHOLD_I32 = int(round(DROPOUT_RATE * (1 << 32))) - (1 << 31)   # == 0 for p=0.5

# murmur3-fmix32 constants expressed as signed int32 (wrapping arithmetic)
_MIX_C1 = -2048144789          # 0x85EBCA6B
_MIX_C2 = -1028477387          # 0xC2B2AE35
_GOLDEN = -1640531527          # 0x9E3779B9


# ----------------------------- Pallas kernels ------------------------------

def _conv_pool_relu_kernel(p_ref, w_ref, b_ref, o_ref, *, rows_out):
    """relu(bias + 2x2-maxpool(conv)) for one conv layer, as a single matmul.

    p_ref: (4*rows_out, K) im2col patches; window position p in {0,1,2,3}
           owns the contiguous row block [p*rows_out, (p+1)*rows_out).
    w_ref: (K, Co), b_ref: (1, Co), o_ref: (rows_out, Co).
    """
    y = jnp.dot(p_ref[...], w_ref[...], preferred_element_type=jnp.float32)
    r = rows_out
    m = jnp.maximum(jnp.maximum(y[0:r], y[r:2 * r]),
                    jnp.maximum(y[2 * r:3 * r], y[3 * r:4 * r]))
    # bias is per-channel, so adding it after the max is equivalent and cheaper
    o_ref[...] = jnp.maximum(m + b_ref[...], 0.0).astype(o_ref.dtype)


def _mlp_head_kernel(seed_ref, x_ref, w1_ref, b1_ref, w2_ref, b2_ref, o_ref,
                     *, apply_dropout):
    """fc1 + relu (+ dropout) + fc2, fused; only the (B, 10) logits leave VMEM."""
    h = jnp.dot(x_ref[...], w1_ref[...], preferred_element_type=jnp.float32)
    h = jnp.maximum(h + b1_ref[...], 0.0)

    if apply_dropout:
        # Counter-based RNG: murmur3-style mixer on int32 element indices + seed.
        # Pure int32 VPU ops (xor / shift / and / mul / cmp); no pltpu.prng_*.
        # Logical right shifts are emulated via arithmetic shift + mask.
        r, c = h.shape
        row = lax.broadcasted_iota(jnp.int32, (r, c), 0)
        col = lax.broadcasted_iota(jnp.int32, (r, c), 1)
        z = row * jnp.int32(c) + col + seed_ref[0] * jnp.int32(_GOLDEN)
        z = z ^ ((z >> 16) & 0xFFFF)
        z = z * jnp.int32(_MIX_C1)
        z = z ^ ((z >> 13) & 0x7FFFF)
        z = z * jnp.int32(_MIX_C2)
        z = z ^ ((z >> 16) & 0xFFFF)
        keep = z >= jnp.int32(_DROP_THRESHOLD_I32)     # raw-bits threshold compare
        h = jnp.where(keep, h * _KEEP_SCALE, 0.0)

    y = jnp.dot(h, w2_ref[...], preferred_element_type=jnp.float32) + b2_ref[...]
    o_ref[...] = y.astype(o_ref.dtype)


# ------------------------------- wrappers -----------------------------------

def _im2col_pool_grouped(x_nhwc, k):
    """im2col for a valid, stride-1 kxk conv, with rows grouped by 2x2 pool
    window position so the conv kernel can fuse the maxpool.

    Returns (patches, POH, POW) with patches of shape
    (4 * B*POH*POW, k*k*C); block p = (di, dj) holds patches for conv outputs
    (2i+di, 2j+dj), rows in (b, i, j) order, columns in (kh, kw, c) order.
    """
    B, H, W, C = x_nhwc.shape
    OH, OW = H - k + 1, W - k + 1
    POH, POW = OH // 2, OW // 2
    blocks = []
    for di in (0, 1):
        for dj in (0, 1):
            cols = []
            for kh in range(k):
                for kw in range(k):
                    cols.append(x_nhwc[:, di + kh:di + kh + 2 * POH:2,
                                       dj + kw:dj + kw + 2 * POW:2, :])
            patch = jnp.concatenate(cols, axis=-1)          # (B, POH, POW, k*k*C)
            blocks.append(patch.reshape(B * POH * POW, k * k * C))
    return jnp.concatenate(blocks, axis=0), POH, POW


def conv_pool_relu(x_nhwc, w_oikk, b):
    """relu(max_pool2d(Conv2d(stride=1, valid)(x), 2, 2)) as one Pallas kernel.
    w_oikk: (out_c, in_c, k, k) PyTorch layout; b: (out_c,)."""
    out_c, in_c, k, _ = w_oikk.shape
    B = x_nhwc.shape[0]
    patches, POH, POW = _im2col_pool_grouped(x_nhwc, k)
    K = k * k * in_c
    R = B * POH * POW
    # reorder weights to match the (kh, kw, c_in) patch flattening
    w_mat = jnp.transpose(w_oikk, (2, 3, 1, 0)).reshape(K, out_c)
    out = pl.pallas_call(
        functools.partial(_conv_pool_relu_kernel, rows_out=R),
        out_shape=jax.ShapeDtypeStruct((R, out_c), jnp.float32),
        grid=(1,),
        in_specs=[
            pl.BlockSpec((4 * R, K), lambda i: (0, 0)),
            pl.BlockSpec((K, out_c), lambda i: (0, 0)),
            pl.BlockSpec((1, out_c), lambda i: (0, 0)),
        ],
        out_specs=pl.BlockSpec((R, out_c), lambda i: (0, 0)),
    )(patches, w_mat, b.reshape(1, out_c))
    return out.reshape(B, POH, POW, out_c)


def mlp_head(seed, x, w1, b1, w2, b2, *, apply_dropout=True):
    """x: (M, 800), w1: (800, 500), w2: (500, 10); returns (M, 10) logits."""
    M, K1 = x.shape
    _, N1 = w1.shape
    _, N2 = w2.shape
    return pl.pallas_call(
        functools.partial(_mlp_head_kernel, apply_dropout=apply_dropout),
        out_shape=jax.ShapeDtypeStruct((M, N2), jnp.float32),
        grid_spec=pltpu.PrefetchScalarGridSpec(
            num_scalar_prefetch=1,
            grid=(1,),
            in_specs=[
                pl.BlockSpec((M, K1), lambda i, s: (0, 0)),
                pl.BlockSpec((K1, N1), lambda i, s: (0, 0)),
                pl.BlockSpec((1, N1), lambda i, s: (0, 0)),
                pl.BlockSpec((N1, N2), lambda i, s: (0, 0)),
                pl.BlockSpec((1, N2), lambda i, s: (0, 0)),
            ],
            out_specs=pl.BlockSpec((M, N2), lambda i, s: (0, 0)),
        ),
    )(seed, x, w1, b1, w2, b2)


# fc1 weight rows are stored in PyTorch's x.view(-1, 800) order (c, h, w); our
# pooled activation flattens as (h, w, c).  This constant permutation maps our
# order onto the torch weight rows so semantics match torch weights exactly.
_FC1_PERM = ((np.arange(4 * 4 * 50) % 50) * 16 + (np.arange(4 * 4 * 50) // 50))


def lenet_dropout_forward(params, x_nchw, dropout_seed, training=True):
    x = jnp.transpose(x_nchw, (0, 2, 3, 1))                        # NCHW -> NHWC
    x = conv_pool_relu(x, params["w_conv1"], params["b_conv1"])    # (B, 12, 12, 20)
    x = conv_pool_relu(x, params["w_conv2"], params["b_conv2"])    # (B, 4, 4, 50)
    B = x.shape[0]
    x = x.reshape(B, 4 * 4 * 50)                                   # (h, w, c) flatten
    w_fc1 = params["w_fc1"][_FC1_PERM]                             # match torch order
    # TODO(synk): dropout uses an in-kernel counter-hash RNG; it cannot bitwise-match
    # torch's RNG stream (statistics / scaling match nn.Dropout(0.5) in train mode).
    return mlp_head(dropout_seed, x, w_fc1, params["b_fc1"],
                    params["w_fc2"], params["b_fc2"], apply_dropout=training)


def init_params(key):
    """Deterministic PyTorch-style uniform(-1/sqrt(fan_in), 1/sqrt(fan_in)) init.
    Linear weights are stored pre-transposed as (in_features, out_features)."""
    ks = jax.random.split(key, 8)

    def u(k, shape, fan_in):
        bound = 1.0 / float(fan_in) ** 0.5
        return jax.random.uniform(k, shape, jnp.float32, -bound, bound)

    return {
        "w_conv1": u(ks[0], (20, 1, 5, 5), 25),
        "b_conv1": u(ks[1], (20,), 25),
        "w_conv2": u(ks[2], (50, 20, 5, 5), 500),
        "b_conv2": u(ks[3], (50,), 500),
        "w_fc1":   u(ks[4], (800, 500), 800),
        "b_fc1":   u(ks[5], (1, 500), 800),
        "w_fc2":   u(ks[6], (500, 10), 500),
        "b_fc2":   u(ks[7], (1, 10), 500),
    }


if __name__ == "__main__":
    key = jax.random.PRNGKey(0)
    pkey, xkey = jax.random.split(key)
    params = init_params(pkey)
    x = jax.random.normal(xkey, (2, 1, 28, 28), jnp.float32)       # MNIST-shaped NCHW
    seed = jnp.array([1234], dtype=jnp.int32)

    logits = jax.jit(lenet_dropout_forward)(params, x, seed)
    jax.block_until_ready(logits)
    assert logits.shape == (2, 10) and logits.dtype == jnp.float32
    assert bool(jnp.all(jnp.isfinite(logits)))
    print("KERNEL_OK")
</pallas_src>

<mosaic_0001>
module attributes {stable_mosaic.version = 11 : i64} {
  func.func @_conv_pool_relu_kernel(%arg0: i32, %arg1: memref<1152x25xf32, #tpu.memory_space<vmem>>, %arg2: memref<25x20xf32, #tpu.memory_space<vmem>>, %arg3: memref<1x20xf32, #tpu.memory_space<vmem>>, %arg4: memref<288x20xf32, #tpu.memory_space<vmem>>) attributes {dimension_semantics = [#tpu.dimension_semantics<arbitrary>], iteration_bounds = array<i64: 1>, scalar_prefetch = 0 : i64, scratch_operands = 0 : i64, tpu.core_type = #tpu.core_type<tc>, window_params = [{pipeline_mode = #tpu.pipeline_mode<synchronous>, transform_indices = @transform_0, window_bounds = array<i64: 1152, 25>}, {pipeline_mode = #tpu.pipeline_mode<synchronous>, transform_indices = @transform_1, window_bounds = array<i64: 25, 20>}, {pipeline_mode = #tpu.pipeline_mode<synchronous>, transform_indices = @transform_2, window_bounds = array<i64: 1, 20>}, {pipeline_mode = #tpu.pipeline_mode<synchronous>, transform_indices = @transform_3, window_bounds = array<i64: 288, 20>}]} {
    %c0 = arith.constant 0 : index
    %c0_0 = arith.constant 0 : index
    %0 = vector.load %arg1[%c0, %c0_0] : memref<1152x25xf32, #tpu.memory_space<vmem>>, vector<1152x25xf32>
    %c0_1 = arith.constant 0 : index
    %c0_2 = arith.constant 0 : index
    %1 = vector.load %arg2[%c0_1, %c0_2] : memref<25x20xf32, #tpu.memory_space<vmem>>, vector<25x20xf32>
    %cst = arith.constant dense<0.000000e+00> : vector<1152x20xf32>
    %2 = tpu.matmul %0, %1, %cst {dimension_numbers = #tpu.dot_dimension_numbers<[1], [0], [0], [1], [0, 0, 1, 1], [], []>} : vector<1152x25xf32>, vector<25x20xf32>, vector<1152x20xf32> -> vector<1152x20xf32>
    %3 = vector.extract_strided_slice %2 {offsets = [0, 0], sizes = [288, 20], strides = [1, 1]} : vector<1152x20xf32> to vector<288x20xf32>
    %4 = vector.extract_strided_slice %2 {offsets = [288, 0], sizes = [288, 20], strides = [1, 1]} : vector<1152x20xf32> to vector<288x20xf32>
    %5 = arith.maximumf %3, %4 : vector<288x20xf32>
    %6 = vector.extract_strided_slice %2 {offsets = [576, 0], sizes = [288, 20], strides = [1, 1]} : vector<1152x20xf32> to vector<288x20xf32>
    %7 = vector.extract_strided_slice %2 {offsets = [864, 0], sizes = [288, 20], strides = [1, 1]} : vector<1152x20xf32> to vector<288x20xf32>
    %8 = arith.maximumf %6, %7 : vector<288x20xf32>
    %9 = arith.maximumf %5, %8 : vector<288x20xf32>
    %c0_3 = arith.constant 0 : index
    %c0_4 = arith.constant 0 : index
    %10 = vector.load %arg3[%c0_3, %c0_4] : memref<1x20xf32, #tpu.memory_space<vmem>>, vector<1x20xf32>
    %11 = vector.broadcast %10 : vector<1x20xf32> to vector<288x20xf32>
    %12 = arith.addf %9, %11 : vector<288x20xf32>
    %cst_5 = arith.constant 0.000000e+00 : f32
    %13 = vector.broadcast %cst_5 : f32 to vector<288x20xf32>
    %14 = arith.maximumf %12, %13 : vector<288x20xf32>
    %c0_6 = arith.constant 0 : index
    %c0_7 = arith.constant 0 : index
    %15 = vector.load %arg4[%c0_6, %c0_7] : memref<288x20xf32, #tpu.memory_space<vmem>>, vector<288x20xf32>
    tpu.vector_store %arg4[%c0_6, %c0_7], %14 {strides = array<i32>} : memref<288x20xf32, #tpu.memory_space<vmem>>, vector<288x20xf32>,
    return
  }
  func.func @transform_0(%arg0: i32) -> (i32, i32) {
    %c0_i32 = arith.constant 0 : i32
    %c0_i32_0 = arith.constant 0 : i32
    %c0_i32_1 = arith.constant 0 : i32
    return %c0_i32, %c0_i32_0 : i32, i32
  }
  func.func @transform_1(%arg0: i32) -> (i32, i32) {
    %c0_i32 = arith.constant 0 : i32
    %c0_i32_0 = arith.constant 0 : i32
    %c0_i32_1 = arith.constant 0 : i32
    return %c0_i32, %c0_i32_0 : i32, i32
  }
  func.func @transform_2(%arg0: i32) -> (i32, i32) {
    %c0_i32 = arith.constant 0 : i32
    %c0_i32_0 = arith.constant 0 : i32
    %c0_i32_1 = arith.constant 0 : i32
    return %c0_i32, %c0_i32_0 : i32, i32
  }
  func.func @transform_3(%arg0: i32) -> (i32, i32) {
    %c0_i32 = arith.constant 0 : i32
    %c0_i32_0 = arith.constant 0 : i32
    %c0_i32_1 = arith.constant 0 : i32
    return %c0_i32, %c0_i32_0 : i32, i32
  }
}

module attributes {stable_mosaic.version = 11 : i64} {
  func.func @_conv_pool_relu_kernel(%arg0: i32, %arg1: memref<128x500xf32, #tpu.memory_space<vmem>>, %arg2: memref<500x50xf32, #tpu.memory_space<vmem>>, %arg3: memref<1x50xf32, #tpu.memory_space<vmem>>, %arg4: memref<32x50xf32, #tpu.memory_space<vmem>>) attributes {dimension_semantics = [#tpu.dimension_semantics<arbitrary>], iteration_bounds = array<i64: 1>, scalar_prefetch = 0 : i64, scratch_operands = 0 : i64, tpu.core_type = #tpu.core_type<tc>, window_params = [{pipeline_mode = #tpu.pipeline_mode<synchronous>, transform_indices = @transform_0, window_bounds = array<i64: 128, 500>}, {pipeline_mode = #tpu.pipeline_mode<synchronous>, transform_indices = @transform_1, window_bounds = array<i64: 500, 50>}, {pipeline_mode = #tpu.pipeline_mode<synchronous>, transform_indices = @transform_2, window_bounds = array<i64: 1, 50>}, {pipeline_mode = #tpu.pipeline_mode<synchronous>, transform_indices = @transform_3, window_bounds = array<i64: 32, 50>}]} {
    %c0 = arith.constant 0 : index
    %c0_0 = arith.constant 0 : index
    %0 = vector.load %arg1[%c0, %c0_0] : memref<128x500xf32, #tpu.memory_space<vmem>>, vector<128x500xf32>
    %c0_1 = arith.constant 0 : index
    %c0_2 = arith.constant 0 : index
    %1 = vector.load %arg2[%c0_1, %c0_2] : memref<500x50xf32, #tpu.memory_space<vmem>>, vector<500x50xf32>
    %cst = arith.constant dense<0.000000e+00> : vector<128x50xf32>
    %2 = tpu.matmul %0, %1, %cst {dimension_numbers = #tpu.dot_dimension_numbers<[1], [0], [0], [1], [0, 0, 1, 1], [], []>} : vector<128x500xf32>, vector<500x50xf32>, vector<128x50xf32> -> vector<128x50xf32>
    %3 = vector.extract_strided_slice %2 {offsets = [0, 0], sizes = [32, 50], strides = [1, 1]} : vector<128x50xf32> to vector<32x50xf32>
    %4 = vector.extract_strided_slice %2 {offsets = [32, 0], sizes = [32, 50], strides = [1, 1]} : vector<128x50xf32> to vector<32x50xf32>
    %5 = arith.maximumf %3, %4 : vector<32x50xf32>
    %6 = vector.extract_strided_slice %2 {offsets = [64, 0], sizes = [32, 50], strides = [1, 1]} : vector<128x50xf32> to vector<32x50xf32>
    %7 = vector.extract_strided_slice %2 {offsets = [96, 0], sizes = [32, 50], strides = [1, 1]} : vector<128x50xf32> to vector<32x50xf32>
    %8 = arith.maximumf %6, %7 : vector<32x50xf32>
    %9 = arith.maximumf %5, %8 : vector<32x50xf32>
    %c0_3 = arith.constant 0 : index
    %c0_4 = arith.constant 0 : index
    %10 = vector.load %arg3[%c0_3, %c0_4] : memref<1x50xf32, #tpu.memory_space<vmem>>, vector<1x50xf32>
    %11 = vector.broadcast %10 : vector<1x50xf32> to vector<32x50xf32>
    %12 = arith.addf %9, %11 : vector<32x50xf32>
    %cst_5 = arith.constant 0.000000e+00 : f32
    %13 = vector.broadcast %cst_5 : f32 to vector<32x50xf32>
    %14 = arith.maximumf %12, %13 : vector<32x50xf32>
    %c0_6 = arith.constant 0 : index
    %c0_7 = arith.constant 0 : index
    %15 = vector.load %arg4[%c0_6, %c0_7] : memref<32x50xf32, #tpu.memory_space<vmem>>, vector<32x50xf32>
    tpu.vector_store %arg4[%c0_6, %c0_7], %14 {strides = array<i32>} : memref<32x50xf32, #tpu.memory_space<vmem>>, vector<32x50xf32>,
    return
  }
  func.func @transform_0(%arg0: i32) -> (i32, i32) {
    %c0_i32 = arith.constant 0 : i32
    %c0_i32_0 = arith.constant 0 : i32
    %c0_i32_1 = arith.constant 0 : i32
    return %c0_i32, %c0_i32_0 : i32, i32
  }
  func.func @transform_1(%arg0: i32) -> (i32, i32) {
    %c0_i32 = arith.constant 0 : i32
    %c0_i32_0 = arith.constant 0 : i32
    %c0_i32_1 = arith.constant 0 : i32
    return %c0_i32, %c0_i32_0 : i32, i32
  }
  func.func @transform_2(%arg0: i32) -> (i32, i32) {
    %c0_i32 = arith.constant 0 : i32
    %c0_i32_0 = arith.constant 0 : i32
    %c0_i32_1 = arith.constant 0 : i32
    return %c0_i32, %c0_i32_0 : i32, i32
  }
  func.func @transform_3(%arg0: i32) -> (i32, i32) {
    %c0_i32 = arith.constant 0 : i32
    %c0_i32_0 = arith.constant 0 : i32
    %c0_i32_1 = arith.constant 0 : i32
    return %c0_i32, %c0_i32_0 : i32, i32
  }
}

module attributes {stable_mosaic.version = 11 : i64} {
  func.func @_mlp_head_kernel(%arg0: i32, %arg1: memref<1xi32, #tpu.memory_space<smem>>, %arg2: memref<2x800xf32, #tpu.memory_space<vmem>>, %arg3: memref<800x500xf32, #tpu.memory_space<vmem>>, %arg4: memref<1x500xf32, #tpu.memory_space<vmem>>, %arg5: memref<500x10xf32, #tpu.memory_space<vmem>>, %arg6: memref<1x10xf32, #tpu.memory_space<vmem>>, %arg7: memref<2x10xf32, #tpu.memory_space<vmem>>) attributes {dimension_semantics = [#tpu.dimension_semantics<arbitrary>], iteration_bounds = array<i64: 1>, scalar_prefetch = 1 : i64, scratch_operands = 0 : i64, tpu.core_type = #tpu.core_type<tc>, window_params = [{pipeline_mode = #tpu.pipeline_mode<synchronous>, transform_indices = @transform_0, window_bounds = array<i64: 2, 800>}, {pipeline_mode = #tpu.pipeline_mode<synchronous>, transform_indices = @transform_1, window_bounds = array<i64: 800, 500>}, {pipeline_mode = #tpu.pipeline_mode<synchronous>, transform_indices = @transform_2, window_bounds = array<i64: 1, 500>}, {pipeline_mode = #tpu.pipeline_mode<synchronous>, transform_indices = @transform_3, window_bounds = array<i64: 500, 10>}, {pipeline_mode = #tpu.pipeline_mode<synchronous>, transform_indices = @transform_4, window_bounds = array<i64: 1, 10>}, {pipeline_mode = #tpu.pipeline_mode<synchronous>, transform_indices = @transform_5, window_bounds = array<i64: 2, 10>}]} {
    %c0 = arith.constant 0 : index
    %c0_0 = arith.constant 0 : index
    %0 = vector.load %arg2[%c0, %c0_0] : memref<2x800xf32, #tpu.memory_space<vmem>>, vector<2x800xf32>
    %c0_1 = arith.constant 0 : index
    %c0_2 = arith.constant 0 : index
    %1 = vector.load %arg3[%c0_1, %c0_2] : memref<800x500xf32, #tpu.memory_space<vmem>>, vector<800x500xf32>
    %cst = arith.constant dense<0.000000e+00> : vector<2x500xf32>
    %2 = tpu.matmul %0, %1, %cst {dimension_numbers = #tpu.dot_dimension_numbers<[1], [0], [0], [1], [0, 0, 1, 1], [], []>} : vector<2x800xf32>, vector<800x500xf32>, vector<2x500xf32> -> vector<2x500xf32>
    %c0_3 = arith.constant 0 : index
    %c0_4 = arith.constant 0 : index
    %3 = vector.load %arg4[%c0_3, %c0_4] : memref<1x500xf32, #tpu.memory_space<vmem>>, vector<1x500xf32>
    %4 = vector.broadcast %3 : vector<1x500xf32> to vector<2x500xf32>
    %5 = arith.addf %2, %4 : vector<2x500xf32>
    %cst_5 = arith.constant 0.000000e+00 : f32
    %6 = vector.broadcast %cst_5 : f32 to vector<2x500xf32>
    %7 = arith.maximumf %5, %6 : vector<2x500xf32>
    %8 = tpu.iota {dimensions = array<i32: 0>} : vector<2x500xi32>
    %9 = tpu.iota {dimensions = array<i32: 1>} : vector<2x500xi32>
    %c500_i32 = arith.constant 500 : i32
    %10 = vector.broadcast %c500_i32 : i32 to vector<2x500xi32>
    %11 = arith.muli %8, %10 : vector<2x500xi32>
    %12 = arith.addi %11, %9 : vector<2x500xi32>
    %c0_6 = arith.constant 0 : index
    %13 = memref.load %arg1[%c0_6] : memref<1xi32, #tpu.memory_space<smem>>
    %c-1640531527_i32 = arith.constant -1640531527 : i32
    %14 = arith.muli %13, %c-1640531527_i32 : i32
    %15 = vector.broadcast %14 : i32 to vector<2x500xi32>
    %16 = arith.addi %12, %15 : vector<2x500xi32>
    %c16_i32 = arith.constant 16 : i32
    %17 = vector.broadcast %c16_i32 : i32 to vector<2x500xi32>
    %18 = arith.shrsi %16, %17 : vector<2x500xi32>
    %c65535_i32 = arith.constant 65535 : i32
    %19 = vector.broadcast %c65535_i32 : i32 to vector<2x500xi32>
    %20 = arith.andi %18, %19 : vector<2x500xi32>
    %21 = arith.xori %16, %20 : vector<2x500xi32>
    %c-2048144789_i32 = arith.constant -2048144789 : i32
    %22 = vector.broadcast %c-2048144789_i32 : i32 to vector<2x500xi32>
    %23 = arith.muli %21, %22 : vector<2x500xi32>
    %c13_i32 = arith.constant 13 : i32
    %24 = vector.broadcast %c13_i32 : i32 to vector<2x500xi32>
    %25 = arith.shrsi %23, %24 : vector<2x500xi32>
    %c524287_i32 = arith.constant 524287 : i32
    %26 = vector.broadcast %c524287_i32 : i32 to vector<2x500xi32>
    %27 = arith.andi %25, %26 : vector<2x500xi32>
    %28 = arith.xori %23, %27 : vector<2x500xi32>
    %c-1028477387_i32 = arith.constant -1028477387 : i32
    %29 = vector.broadcast %c-1028477387_i32 : i32 to vector<2x500xi32>
    %30 = arith.muli %28, %29 : vector<2x500xi32>
    %c16_i32_7 = arith.constant 16 : i32
    %31 = vector.broadcast %c16_i32_7 : i32 to vector<2x500xi32>
    %32 = arith.shrsi %30, %31 : vector<2x500xi32>
    %c65535_i32_8 = arith.constant 65535 : i32
    %33 = vector.broadcast %c65535_i32_8 : i32 to vector<2x500xi32>
    %34 = arith.andi %32, %33 : vector<2x500xi32>
    %35 = arith.xori %30, %34 : vector<2x500xi32>
    %c0_i32 = arith.constant 0 : i32
    %36 = vector.broadcast %c0_i32 : i32 to vector<2x500xi32>
    %37 = arith.cmpi sge, %35, %36 : vector<2x500xi32>
    %cst_9 = arith.constant 2.000000e+00 : f32
    %38 = vector.broadcast %cst_9 : f32 to vector<2x500xf32>
    %39 = arith.mulf %7, %38 : vector<2x500xf32>
    %cst_10 = arith.constant 0.000000e+00 : f32
    %40 = vector.broadcast %cst_10 : f32 to vector<2x500xf32>
    %41 = arith.select %37, %39, %40 : vector<2x500xi1>, vector<2x500xf32>
    %c0_11 = arith.constant 0 : index
    %c0_12 = arith.constant 0 : index
    %42 = vector.load %arg5[%c0_11, %c0_12] : memref<500x10xf32, #tpu.memory_space<vmem>>, vector<500x10xf32>
    %cst_13 = arith.constant dense<0.000000e+00> : vector<2x10xf32>
    %43 = tpu.matmul %41, %42, %cst_13 {dimension_numbers = #tpu.dot_dimension_numbers<[1], [0], [0], [1], [0, 0, 1, 1], [], []>} : vector<2x500xf32>, vector<500x10xf32>, vector<2x10xf32> -> vector<2x10xf32>
    %c0_14 = arith.constant 0 : index
    %c0_15 = arith.constant 0 : index
    %44 = vector.load %arg6[%c0_14, %c0_15] : memref<1x10xf32, #tpu.memory_space<vmem>>, vector<1x10xf32>
    %45 = vector.broadcast %44 : vector<1x10xf32> to vector<2x10xf32>
    %46 = arith.addf %43, %45 : vector<2x10xf32>
    %c0_16 = arith.constant 0 : index
    %c0_17 = arith.constant 0 : index
    %47 = vector.load %arg7[%c0_16, %c0_17] : memref<2x10xf32, #tpu.memory_space<vmem>>, vector<2x10xf32>
    tpu.vector_store %arg7[%c0_16, %c0_17], %46 {strides = array<i32>} : memref<2x10xf32, #tpu.memory_space<vmem>>, vector<2x10xf32>,
    return
  }
  func.func @transform_0(%arg0: i32, %arg1: memref<1xi32, #tpu.memory_space<smem>>) -> (i32, i32) {
    %c0_i32 = arith.constant 0 : i32
    %c0_i32_0 = arith.constant 0 : i32
    %c0_i32_1 = arith.constant 0 : i32
    return %c0_i32, %c0_i32_0 : i32, i32
  }
  func.func @transform_1(%arg0: i32, %arg1: memref<1xi32, #tpu.memory_space<smem>>) -> (i32, i32) {
    %c0_i32 = arith.constant 0 : i32
    %c0_i32_0 = arith.constant 0 : i32
    %c0_i32_1 = arith.constant 0 : i32
    return %c0_i32, %c0_i32_0 : i32, i32
  }
  func.func @transform_2(%arg0: i32, %arg1: memref<1xi32, #tpu.memory_space<smem>>) -> (i32, i32) {
    %c0_i32 = arith.constant 0 : i32
    %c0_i32_0 = arith.constant 0 : i32
    %c0_i32_1 = arith.constant 0 : i32
    return %c0_i32, %c0_i32_0 : i32, i32
  }
  func.func @transform_3(%arg0: i32, %arg1: memref<1xi32, #tpu.memory_space<smem>>) -> (i32, i32) {
    %c0_i32 = arith.constant 0 : i32
    %c0_i32_0 = arith.constant 0 : i32
    %c0_i32_1 = arith.constant 0 : i32
    return %c0_i32, %c0_i32_0 : i32, i32
  }
  func.func @transform_4(%arg0: i32, %arg1: memref<1xi32, #tpu.memory_space<smem>>) -> (i32, i32) {
    %c0_i32 = arith.constant 0 : i32
    %c0_i32_0 = arith.constant 0 : i32
    %c0_i32_1 = arith.constant 0 : i32
    return %c0_i32, %c0_i32_0 : i32, i32
  }
  func.func @transform_5(%arg0: i32, %arg1: memref<1xi32, #tpu.memory_space<smem>>) -> (i32, i32) {
    %c0_i32 = arith.constant 0 : i32
    %c0_i32_0 = arith.constant 0 : i32
    %c0_i32_1 = arith.constant 0 : i32
    return %c0_i32, %c0_i32_0 : i32, i32
  }
}

</mosaic_0001>

<bundles_post_ra>
// kernel: lenet_dropout_forward.3
= control target key start
LH: loop header
LB: loop body
LE: loop exit
PB: predicated region body
PF: predicated region fallthrough
CT: control target
= control target key end

     0   :  { %vm595_vm0 = vcmask 1040384   ;;  %vm162_vm1 = vcmask 203776   ;;  %vm1232_vm2 = vcmask 162816   ;;  %s2224_s1 = inlined_call_operand.vmem [shape: f32[25,20], index: 1, kind: input, shape index: {}]   ;;  %s2225_s0 = inlined_call_operand.vmem [shape: f32[1152,25], index: 0, kind: input, shape index: {}]   ;;  %s2226_s2 = inlined_call_operand.vmem [shape: f32[1,20], index: 2, kind: input, shape index: {}]   ;;  %s2227_s3 = inlined_call_operand.vmem [shape: f32[288,20], index: 3, kind: output, shape index: {}]  }
   0x1   :  { %v161_v0 = vld [vmem:[%s2224_s1 + $0x18] sm:$0x1]  ;;  %v160_v1 = vld [vmem:[%s2224_s1 + $0x10] sm:$0xff]  ;;  %v159_v2 = vld [vmem:[%s2224_s1 + $0x8] sm:$0xff] }
   0x2   :  { %1419 = vmatpush.msk.msra.mxu2 %vm595_vm0, %v161_v0  ;;  %1420 = vmatpush.msk.msra.mxu3 %vm595_vm0, %v161_v0  ;;  %v158_v3 = vld [vmem:[%s2224_s1] sm:$0xff]  ;;  %v87_v8 = vld [vmem:[%s2225_s0 + $0x248] sm:$0xff]  ;;  %v88_v12 = vld [vmem:[%s2225_s0 + $0x250] sm:$0xff] }
   0x3   :  { %1273 = vmatpush.msk.msra.mxu0 %vm595_vm0, %v161_v0  ;;  %1418 = vmatpush.msk.msra.mxu1 %vm595_vm0, %v161_v0  ;;  %v86_v4 = vld [vmem:[%s2225_s0 + $0x240] sm:$0xff]  ;;  %v123_v9 = vld [vmem:[%s2225_s0 + $0x368] sm:$0xff]  ;;  %v124_v13 = vld [vmem:[%s2225_s0 + $0x370] sm:$0xff] }
   0x4   :  { %1422 = vmatpush.msra.mxu2 %v160_v1  ;;  %1423 = vmatpush.msra.mxu3 %v160_v1  ;;  %v122_v5 = vld [vmem:[%s2225_s0 + $0x360] sm:$0xff]  ;;  %v15_v10 = vld [vmem:[%s2225_s0 + $0x8] sm:$0xff]  ;;  %v16_v14 = vld [vmem:[%s2225_s0 + $0x10] sm:$0xff] }
   0x5   :  { %612 = vmatpush.msra.mxu0 %v160_v1  ;;  %1421 = vmatpush.msra.mxu1 %v160_v1  ;;  %v14_v6 = vld [vmem:[%s2225_s0] sm:$0xff]  ;;  %v51_v11 = vld [vmem:[%s2225_s0 + $0x128] sm:$0xff]  ;;  %v52_v15 = vld [vmem:[%s2225_s0 + $0x130] sm:$0xff] }
   0x6   :  { %1425 = vmatpush.msra.mxu2 %v159_v2  ;;  %1426 = vmatpush.msra.mxu3 %v159_v2  ;;  %v50_v7 = vld [vmem:[%s2225_s0 + $0x120] sm:$0xff]  ;;  %v89_v16 = vld [vmem:[%s2225_s0 + $0x258] sm:$0xff]  ;;  %v91_v24 = vld [vmem:[%s2225_s0 + $0x268] sm:$0xff] }
   0x7   :  { %613 = vmatpush.msra.mxu0 %v159_v2  ;;  %1424 = vmatpush.msra.mxu1 %v159_v2  ;;  %v125_v17 = vld [vmem:[%s2225_s0 + $0x378] sm:$0xff]  ;;  %v90_v20 = vld [vmem:[%s2225_s0 + $0x260] sm:$0xff]  ;;  %v127_v25 = vld [vmem:[%s2225_s0 + $0x388] sm:$0xff] }
   0x8   :  { %1428 = vmatpush.msra.mxu2 %v158_v3  ;;  %1429 = vmatpush.msra.mxu3 %v158_v3  ;;  %v17_v18 = vld [vmem:[%s2225_s0 + $0x18] sm:$0xff]  ;;  %v126_v21 = vld [vmem:[%s2225_s0 + $0x380] sm:$0xff]  ;;  %v19_v26 = vld [vmem:[%s2225_s0 + $0x28] sm:$0xff] }
   0x9   :  { %1346 = vmatmul.msk.f32.vlgmr.msra.gmra.mxu2 %vm162_vm1, %v86_v4  ;;  %1382 = vmatmul.msk.f32.vlgmr.msra.gmra.mxu3 %vm162_vm1, %v122_v5  ;;  %v53_v19 = vld [vmem:[%s2225_s0 + $0x138] sm:$0xff]  ;;  %v18_v22 = vld [vmem:[%s2225_s0 + $0x20] sm:$0xff]  ;;  %v55_v27 = vld [vmem:[%s2225_s0 + $0x148] sm:$0xff] }
   0xa   :  { %614 = vmatpush.msra.mxu0 %v158_v3  ;;  %1427 = vmatpush.msra.mxu1 %v158_v3  ;;  %v54_v23 = vld [vmem:[%s2225_s0 + $0x140] sm:$0xff]  ;;  %v92_v28 = vld [vmem:[%s2225_s0 + $0x270] sm:$0xff]  ;;  %v93_v32 = vld [vmem:[%s2225_s0 + $0x278] sm:$0xff] }
   0xb   :  { %1274 = vmatmul.msk.f32.vlgmr.msra.gmra.mxu0 %vm162_vm1, %v14_v6  ;;  %1310 = vmatmul.msk.f32.vlgmr.msra.gmra.mxu1 %vm162_vm1, %v50_v7  ;;  %v128_v29 = vld [vmem:[%s2225_s0 + $0x390] sm:$0xff]  ;;  %v129_v33 = vld [vmem:[%s2225_s0 + $0x398] sm:$0xff]  ;;  %v94_v36 = vld [vmem:[%s2225_s0 + $0x280] sm:$0xff] }
   0xc   :  { %v20_v30 = vld [vmem:[%s2225_s0 + $0x30] sm:$0xff]  ;;  %v21_v34 = vld [vmem:[%s2225_s0 + $0x38] sm:$0xff]  ;;  %v130_v37 = vld [vmem:[%s2225_s0 + $0x3a0] sm:$0xff] }
   0xd   :  { %v56_v31 = vld [vmem:[%s2225_s0 + $0x150] sm:$0xff]  ;;  %v57_v35 = vld [vmem:[%s2225_s0 + $0x158] sm:$0xff]  ;;  %v22_v38 = vld [vmem:[%s2225_s0 + $0x40] sm:$0xff] }
   0xe   :  { %v58_v39 = vld [vmem:[%s2225_s0 + $0x160] sm:$0xff]  ;;  %v95_v40 = vld [vmem:[%s2225_s0 + $0x288] sm:$0xff]  ;;  %v96_v44 = vld [vmem:[%s2225_s0 + $0x290] sm:$0xff] }
   0xf   :  { %v131_v41 = vld [vmem:[%s2225_s0 + $0x3a8] sm:$0xff]  ;;  %v132_v45 = vld [vmem:[%s2225_s0 + $0x3b0] sm:$0xff]  ;;  %v97_v48 = vld [vmem:[%s2225_s0 + $0x298] sm:$0xff] }
  0x10   :  { %v23_v42 = vld [vmem:[%s2225_s0 + $0x48] sm:$0xff]  ;;  %v24_v46 = vld [vmem:[%s2225_s0 + $0x50] sm:$0xff]  ;;  %v133_v49 = vld [vmem:[%s2225_s0 + $0x3b8] sm:$0xff] }
  0x11   :  { %1347 = vmatmul.msk.f32.gmra.mxu2 %vm162_vm1, %v87_v8  ;;  %1383 = vmatmul.msk.f32.gmra.mxu3 %vm162_vm1, %v123_v9  ;;  %v59_v43 = vld [vmem:[%s2225_s0 + $0x168] sm:$0xff]  ;;  %v60_v47 = vld [vmem:[%s2225_s0 + $0x170] sm:$0xff]  ;;  %v25_v50 = vld [vmem:[%s2225_s0 + $0x58] sm:$0xff] }
  0x12   :  { %v61_v51 = vld [vmem:[%s2225_s0 + $0x178] sm:$0xff]  ;;  %v98_v52 = vld [vmem:[%s2225_s0 + $0x2a0] sm:$0xff]  ;;  %v99_v56 = vld [vmem:[%s2225_s0 + $0x2a8] sm:$0xff] }
  0x13   :  { %1275 = vmatmul.msk.f32.gmra.mxu0 %vm162_vm1, %v15_v10  ;;  %1311 = vmatmul.msk.f32.gmra.mxu1 %vm162_vm1, %v51_v11  ;;  %v134_v53 = vld [vmem:[%s2225_s0 + $0x3c0] sm:$0xff]  ;;  %v135_v57 = vld [vmem:[%s2225_s0 + $0x3c8] sm:$0xff]  ;;  %v100_v60 = vld [vmem:[%s2225_s0 + $0x2b0] sm:$0xff] }
  0x14   :  { %v26_v54 = vld [vmem:[%s2225_s0 + $0x60] sm:$0xff]  ;;  %v27_v58 = vld [vmem:[%s2225_s0 + $0x68] sm:$0xff]  ;;  %v136_v61 = vld [vmem:[%s2225_s0 + $0x3d0] sm:$0xff] }
  0x15   :  { %v62_v55 = vld [vmem:[%s2225_s0 + $0x180] sm:$0xff]  ;;  %v63_v59 = vld [vmem:[%s2225_s0 + $0x188] sm:$0xff]  ;;  %v28_v62 = vld [vmem:[%s2225_s0 + $0x70] sm:$0xff] }
  0x16   :  { %v64_v63 = vld [vmem:[%s2225_s0 + $0x190] sm:$0xff]  ;;  %v101_v0 = vld [vmem:[%s2225_s0 + $0x2b8] sm:$0xff]  ;;  %v102_v4 = vld [vmem:[%s2225_s0 + $0x2c0] sm:$0xff] }
  0x17   :  { %v137_v1 = vld [vmem:[%s2225_s0 + $0x3d8] sm:$0xff]  ;;  %v138_v5 = vld [vmem:[%s2225_s0 + $0x3e0] sm:$0xff] }
  0x18   :  { %v29_v2 = vld [vmem:[%s2225_s0 + $0x78] sm:$0xff]  ;;  %v30_v8 = vld [vmem:[%s2225_s0 + $0x80] sm:$0xff] }
  0x19   :  { %1348 = vmatmul.msk.f32.gmra.mxu2 %vm162_vm1, %v88_v12  ;;  %1384 = vmatmul.msk.f32.gmra.mxu3 %vm162_vm1, %v124_v13  ;;  %v65_v3 = vld [vmem:[%s2225_s0 + $0x198] sm:$0xff]  ;;  %v66_v9 = vld [vmem:[%s2225_s0 + $0x1a0] sm:$0xff] }
  0x1b   :  { %1276 = vmatmul.msk.f32.gmra.mxu0 %vm162_vm1, %v16_v14  ;;  %1312 = vmatmul.msk.f32.gmra.mxu1 %vm162_vm1, %v52_v15  ;;  %v1738_v14 = vld [vmem:[%s2226_s2] ss:$0 sm:$0xff]  ;;  %v103_v15 = vld [vmem:[%s2225_s0 + $0x2c8] sm:$0xff] }
  0x21   :  { %1349 = vmatmul.msk.f32.gmra.mxu2 %vm162_vm1, %v89_v16  ;;  %1385 = vmatmul.msk.f32.gmra.mxu3 %vm162_vm1, %v125_v17  ;;  %v139_v16 = vld [vmem:[%s2225_s0 + $0x3e8] sm:$0xff] }
  0x23   :  { %1277 = vmatmul.msk.f32.gmra.mxu0 %vm162_vm1, %v17_v18  ;;  %1313 = vmatmul.msk.f32.gmra.mxu1 %vm162_vm1, %v53_v19 }
  0x29   :  { %1350 = vmatmul.msk.f32.gmra.mxu2 %vm162_vm1, %v90_v20  ;;  %1386 = vmatmul.msk.f32.gmra.mxu3 %vm162_vm1, %v126_v21  ;;  %v31_v20 = vld [vmem:[%s2225_s0 + $0x88] sm:$0xff] }
  0x2a   :  { %v67_v21 = vld [vmem:[%s2225_s0 + $0x1a8] sm:$0xff] }
  0x2b   :  { %1278 = vmatmul.msk.f32.gmra.mxu0 %vm162_vm1, %v18_v22  ;;  %1314 = vmatmul.msk.f32.gmra.mxu1 %vm162_vm1, %v54_v23 }
  0x31   :  { %1351 = vmatmul.msk.f32.gmra.mxu2 %vm162_vm1, %v91_v24  ;;  %1387 = vmatmul.msk.f32.gmra.mxu3 %vm162_vm1, %v127_v25 }
  0x33   :  { %1279 = vmatmul.msk.f32.gmra.mxu0 %vm162_vm1, %v19_v26  ;;  %1315 = vmatmul.msk.f32.gmra.mxu1 %vm162_vm1, %v55_v27 }
  0x39   :  { %1352 = vmatmul.msk.f32.gmra.mxu2 %vm162_vm1, %v92_v28  ;;  %1388 = vmatmul.msk.f32.gmra.mxu3 %vm162_vm1, %v128_v29  ;;  %v104_v28 = vld [vmem:[%s2225_s0 + $0x2d0] sm:$0xff] }
  0x3a   :  { %v140_v29 = vld [vmem:[%s2225_s0 + $0x3f0] sm:$0xff] }
  0x3b   :  { %1280 = vmatmul.msk.f32.gmra.mxu0 %vm162_vm1, %v20_v30  ;;  %1316 = vmatmul.msk.f32.gmra.mxu1 %vm162_vm1, %v56_v31 }
  0x41   :  { %1353 = vmatmul.msk.f32.gmra.mxu2 %vm162_vm1, %v93_v32  ;;  %1389 = vmatmul.msk.f32.gmra.mxu3 %vm162_vm1, %v129_v33  ;;  %v32_v33 = vld [vmem:[%s2225_s0 + $0x90] sm:$0xff] }
  0x43   :  { %1281 = vmatmul.msk.f32.gmra.mxu0 %vm162_vm1, %v21_v34  ;;  %1317 = vmatmul.msk.f32.gmra.mxu1 %vm162_vm1, %v57_v35  ;;  %v68_v34 = vld [vmem:[%s2225_s0 + $0x1b0] sm:$0xff] }
  0x49   :  { %1354 = vmatmul.msk.f32.gmra.mxu2 %vm162_vm1, %v94_v36  ;;  %1390 = vmatmul.msk.f32.gmra.mxu3 %vm162_vm1, %v130_v37 }
  0x4b   :  { %1282 = vmatmul.msk.f32.gmra.mxu0 %vm162_vm1, %v22_v38  ;;  %1318 = vmatmul.msk.f32.gmra.mxu1 %vm162_vm1, %v58_v39 }
  0x51   :  { %1355 = vmatmul.msk.f32.gmra.mxu2 %vm162_vm1, %v95_v40  ;;  %1391 = vmatmul.msk.f32.gmra.mxu3 %vm162_vm1, %v131_v41  ;;  %v105_v41 = vld [vmem:[%s2225_s0 + $0x2d8] sm:$0xff] }
  0x53   :  { %1283 = vmatmul.msk.f32.gmra.mxu0 %vm162_vm1, %v23_v42  ;;  %1319 = vmatmul.msk.f32.gmra.mxu1 %vm162_vm1, %v59_v43  ;;  %v141_v42 = vld [vmem:[%s2225_s0 + $0x3f8] sm:$0xff] }
  0x59   :  { %1356 = vmatmul.msk.f32.gmra.mxu2 %vm162_vm1, %v96_v44  ;;  %1392 = vmatmul.msk.f32.gmra.mxu3 %vm162_vm1, %v132_v45 }
  0x5b   :  { %1284 = vmatmul.msk.f32.gmra.mxu0 %vm162_vm1, %v24_v46  ;;  %1320 = vmatmul.msk.f32.gmra.mxu1 %vm162_vm1, %v60_v47  ;;  %v33_v46 = vld [vmem:[%s2225_s0 + $0x98] sm:$0xff] }
  0x5c   :  { %v69_v47 = vld [vmem:[%s2225_s0 + $0x1b8] sm:$0xff] }
  0x61   :  { %1357 = vmatmul.msk.f32.gmra.mxu2 %vm162_vm1, %v97_v48  ;;  %1393 = vmatmul.msk.f32.gmra.mxu3 %vm162_vm1, %v133_v49 }
  0x63   :  { %1285 = vmatmul.msk.f32.gmra.mxu0 %vm162_vm1, %v25_v50  ;;  %1321 = vmatmul.msk.f32.gmra.mxu1 %vm162_vm1, %v61_v51 }
  0x69   :  { %1358 = vmatmul.msk.f32.gmra.mxu2 %vm162_vm1, %v98_v52  ;;  %1394 = vmatmul.msk.f32.gmra.mxu3 %vm162_vm1, %v134_v53 }
  0x6b   :  { %1286 = vmatmul.msk.f32.gmra.mxu0 %vm162_vm1, %v26_v54  ;;  %1322 = vmatmul.msk.f32.gmra.mxu1 %vm162_vm1, %v62_v55  ;;  %v106_v54 = vld [vmem:[%s2225_s0 + $0x2e0] sm:$0xff] }
  0x6c   :  { %v142_v55 = vld [vmem:[%s2225_s0 + $0x400] sm:$0xff] }
  0x71   :  { %1359 = vmatmul.msk.f32.gmra.mxu2 %vm162_vm1, %v99_v56  ;;  %1395 = vmatmul.msk.f32.gmra.mxu3 %vm162_vm1, %v135_v57 }
  0x73   :  { %1287 = vmatmul.msk.f32.gmra.mxu0 %vm162_vm1, %v27_v58  ;;  %1323 = vmatmul.msk.f32.gmra.mxu1 %vm162_vm1, %v63_v59  ;;  %v34_v59 = vld [vmem:[%s2225_s0 + $0xa0] sm:$0xff] }
  0x79   :  { %1360 = vmatmul.msk.f32.gmra.mxu2 %vm162_vm1, %v100_v60  ;;  %1396 = vmatmul.msk.f32.gmra.mxu3 %vm162_vm1, %v136_v61  ;;  %v70_v60 = vld [vmem:[%s2225_s0 + $0x1c0] sm:$0xff] }
  0x7b   :  { %1288 = vmatmul.msk.f32.gmra.mxu0 %vm162_vm1, %v28_v62  ;;  %1324 = vmatmul.msk.f32.gmra.mxu1 %vm162_vm1, %v64_v63 }
  0x81   :  { %1361 = vmatmul.msk.f32.gmra.mxu2 %vm162_vm1, %v101_v0  ;;  %1397 = vmatmul.msk.f32.gmra.mxu3 %vm162_vm1, %v137_v1 }
  0x83   :  { %1289 = vmatmul.msk.f32.gmra.mxu0 %vm162_vm1, %v29_v2  ;;  %1325 = vmatmul.msk.f32.gmra.mxu1 %vm162_vm1, %v65_v3  ;;  %v107_v3 = vld [vmem:[%s2225_s0 + $0x2e8] sm:$0xff] }
  0x88   :  { %v616_v6 = vpop.f32.mrf.mxu0  ;;  %v724_v7 = vpop.f32.mrf.mxu1 }
  0x89   :  { %1362 = vmatmul.msk.f32.gmra.mxu2 %vm162_vm1, %v102_v4  ;;  %1398 = vmatmul.msk.f32.gmra.mxu3 %vm162_vm1, %v138_v5  ;;  %v1048_v10 = vmax.f32 %v616_v6, %v724_v7  ;;  %v143_v4 = vld [vmem:[%s2225_s0 + $0x408] sm:$0xff] }
  0x8b   :  { %1290 = vmatmul.msk.f32.gmra.mxu0 %vm162_vm1, %v30_v8  ;;  %1326 = vmatmul.msk.f32.gmra.mxu1 %vm162_vm1, %v66_v9  ;;  %v35_v8 = vld [vmem:[%s2225_s0 + $0xa8] sm:$0xff] }
  0x8c   :  { %v832_v11 = vpop.f32.mrf.mxu2  ;;  %v940_v12 = vpop.f32.mrf.mxu3  ;;  %v71_v9 = vld [vmem:[%s2225_s0 + $0x1c8] sm:$0xff] }
  0x8d   :  { %v1084_v13 = vmax.f32 %v832_v11, %v940_v12 }
  0x8f   :  { %v1120_v17 = vmax.f32 %v1048_v10, %v1084_v13 }
  0x90   :  { %v619_v18 = vpop.f32.mrf.mxu0  ;;  %v727_v19 = vpop.f32.mrf.mxu1 }
  0x91   :  { %v1160_v22 = vadd.f32 %v1738_v14, %v1120_v17  ;;  %1363 = vmatmul.msk.f32.gmra.mxu2 %vm162_vm1, %v103_v15  ;;  %1399 = vmatmul.msk.f32.gmra.mxu3 %vm162_vm1, %v139_v16  ;;  %v1049_v24 = vmax.f32 %v619_v18, %v727_v19  ;;  %v108_v17 = vld [vmem:[%s2225_s0 + $0x2f0] sm:$0xff] }
  0x92   :  { %v144_v18 = vld [vmem:[%s2225_s0 + $0x410] sm:$0xff] }
  0x93   :  { %v1196_v23 = vmax.f32 %v1160_v22, 0.0  ;;  %1291 = vmatmul.msk.f32.gmra.mxu0 %vm162_vm1, %v31_v20  ;;  %1327 = vmatmul.msk.f32.gmra.mxu1 %vm162_vm1, %v67_v21  ;;  %v36_v22 = vld [vmem:[%s2225_s0 + $0xb0] sm:$0xff] }
  0x94   :  { %v835_v25 = vpop.f32.mrf.mxu2  ;;  %v943_v26 = vpop.f32.mrf.mxu3 }
  0x95   :  { %1233 = vst.msk [vmem:[%s2227_s3] sm:$0xff] %vm1232_vm2, %v1196_v23  ;;  %v1085_v27 = vmax.f32 %v835_v25, %v943_v26  ;;  %v72_v23 = vld [vmem:[%s2225_s0 + $0x1d0] sm:$0xff] }
  0x97   :  { %v1121_v30 = vmax.f32 %v1049_v24, %v1085_v27 }
  0x98   :  { %v622_v31 = vpop.f32.mrf.mxu0  ;;  %v730_v32 = vpop.f32.mrf.mxu1 }
  0x99   :  { %v1161_v35 = vadd.f32 %v1738_v14, %v1121_v30  ;;  %1364 = vmatmul.msk.f32.gmra.mxu2 %vm162_vm1, %v104_v28  ;;  %1400 = vmatmul.msk.f32.gmra.mxu3 %vm162_vm1, %v140_v29  ;;  %v1050_v37 = vmax.f32 %v622_v31, %v730_v32  ;;  %v109_v30 = vld [vmem:[%s2225_s0 + $0x2f8] sm:$0xff] }
  0x9a   :  { %v145_v31 = vld [vmem:[%s2225_s0 + $0x418] sm:$0xff] }
  0x9b   :  { %v1197_v36 = vmax.f32 %v1161_v35, 0.0  ;;  %1292 = vmatmul.msk.f32.gmra.mxu0 %vm162_vm1, %v32_v33  ;;  %1328 = vmatmul.msk.f32.gmra.mxu1 %vm162_vm1, %v68_v34  ;;  %v37_v35 = vld [vmem:[%s2225_s0 + $0xb8] sm:$0xff] }
  0x9c   :  { %v838_v38 = vpop.f32.mrf.mxu2  ;;  %v946_v39 = vpop.f32.mrf.mxu3 }
  0x9d   :  { %1234 = vst.msk [vmem:[%s2227_s3 + $0x8] sm:$0xff] %vm1232_vm2, %v1197_v36  ;;  %v1086_v40 = vmax.f32 %v838_v38, %v946_v39  ;;  %v73_v36 = vld [vmem:[%s2225_s0 + $0x1d8] sm:$0xff] }
  0x9f   :  { %v1122_v43 = vmax.f32 %v1050_v37, %v1086_v40 }
  0xa0   :  { %v625_v44 = vpop.f32.mrf.mxu0  ;;  %v733_v45 = vpop.f32.mrf.mxu1 }
  0xa1   :  { %v1162_v48 = vadd.f32 %v1738_v14, %v1122_v43  ;;  %1365 = vmatmul.msk.f32.gmra.mxu2 %vm162_vm1, %v105_v41  ;;  %1401 = vmatmul.msk.f32.gmra.mxu3 %vm162_vm1, %v141_v42  ;;  %v1051_v50 = vmax.f32 %v625_v44, %v733_v45  ;;  %v110_v43 = vld [vmem:[%s2225_s0 + $0x300] sm:$0xff] }
  0xa2   :  { %v146_v44 = vld [vmem:[%s2225_s0 + $0x420] sm:$0xff] }
  0xa3   :  { %v1198_v49 = vmax.f32 %v1162_v48, 0.0  ;;  %1293 = vmatmul.msk.f32.gmra.mxu0 %vm162_vm1, %v33_v46  ;;  %1329 = vmatmul.msk.f32.gmra.mxu1 %vm162_vm1, %v69_v47  ;;  %v38_v48 = vld [vmem:[%s2225_s0 + $0xc0] sm:$0xff] }
  0xa4   :  { %v841_v51 = vpop.f32.mrf.mxu2  ;;  %v949_v52 = vpop.f32.mrf.mxu3 }
  0xa5   :  { %1235 = vst.msk [vmem:[%s2227_s3 + $0x10] sm:$0xff] %vm1232_vm2, %v1198_v49  ;;  %v1087_v53 = vmax.f32 %v841_v51, %v949_v52  ;;  %v74_v49 = vld [vmem:[%s2225_s0 + $0x1e0] sm:$0xff] }
  0xa7   :  { %v1123_v56 = vmax.f32 %v1051_v50, %v1087_v53 }
  0xa8   :  { %v628_v57 = vpop.f32.mrf.mxu0  ;;  %v736_v58 = vpop.f32.mrf.mxu1 }
  0xa9   :  { %v1163_v61 = vadd.f32 %v1738_v14, %v1123_v56  ;;  %1366 = vmatmul.msk.f32.gmra.mxu2 %vm162_vm1, %v106_v54  ;;  %1402 = vmatmul.msk.f32.gmra.mxu3 %vm162_vm1, %v142_v55  ;;  %v1052_v63 = vmax.f32 %v628_v57, %v736_v58  ;;  %v111_v56 = vld [vmem:[%s2225_s0 + $0x308] sm:$0xff] }
  0xaa   :  { %v147_v57 = vld [vmem:[%s2225_s0 + $0x428] sm:$0xff] }
  0xab   :  { %v1199_v62 = vmax.f32 %v1163_v61, 0.0  ;;  %1294 = vmatmul.msk.f32.gmra.mxu0 %vm162_vm1, %v34_v59  ;;  %1330 = vmatmul.msk.f32.gmra.mxu1 %vm162_vm1, %v70_v60  ;;  %v39_v61 = vld [vmem:[%s2225_s0 + $0xc8] sm:$0xff] }
  0xac   :  { %v844_v0 = vpop.f32.mrf.mxu2  ;;  %v952_v1 = vpop.f32.mrf.mxu3 }
  0xad   :  { %1236 = vst.msk [vmem:[%s2227_s3 + $0x18] sm:$0xff] %vm1232_vm2, %v1199_v62  ;;  %v1088_v2 = vmax.f32 %v844_v0, %v952_v1  ;;  %v75_v62 = vld [vmem:[%s2225_s0 + $0x1e8] sm:$0xff] }
  0xaf   :  { %v1124_v5 = vmax.f32 %v1052_v63, %v1088_v2 }
  0xb0   :  { %v631_v6 = vpop.f32.mrf.mxu0  ;;  %v739_v7 = vpop.f32.mrf.mxu1 }
  0xb1   :  { %v1164_v10 = vadd.f32 %v1738_v14, %v1124_v5  ;;  %1367 = vmatmul.msk.f32.gmra.mxu2 %vm162_vm1, %v107_v3  ;;  %1403 = vmatmul.msk.f32.gmra.mxu3 %vm162_vm1, %v143_v4  ;;  %v1053_v12 = vmax.f32 %v631_v6, %v739_v7  ;;  %v112_v5 = vld [vmem:[%s2225_s0 + $0x310] sm:$0xff] }
  0xb2   :  { %v148_v6 = vld [vmem:[%s2225_s0 + $0x430] sm:$0xff] }
  0xb3   :  { %v1200_v11 = vmax.f32 %v1164_v10, 0.0  ;;  %1295 = vmatmul.msk.f32.gmra.mxu0 %vm162_vm1, %v35_v8  ;;  %1331 = vmatmul.msk.f32.gmra.mxu1 %vm162_vm1, %v71_v9  ;;  %v40_v10 = vld [vmem:[%s2225_s0 + $0xd0] sm:$0xff] }
  0xb4   :  { %v847_v13 = vpop.f32.mrf.mxu2  ;;  %v955_v15 = vpop.f32.mrf.mxu3 }
  0xb5   :  { %1237 = vst.msk [vmem:[%s2227_s3 + $0x20] sm:$0xff] %vm1232_vm2, %v1200_v11  ;;  %v1089_v16 = vmax.f32 %v847_v13, %v955_v15  ;;  %v76_v11 = vld [vmem:[%s2225_s0 + $0x1f0] sm:$0xff] }
  0xb7   :  { %v1125_v19 = vmax.f32 %v1053_v12, %v1089_v16 }
  0xb8   :  { %v634_v20 = vpop.f32.mrf.mxu0  ;;  %v742_v21 = vpop.f32.mrf.mxu1 }
  0xb9   :  { %v1165_v24 = vadd.f32 %v1738_v14, %v1125_v19  ;;  %1368 = vmatmul.msk.f32.gmra.mxu2 %vm162_vm1, %v108_v17  ;;  %1404 = vmatmul.msk.f32.gmra.mxu3 %vm162_vm1, %v144_v18  ;;  %v1054_v26 = vmax.f32 %v634_v20, %v742_v21  ;;  %v113_v19 = vld [vmem:[%s2225_s0 + $0x318] sm:$0xff] }
  0xba   :  { %v149_v20 = vld [vmem:[%s2225_s0 + $0x438] sm:$0xff] }
  0xbb   :  { %v1201_v25 = vmax.f32 %v1165_v24, 0.0  ;;  %1296 = vmatmul.msk.f32.gmra.mxu0 %vm162_vm1, %v36_v22  ;;  %1332 = vmatmul.msk.f32.gmra.mxu1 %vm162_vm1, %v72_v23  ;;  %v41_v24 = vld [vmem:[%s2225_s0 + $0xd8] sm:$0xff] }
  0xbc   :  { %v850_v27 = vpop.f32.mrf.mxu2  ;;  %v958_v28 = vpop.f32.mrf.mxu3 }
  0xbd   :  { %1238 = vst.msk [vmem:[%s2227_s3 + $0x28] sm:$0xff] %vm1232_vm2, %v1201_v25  ;;  %v1090_v29 = vmax.f32 %v850_v27, %v958_v28  ;;  %v77_v25 = vld [vmem:[%s2225_s0 + $0x1f8] sm:$0xff] }
  0xbf   :  { %v1126_v32 = vmax.f32 %v1054_v26, %v1090_v29 }
  0xc0   :  { %v637_v33 = vpop.f32.mrf.mxu0  ;;  %v745_v34 = vpop.f32.mrf.mxu1 }
  0xc1   :  { %v1166_v37 = vadd.f32 %v1738_v14, %v1126_v32  ;;  %1369 = vmatmul.msk.f32.gmra.mxu2 %vm162_vm1, %v109_v30  ;;  %1405 = vmatmul.msk.f32.gmra.mxu3 %vm162_vm1, %v145_v31  ;;  %v1055_v39 = vmax.f32 %v637_v33, %v745_v34  ;;  %v114_v32 = vld [vmem:[%s2225_s0 + $0x320] sm:$0xff] }
  0xc2   :  { %v150_v33 = vld [vmem:[%s2225_s0 + $0x440] sm:$0xff] }
  0xc3   :  { %v1202_v38 = vmax.f32 %v1166_v37, 0.0  ;;  %1297 = vmatmul.msk.f32.gmra.mxu0 %vm162_vm1, %v37_v35  ;;  %1333 = vmatmul.msk.f32.gmra.mxu1 %vm162_vm1, %v73_v36  ;;  %v42_v37 = vld [vmem:[%s2225_s0 + $0xe0] sm:$0xff] }
  0xc4   :  { %v853_v40 = vpop.f32.mrf.mxu2  ;;  %v961_v41 = vpop.f32.mrf.mxu3 }
  0xc5   :  { %1239 = vst.msk [vmem:[%s2227_s3 + $0x30] sm:$0xff] %vm1232_vm2, %v1202_v38  ;;  %v1091_v42 = vmax.f32 %v853_v40, %v961_v41  ;;  %v78_v38 = vld [vmem:[%s2225_s0 + $0x200] sm:$0xff] }
  0xc7   :  { %v1127_v45 = vmax.f32 %v1055_v39, %v1091_v42 }
  0xc8   :  { %v640_v46 = vpop.f32.mrf.mxu0  ;;  %v748_v47 = vpop.f32.mrf.mxu1 }
  0xc9   :  { %v1167_v50 = vadd.f32 %v1738_v14, %v1127_v45  ;;  %1370 = vmatmul.msk.f32.gmra.mxu2 %vm162_vm1, %v110_v43  ;;  %1406 = vmatmul.msk.f32.gmra.mxu3 %vm162_vm1, %v146_v44  ;;  %v1056_v52 = vmax.f32 %v640_v46, %v748_v47  ;;  %v115_v45 = vld [vmem:[%s2225_s0 + $0x328] sm:$0xff] }
  0xca   :  { %v151_v46 = vld [vmem:[%s2225_s0 + $0x448] sm:$0xff] }
  0xcb   :  { %v1203_v51 = vmax.f32 %v1167_v50, 0.0  ;;  %1298 = vmatmul.msk.f32.gmra.mxu0 %vm162_vm1, %v38_v48  ;;  %1334 = vmatmul.msk.f32.gmra.mxu1 %vm162_vm1, %v74_v49  ;;  %v43_v50 = vld [vmem:[%s2225_s0 + $0xe8] sm:$0xff] }
  0xcc   :  { %v856_v53 = vpop.f32.mrf.mxu2  ;;  %v964_v54 = vpop.f32.mrf.mxu3 }
  0xcd   :  { %1240 = vst.msk [vmem:[%s2227_s3 + $0x38] sm:$0xff] %vm1232_vm2, %v1203_v51  ;;  %v1092_v55 = vmax.f32 %v856_v53, %v964_v54  ;;  %v79_v51 = vld [vmem:[%s2225_s0 + $0x208] sm:$0xff] }
  0xcf   :  { %v1128_v58 = vmax.f32 %v1056_v52, %v1092_v55 }
  0xd0   :  { %v643_v59 = vpop.f32.mrf.mxu0  ;;  %v751_v60 = vpop.f32.mrf.mxu1 }
  0xd1   :  { %v1168_v63 = vadd.f32 %v1738_v14, %v1128_v58  ;;  %1371 = vmatmul.msk.f32.gmra.mxu2 %vm162_vm1, %v111_v56  ;;  %1407 = vmatmul.msk.f32.gmra.mxu3 %vm162_vm1, %v147_v57  ;;  %v1057_v1 = vmax.f32 %v643_v59, %v751_v60  ;;  %v116_v58 = vld [vmem:[%s2225_s0 + $0x330] sm:$0xff] }
  0xd2   :  { %v152_v59 = vld [vmem:[%s2225_s0 + $0x450] sm:$0xff] }
  0xd3   :  { %v1204_v0 = vmax.f32 %v1168_v63, 0.0  ;;  %1299 = vmatmul.msk.f32.gmra.mxu0 %vm162_vm1, %v39_v61  ;;  %1335 = vmatmul.msk.f32.gmra.mxu1 %vm162_vm1, %v75_v62  ;;  %v44_v63 = vld [vmem:[%s2225_s0 + $0xf0] sm:$0xff] }
  0xd4   :  { %v859_v2 = vpop.f32.mrf.mxu2  ;;  %v967_v3 = vpop.f32.mrf.mxu3 }
  0xd5   :  { %1241 = vst.msk [vmem:[%s2227_s3 + $0x40] sm:$0xff] %vm1232_vm2, %v1204_v0  ;;  %v1093_v4 = vmax.f32 %v859_v2, %v967_v3  ;;  %v80_v0 = vld [vmem:[%s2225_s0 + $0x210] sm:$0xff] }
  0xd7   :  { %v1129_v7 = vmax.f32 %v1057_v1, %v1093_v4 }
  0xd8   :  { %v646_v8 = vpop.f32.mrf.mxu0  ;;  %v754_v9 = vpop.f32.mrf.mxu1 }
  0xd9   :  { %v1169_v12 = vadd.f32 %v1738_v14, %v1129_v7  ;;  %1372 = vmatmul.msk.f32.gmra.mxu2 %vm162_vm1, %v112_v5  ;;  %1408 = vmatmul.msk.f32.gmra.mxu3 %vm162_vm1, %v148_v6  ;;  %v1058_v15 = vmax.f32 %v646_v8, %v754_v9  ;;  %v117_v7 = vld [vmem:[%s2225_s0 + $0x338] sm:$0xff] }
  0xda   :  { %v153_v8 = vld [vmem:[%s2225_s0 + $0x458] sm:$0xff] }
  0xdb   :  { %v1205_v13 = vmax.f32 %v1169_v12, 0.0  ;;  %1300 = vmatmul.msk.f32.gmra.mxu0 %vm162_vm1, %v40_v10  ;;  %1336 = vmatmul.msk.f32.gmra.mxu1 %vm162_vm1, %v76_v11  ;;  %v45_v12 = vld [vmem:[%s2225_s0 + $0xf8] sm:$0xff] }
  0xdc   :  { %v862_v16 = vpop.f32.mrf.mxu2  ;;  %v970_v17 = vpop.f32.mrf.mxu3 }
  0xdd   :  { %1242 = vst.msk [vmem:[%s2227_s3 + $0x48] sm:$0xff] %vm1232_vm2, %v1205_v13  ;;  %v1094_v18 = vmax.f32 %v862_v16, %v970_v17  ;;  %v81_v13 = vld [vmem:[%s2225_s0 + $0x218] sm:$0xff] }
  0xdf   :  { %v1130_v21 = vmax.f32 %v1058_v15, %v1094_v18 }
  0xe0   :  { %v649_v22 = vpop.f32.mrf.mxu0  ;;  %v757_v23 = vpop.f32.mrf.mxu1 }
  0xe1   :  { %v1170_v26 = vadd.f32 %v1738_v14, %v1130_v21  ;;  %1373 = vmatmul.msk.f32.gmra.mxu2 %vm162_vm1, %v113_v19  ;;  %1409 = vmatmul.msk.f32.gmra.mxu3 %vm162_vm1, %v149_v20  ;;  %v1059_v28 = vmax.f32 %v649_v22, %v757_v23  ;;  %v118_v21 = vld [vmem:[%s2225_s0 + $0x340] sm:$0xff] }
  0xe2   :  { %v154_v22 = vld [vmem:[%s2225_s0 + $0x460] sm:$0xff] }
  0xe3   :  { %v1206_v27 = vmax.f32 %v1170_v26, 0.0  ;;  %1301 = vmatmul.msk.f32.gmra.mxu0 %vm162_vm1, %v41_v24  ;;  %1337 = vmatmul.msk.f32.gmra.mxu1 %vm162_vm1, %v77_v25  ;;  %v46_v26 = vld [vmem:[%s2225_s0 + $0x100] sm:$0xff] }
  0xe4   :  { %v865_v29 = vpop.f32.mrf.mxu2  ;;  %v973_v30 = vpop.f32.mrf.mxu3 }
  0xe5   :  { %1243 = vst.msk [vmem:[%s2227_s3 + $0x50] sm:$0xff] %vm1232_vm2, %v1206_v27  ;;  %v1095_v31 = vmax.f32 %v865_v29, %v973_v30  ;;  %v82_v27 = vld [vmem:[%s2225_s0 + $0x220] sm:$0xff] }
  0xe7   :  { %v1131_v34 = vmax.f32 %v1059_v28, %v1095_v31 }
  0xe8   :  { %v652_v35 = vpop.f32.mrf.mxu0  ;;  %v760_v36 = vpop.f32.mrf.mxu1 }
  0xe9   :  { %v1171_v39 = vadd.f32 %v1738_v14, %v1131_v34  ;;  %1374 = vmatmul.msk.f32.gmra.mxu2 %vm162_vm1, %v114_v32  ;;  %1410 = vmatmul.msk.f32.gmra.mxu3 %vm162_vm1, %v150_v33  ;;  %v1060_v41 = vmax.f32 %v652_v35, %v760_v36  ;;  %v119_v34 = vld [vmem:[%s2225_s0 + $0x348] sm:$0xff] }
  0xea   :  { %v155_v35 = vld [vmem:[%s2225_s0 + $0x468] sm:$0xff] }
  0xeb   :  { %v1207_v40 = vmax.f32 %v1171_v39, 0.0  ;;  %1302 = vmatmul.msk.f32.gmra.mxu0 %vm162_vm1, %v42_v37  ;;  %1338 = vmatmul.msk.f32.gmra.mxu1 %vm162_vm1, %v78_v38  ;;  %v47_v39 = vld [vmem:[%s2225_s0 + $0x108] sm:$0xff] }
  0xec   :  { %v868_v42 = vpop.f32.mrf.mxu2  ;;  %v976_v43 = vpop.f32.mrf.mxu3 }
  0xed   :  { %1244 = vst.msk [vmem:[%s2227_s3 + $0x58] sm:$0xff] %vm1232_vm2, %v1207_v40  ;;  %v1096_v44 = vmax.f32 %v868_v42, %v976_v43  ;;  %v83_v40 = vld [vmem:[%s2225_s0 + $0x228] sm:$0xff] }
  0xef   :  { %v1132_v47 = vmax.f32 %v1060_v41, %v1096_v44 }
  0xf0   :  { %v655_v48 = vpop.f32.mrf.mxu0  ;;  %v763_v49 = vpop.f32.mrf.mxu1 }
  0xf1   :  { %v1172_v52 = vadd.f32 %v1738_v14, %v1132_v47  ;;  %1375 = vmatmul.msk.f32.gmra.mxu2 %vm162_vm1, %v115_v45  ;;  %1411 = vmatmul.msk.f32.gmra.mxu3 %vm162_vm1, %v151_v46  ;;  %v1061_v54 = vmax.f32 %v655_v48, %v763_v49  ;;  %v120_v47 = vld [vmem:[%s2225_s0 + $0x350] sm:$0xff] }
  0xf2   :  { %v156_v48 = vld [vmem:[%s2225_s0 + $0x470] sm:$0xff] }
  0xf3   :  { %v1208_v53 = vmax.f32 %v1172_v52, 0.0  ;;  %1303 = vmatmul.msk.f32.gmra.mxu0 %vm162_vm1, %v43_v50  ;;  %1339 = vmatmul.msk.f32.gmra.mxu1 %vm162_vm1, %v79_v51  ;;  %v48_v52 = vld [vmem:[%s2225_s0 + $0x110] sm:$0xff] }
  0xf4   :  { %v871_v55 = vpop.f32.mrf.mxu2  ;;  %v979_v56 = vpop.f32.mrf.mxu3 }
  0xf5   :  { %1245 = vst.msk [vmem:[%s2227_s3 + $0x60] sm:$0xff] %vm1232_vm2, %v1208_v53  ;;  %v1097_v57 = vmax.f32 %v871_v55, %v979_v56  ;;  %v84_v53 = vld [vmem:[%s2225_s0 + $0x230] sm:$0xff] }
  0xf7   :  { %v1133_v60 = vmax.f32 %v1061_v54, %v1097_v57 }
  0xf8   :  { %v658_v61 = vpop.f32.mrf.mxu0  ;;  %v766_v62 = vpop.f32.mrf.mxu1 }
  0xf9   :  { %v1173_v1 = vadd.f32 %v1738_v14, %v1133_v60  ;;  %1376 = vmatmul.msk.f32.gmra.mxu2 %vm162_vm1, %v116_v58  ;;  %1412 = vmatmul.msk.f32.gmra.mxu3 %vm162_vm1, %v152_v59  ;;  %v1062_v3 = vmax.f32 %v658_v61, %v766_v62  ;;  %v121_v60 = vld [vmem:[%s2225_s0 + $0x358] sm:$0xff] }
  0xfa   :  { %v157_v61 = vld [vmem:[%s2225_s0 + $0x478] sm:$0xff] }
  0xfb   :  { %v1209_v2 = vmax.f32 %v1173_v1, 0.0  ;;  %1304 = vmatmul.msk.f32.gmra.mxu0 %vm162_vm1, %v44_v63  ;;  %1340 = vmatmul.msk.f32.gmra.mxu1 %vm162_vm1, %v80_v0  ;;  %v49_v1 = vld [vmem:[%s2225_s0 + $0x118] sm:$0xff] }
  0xfc   :  { %v874_v4 = vpop.f32.mrf.mxu2  ;;  %v982_v5 = vpop.f32.mrf.mxu3 }
  0xfd   :  { %1246 = vst.msk [vmem:[%s2227_s3 + $0x68] sm:$0xff] %vm1232_vm2, %v1209_v2  ;;  %v1098_v6 = vmax.f32 %v874_v4, %v982_v5  ;;  %v85_v2 = vld [vmem:[%s2225_s0 + $0x238] sm:$0xff] }
  0xff   :  { %v1134_v9 = vmax.f32 %v1062_v3, %v1098_v6 }
 0x100   :  { %v661_v10 = vpop.f32.mrf.mxu0  ;;  %v769_v11 = vpop.f32.mrf.mxu1 }
 0x101   :  { %v1174_v15 = vadd.f32 %v1738_v14, %v1134_v9  ;;  %1377 = vmatmul.msk.f32.gmra.mxu2 %vm162_vm1, %v117_v7  ;;  %1413 = vmatmul.msk.f32.gmra.mxu3 %vm162_vm1, %v153_v8  ;;  %v1063_v17 = vmax.f32 %v661_v10, %v769_v11 }
 0x103   :  { %v1210_v16 = vmax.f32 %v1174_v15, 0.0  ;;  %1305 = vmatmul.msk.f32.gmra.mxu0 %vm162_vm1, %v45_v12  ;;  %1341 = vmatmul.msk.f32.gmra.mxu1 %vm162_vm1, %v81_v13 }
 0x104   :  { %v877_v18 = vpop.f32.mrf.mxu2  ;;  %v985_v19 = vpop.f32.mrf.mxu3 }
 0x105   :  { %1247 = vst.msk [vmem:[%s2227_s3 + $0x70] sm:$0xff] %vm1232_vm2, %v1210_v16  ;;  %v1099_v20 = vmax.f32 %v877_v18, %v985_v19 }
 0x107   :  { %v1135_v23 = vmax.f32 %v1063_v17, %v1099_v20 }
 0x108   :  { %v664_v24 = vpop.f32.mrf.mxu0  ;;  %v772_v25 = vpop.f32.mrf.mxu1 }
 0x109   :  { %v1175_v28 = vadd.f32 %v1738_v14, %v1135_v23  ;;  %1378 = vmatmul.msk.f32.gmra.mxu2 %vm162_vm1, %v118_v21  ;;  %1414 = vmatmul.msk.f32.gmra.mxu3 %vm162_vm1, %v154_v22  ;;  %v1064_v30 = vmax.f32 %v664_v24, %v772_v25 }
 0x10b   :  { %v1211_v29 = vmax.f32 %v1175_v28, 0.0  ;;  %1306 = vmatmul.msk.f32.gmra.mxu0 %vm162_vm1, %v46_v26  ;;  %1342 = vmatmul.msk.f32.gmra.mxu1 %vm162_vm1, %v82_v27 }
 0x10c   :  { %v880_v31 = vpop.f32.mrf.mxu2  ;;  %v988_v32 = vpop.f32.mrf.mxu3 }
 0x10d   :  { %1248 = vst.msk [vmem:[%s2227_s3 + $0x78] sm:$0xff] %vm1232_vm2, %v1211_v29  ;;  %v1100_v33 = vmax.f32 %v880_v31, %v988_v32 }
 0x10f   :  { %v1136_v36 = vmax.f32 %v1064_v30, %v1100_v33 }
 0x110   :  { %v667_v37 = vpop.f32.mrf.mxu0  ;;  %v775_v38 = vpop.f32.mrf.mxu1 }
 0x111   :  { %v1176_v41 = vadd.f32 %v1738_v14, %v1136_v36  ;;  %1379 = vmatmul.msk.f32.gmra.mxu2 %vm162_vm1, %v119_v34  ;;  %1415 = vmatmul.msk.f32.gmra.mxu3 %vm162_vm1, %v155_v35  ;;  %v1065_v43 = vmax.f32 %v667_v37, %v775_v38 }
 0x113   :  { %v1212_v42 = vmax.f32 %v1176_v41, 0.0  ;;  %1307 = vmatmul.msk.f32.gmra.mxu0 %vm162_vm1, %v47_v39  ;;  %1343 = vmatmul.msk.f32.gmra.mxu1 %vm162_vm1, %v83_v40 }
 0x114   :  { %v883_v44 = vpop.f32.mrf.mxu2  ;;  %v991_v45 = vpop.f32.mrf.mxu3 }
 0x115   :  { %1249 = vst.msk [vmem:[%s2227_s3 + $0x80] sm:$0xff] %vm1232_vm2, %v1212_v42  ;;  %v1101_v46 = vmax.f32 %v883_v44, %v991_v45 }
 0x117   :  { %v1137_v49 = vmax.f32 %v1065_v43, %v1101_v46 }
 0x118   :  { %v670_v50 = vpop.f32.mrf.mxu0  ;;  %v778_v51 = vpop.f32.mrf.mxu1 }
 0x119   :  { %v1177_v54 = vadd.f32 %v1738_v14, %v1137_v49  ;;  %1380 = vmatmul.msk.f32.gmra.mxu2 %vm162_vm1, %v120_v47  ;;  %1416 = vmatmul.msk.f32.gmra.mxu3 %vm162_vm1, %v156_v48  ;;  %v1066_v56 = vmax.f32 %v670_v50, %v778_v51 }
 0x11b   :  { %v1213_v55 = vmax.f32 %v1177_v54, 0.0  ;;  %1308 = vmatmul.msk.f32.gmra.mxu0 %vm162_vm1, %v48_v52  ;;  %1344 = vmatmul.msk.f32.gmra.mxu1 %vm162_vm1, %v84_v53 }
 0x11c   :  { %v886_v57 = vpop.f32.mrf.mxu2  ;;  %v994_v58 = vpop.f32.mrf.mxu3 }
 0x11d   :  { %1250 = vst.msk [vmem:[%s2227_s3 + $0x88] sm:$0xff] %vm1232_vm2, %v1213_v55  ;;  %v1102_v59 = vmax.f32 %v886_v57, %v994_v58 }
 0x11f   :  { %v1138_v62 = vmax.f32 %v1066_v56, %v1102_v59 }
 0x120   :  { %v673_v63 = vpop.f32.mrf.mxu0  ;;  %v781_v0 = vpop.f32.mrf.mxu1 }
 0x121   :  { %v1178_v3 = vadd.f32 %v1738_v14, %v1138_v62  ;;  %1381 = vmatmul.msk.f32.gmra.mxu2 %vm162_vm1, %v121_v60  ;;  %1417 = vmatmul.msk.f32.gmra.mxu3 %vm162_vm1, %v157_v61  ;;  %v1067_v5 = vmax.f32 %v673_v63, %v781_v0 }
 0x123   :  { %v1214_v4 = vmax.f32 %v1178_v3, 0.0  ;;  %1309 = vmatmul.msk.f32.gmra.mxu0 %vm162_vm1, %v49_v1  ;;  %1345 = vmatmul.msk.f32.gmra.mxu1 %vm162_vm1, %v85_v2 }
 0x124   :  { %v889_v6 = vpop.f32.mrf.mxu2  ;;  %v997_v7 = vpop.f32.mrf.mxu3 }
 0x125   :  { %1251 = vst.msk [vmem:[%s2227_s3 + $0x90] sm:$0xff] %vm1232_vm2, %v1214_v4  ;;  %v1103_v8 = vmax.f32 %v889_v6, %v997_v7 }
 0x127   :  { %v1139_v9 = vmax.f32 %v1067_v5, %v1103_v8 }
 0x128   :  { %v676_v10 = vpop.f32.mrf.mxu0  ;;  %v784_v11 = vpop.f32.mrf.mxu1 }
 0x129   :  { %v1179_v12 = vadd.f32 %v1738_v14, %v1139_v9  ;;  %v1068_v15 = vmax.f32 %v676_v10, %v784_v11 }
 0x12b   :  { %v1215_v13 = vmax.f32 %v1179_v12, 0.0 }
 0x12c   :  { %v892_v16 = vpop.f32.mrf.mxu2  ;;  %v1000_v17 = vpop.f32.mrf.mxu3 }
 0x12d   :  { %1252 = vst.msk [vmem:[%s2227_s3 + $0x98] sm:$0xff] %vm1232_vm2, %v1215_v13  ;;  %v1104_v18 = vmax.f32 %v892_v16, %v1000_v17 }
 0x12f   :  { %v1140_v19 = vmax.f32 %v1068_v15, %v1104_v18 }
 0x130   :  { %v679_v20 = vpop.f32.mrf.mxu0  ;;  %v787_v21 = vpop.f32.mrf.mxu1 }
 0x131   :  { %v1180_v22 = vadd.f32 %v1738_v14, %v1140_v19  ;;  %v1069_v24 = vmax.f32 %v679_v20, %v787_v21 }
 0x133   :  { %v1216_v23 = vmax.f32 %v1180_v22, 0.0 }
 0x134   :  { %v895_v25 = vpop.f32.mrf.mxu2  ;;  %v1003_v26 = vpop.f32.mrf.mxu3 }
 0x135   :  { %1253 = vst.msk [vmem:[%s2227_s3 + $0xa0] sm:$0xff] %vm1232_vm2, %v1216_v23  ;;  %v1105_v27 = vmax.f32 %v895_v25, %v1003_v26 }
 0x137   :  { %v1141_v28 = vmax.f32 %v1069_v24, %v1105_v27 }
 0x138   :  { %v682_v29 = vpop.f32.mrf.mxu0  ;;  %v790_v30 = vpop.f32.mrf.mxu1 }
 0x139   :  { %v1181_v31 = vadd.f32 %v1738_v14, %v1141_v28  ;;  %v1070_v33 = vmax.f32 %v682_v29, %v790_v30 }
 0x13b   :  { %v1217_v32 = vmax.f32 %v1181_v31, 0.0 }
 0x13c   :  { %v898_v34 = vpop.f32.mrf.mxu2  ;;  %v1006_v35 = vpop.f32.mrf.mxu3 }
 0x13d   :  { %1254 = vst.msk [vmem:[%s2227_s3 + $0xa8] sm:$0xff] %vm1232_vm2, %v1217_v32  ;;  %v1106_v36 = vmax.f32 %v898_v34, %v1006_v35 }
 0x13f   :  { %v1142_v37 = vmax.f32 %v1070_v33, %v1106_v36 }
 0x140   :  { %v685_v38 = vpop.f32.mrf.mxu0  ;;  %v793_v39 = vpop.f32.mrf.mxu1 }
 0x141   :  { %v1182_v40 = vadd.f32 %v1738_v14, %v1142_v37  ;;  %v1071_v42 = vmax.f32 %v685_v38, %v793_v39 }
 0x143   :  { %v1218_v41 = vmax.f32 %v1182_v40, 0.0 }
 0x144   :  { %v901_v43 = vpop.f32.mrf.mxu2  ;;  %v1009_v44 = vpop.f32.mrf.mxu3 }
 0x145   :  { %1255 = vst.msk [vmem:[%s2227_s3 + $0xb0] sm:$0xff] %vm1232_vm2, %v1218_v41  ;;  %v1107_v45 = vmax.f32 %v901_v43, %v1009_v44 }
 0x147   :  { %v1143_v46 = vmax.f32 %v1071_v42, %v1107_v45 }
 0x148   :  { %v688_v47 = vpop.f32.mrf.mxu0  ;;  %v796_v48 = vpop.f32.mrf.mxu1 }
 0x149   :  { %v1183_v49 = vadd.f32 %v1738_v14, %v1143_v46  ;;  %v1072_v51 = vmax.f32 %v688_v47, %v796_v48 }
 0x14b   :  { %v1219_v50 = vmax.f32 %v1183_v49, 0.0 }
 0x14c   :  { %v904_v52 = vpop.f32.mrf.mxu2  ;;  %v1012_v53 = vpop.f32.mrf.mxu3 }
 0x14d   :  { %1256 = vst.msk [vmem:[%s2227_s3 + $0xb8] sm:$0xff] %vm1232_vm2, %v1219_v50  ;;  %v1108_v54 = vmax.f32 %v904_v52, %v1012_v53 }
 0x14f   :  { %v1144_v55 = vmax.f32 %v1072_v51, %v1108_v54 }
 0x150   :  { %v691_v56 = vpop.f32.mrf.mxu0  ;;  %v799_v57 = vpop.f32.mrf.mxu1 }
 0x151   :  { %v1184_v58 = vadd.f32 %v1738_v14, %v1144_v55  ;;  %v1073_v60 = vmax.f32 %v691_v56, %v799_v57 }
 0x153   :  { %v1220_v59 = vmax.f32 %v1184_v58, 0.0 }
 0x154   :  { %v907_v61 = vpop.f32.mrf.mxu2  ;;  %v1015_v62 = vpop.f32.mrf.mxu3 }
 0x155   :  { %1257 = vst.msk [vmem:[%s2227_s3 + $0xc0] sm:$0xff] %vm1232_vm2, %v1220_v59  ;;  %v1109_v63 = vmax.f32 %v907_v61, %v1015_v62 }
 0x157   :  { %v1145_v0 = vmax.f32 %v1073_v60, %v1109_v63 }
 0x158   :  { %v694_v1 = vpop.f32.mrf.mxu0  ;;  %v802_v2 = vpop.f32.mrf.mxu1 }
 0x159   :  { %v1185_v3 = vadd.f32 %v1738_v14, %v1145_v0  ;;  %v1074_v5 = vmax.f32 %v694_v1, %v802_v2 }
 0x15b   :  { %v1221_v4 = vmax.f32 %v1185_v3, 0.0 }
 0x15c   :  { %v910_v6 = vpop.f32.mrf.mxu2  ;;  %v1018_v7 = vpop.f32.mrf.mxu3 }
 0x15d   :  { %1258 = vst.msk [vmem:[%s2227_s3 + $0xc8] sm:$0xff] %vm1232_vm2, %v1221_v4  ;;  %v1110_v8 = vmax.f32 %v910_v6, %v1018_v7 }
 0x15f   :  { %v1146_v9 = vmax.f32 %v1074_v5, %v1110_v8 }
 0x160   :  { %v697_v10 = vpop.f32.mrf.mxu0  ;;  %v805_v11 = vpop.f32.mrf.mxu1 }
 0x161   :  { %v1186_v12 = vadd.f32 %v1738_v14, %v1146_v9  ;;  %v1075_v15 = vmax.f32 %v697_v10, %v805_v11 }
 0x163   :  { %v1222_v13 = vmax.f32 %v1186_v12, 0.0 }
 0x164   :  { %v913_v16 = vpop.f32.mrf.mxu2  ;;  %v1021_v17 = vpop.f32.mrf.mxu3 }
 0x165   :  { %1259 = vst.msk [vmem:[%s2227_s3 + $0xd0] sm:$0xff] %vm1232_vm2, %v1222_v13  ;;  %v1111_v18 = vmax.f32 %v913_v16, %v1021_v17 }
 0x167   :  { %v1147_v19 = vmax.f32 %v1075_v15, %v1111_v18 }
 0x168   :  { %v700_v20 = vpop.f32.mrf.mxu0  ;;  %v808_v21 = vpop.f32.mrf.mxu1 }
 0x169   :  { %v1187_v22 = vadd.f32 %v1738_v14, %v1147_v19  ;;  %v1076_v24 = vmax.f32 %v700_v20, %v808_v21 }
 0x16b   :  { %v1223_v23 = vmax.f32 %v1187_v22, 0.0 }
 0x16c   :  { %v916_v25 = vpop.f32.mrf.mxu2  ;;  %v1024_v26 = vpop.f32.mrf.mxu3 }
 0x16d   :  { %1260 = vst.msk [vmem:[%s2227_s3 + $0xd8] sm:$0xff] %vm1232_vm2, %v1223_v23  ;;  %v1112_v27 = vmax.f32 %v916_v25, %v1024_v26 }
 0x16f   :  { %v1148_v28 = vmax.f32 %v1076_v24, %v1112_v27 }
 0x170   :  { %v703_v29 = vpop.f32.mrf.mxu0  ;;  %v811_v30 = vpop.f32.mrf.mxu1 }
 0x171   :  { %v1188_v31 = vadd.f32 %v1738_v14, %v1148_v28  ;;  %v1077_v33 = vmax.f32 %v703_v29, %v811_v30 }
 0x173   :  { %v1224_v32 = vmax.f32 %v1188_v31, 0.0 }
 0x174   :  { %v919_v34 = vpop.f32.mrf.mxu2  ;;  %v1027_v35 = vpop.f32.mrf.mxu3 }
 0x175   :  { %1261 = vst.msk [vmem:[%s2227_s3 + $0xe0] sm:$0xff] %vm1232_vm2, %v1224_v32  ;;  %v1113_v36 = vmax.f32 %v919_v34, %v1027_v35 }
 0x177   :  { %v1149_v37 = vmax.f32 %v1077_v33, %v1113_v36 }
 0x178   :  { %v706_v38 = vpop.f32.mrf.mxu0  ;;  %v814_v39 = vpop.f32.mrf.mxu1 }
 0x179   :  { %v1189_v40 = vadd.f32 %v1738_v14, %v1149_v37  ;;  %v1078_v42 = vmax.f32 %v706_v38, %v814_v39 }
 0x17b   :  { %v1225_v41 = vmax.f32 %v1189_v40, 0.0 }
 0x17c   :  { %v922_v43 = vpop.f32.mrf.mxu2  ;;  %v1030_v44 = vpop.f32.mrf.mxu3 }
 0x17d   :  { %1262 = vst.msk [vmem:[%s2227_s3 + $0xe8] sm:$0xff] %vm1232_vm2, %v1225_v41  ;;  %v1114_v45 = vmax.f32 %v922_v43, %v1030_v44 }
 0x17f   :  { %v1150_v46 = vmax.f32 %v1078_v42, %v1114_v45 }
 0x180   :  { %v709_v47 = vpop.f32.mrf.mxu0  ;;  %v817_v48 = vpop.f32.mrf.mxu1 }
 0x181   :  { %v1190_v49 = vadd.f32 %v1738_v14, %v1150_v46  ;;  %v1079_v51 = vmax.f32 %v709_v47, %v817_v48 }
 0x183   :  { %v1226_v50 = vmax.f32 %v1190_v49, 0.0 }
 0x184   :  { %v925_v52 = vpop.f32.mrf.mxu2  ;;  %v1033_v53 = vpop.f32.mrf.mxu3 }
 0x185   :  { %1263 = vst.msk [vmem:[%s2227_s3 + $0xf0] sm:$0xff] %vm1232_vm2, %v1226_v50  ;;  %v1115_v54 = vmax.f32 %v925_v52, %v1033_v53 }
 0x187   :  { %v1151_v55 = vmax.f32 %v1079_v51, %v1115_v54 }
 0x188   :  { %v712_v56 = vpop.f32.mrf.mxu0  ;;  %v820_v57 = vpop.f32.mrf.mxu1 }
 0x189   :  { %v1191_v58 = vadd.f32 %v1738_v14, %v1151_v55  ;;  %v1080_v60 = vmax.f32 %v712_v56, %v820_v57 }
 0x18b   :  { %v1227_v59 = vmax.f32 %v1191_v58, 0.0 }
 0x18c   :  { %v928_v61 = vpop.f32.mrf.mxu2  ;;  %v1036_v62 = vpop.f32.mrf.mxu3 }
 0x18d   :  { %1264 = vst.msk [vmem:[%s2227_s3 + $0xf8] sm:$0xff] %vm1232_vm2, %v1227_v59  ;;  %v1116_v63 = vmax.f32 %v928_v61, %v1036_v62 }
 0x18f   :  { %v1152_v0 = vmax.f32 %v1080_v60, %v1116_v63 }
 0x190   :  { %v715_v1 = vpop.f32.mrf.mxu0  ;;  %v823_v2 = vpop.f32.mrf.mxu1 }
 0x191   :  { %v1192_v3 = vadd.f32 %v1738_v14, %v1152_v0  ;;  %v1081_v5 = vmax.f32 %v715_v1, %v823_v2 }
 0x193   :  { %v1228_v4 = vmax.f32 %v1192_v3, 0.0 }
 0x194   :  { %v931_v6 = vpop.f32.mrf.mxu2  ;;  %v1039_v7 = vpop.f32.mrf.mxu3 }
 0x195   :  { %1265 = vst.msk [vmem:[%s2227_s3 + $0x100] sm:$0xff] %vm1232_vm2, %v1228_v4  ;;  %v1117_v8 = vmax.f32 %v931_v6, %v1039_v7 }
 0x197   :  { %v1153_v9 = vmax.f32 %v1081_v5, %v1117_v8 }
 0x198   :  { %v718_v10 = vpop.f32.mrf.mxu0  ;;  %v826_v11 = vpop.f32.mrf.mxu1 }
 0x199   :  { %v1193_v12 = vadd.f32 %v1738_v14, %v1153_v9  ;;  %v1082_v15 = vmax.f32 %v718_v10, %v826_v11 }
 0x19b   :  { %v1229_v13 = vmax.f32 %v1193_v12, 0.0 }
 0x19c   :  { %v934_v16 = vpop.f32.mrf.mxu2  ;;  %v1042_v17 = vpop.f32.mrf.mxu3 }
 0x19d   :  { %1266 = vst.msk [vmem:[%s2227_s3 + $0x108] sm:$0xff] %vm1232_vm2, %v1229_v13  ;;  %v1118_v18 = vmax.f32 %v934_v16, %v1042_v17 }
 0x19f   :  { %v1154_v19 = vmax.f32 %v1082_v15, %v1118_v18 }
 0x1a0   :  { %v721_v20 = vpop.f32.mrf.mxu0  ;;  %v829_v21 = vpop.f32.mrf.mxu1 }
 0x1a1   :  { %v1194_v22 = vadd.f32 %v1738_v14, %v1154_v19  ;;  %v1083_v24 = vmax.f32 %v721_v20, %v829_v21 }
 0x1a3   :  { %v1230_v23 = vmax.f32 %v1194_v22, 0.0 }
 0x1a4   :  { %v937_v25 = vpop.f32.mrf.mxu2  ;;  %v1045_v26 = vpop.f32.mrf.mxu3 }
 0x1a5   :  { %1267 = vst.msk [vmem:[%s2227_s3 + $0x110] sm:$0xff] %vm1232_vm2, %v1230_v23  ;;  %v1119_v27 = vmax.f32 %v937_v25, %v1045_v26 }
 0x1a7   :  { %v1155_v28 = vmax.f32 %v1083_v24, %v1119_v27 }
 0x1a9   :  { %v1195_v29 = vadd.f32 %v1738_v14, %v1155_v28 }
 0x1ab   :  { %v1231_v30 = vmax.f32 %v1195_v29, 0.0 }
 0x1ad   :  { %1268 = vst.msk [vmem:[%s2227_s3 + $0x118] sm:$0xff] %vm1232_vm2, %v1231_v30 }

// kernel: lenet_dropout_forward.4
= control target key start
LH: loop header
LB: loop body
LE: loop exit
PB: predicated region body
PF: predicated region fallthrough
CT: control target
= control target key end

     0   :  { %vm190_vm0 = vcmask 1043456   ;;  %vm141_vm1 = vcmask 949248   ;;  %vm478_vm2 = vcmask 408576   ;;  %s971_s1 = inlined_call_operand.vmem [shape: f32[500,50], index: 1, kind: input, shape index: {}]   ;;  %s972_s0 = inlined_call_operand.vmem [shape: f32[128,500], index: 0, kind: input, shape index: {}]   ;;  %s973_s2 = inlined_call_operand.vmem [shape: f32[1,50], index: 2, kind: input, shape index: {}]   ;;  %s974_s3 = inlined_call_operand.vmem [shape: f32[32,50], index: 3, kind: output, shape index: {}]  }
   0x1   :  { %v125_v0 = vld [vmem:[%s971_s1 + $0x178] sm:$0xff]  ;;  %v124_v1 = vld [vmem:[%s971_s1 + $0x170] sm:$0xff]  ;;  %v123_v5 = vld [vmem:[%s971_s1 + $0x168] sm:$0xff] }
   0x2   :  { %v93_v2 = vld [vmem:[%s971_s1 + $0x78] sm:$0xff]  ;;  %324 = vmatpush.msra.mxu2 %v125_v0  ;;  %v140_v4 = vld [vmem:[%s971_s1 + $0x1f0] sm:$0xf]  ;;  %v139_v8 = vld [vmem:[%s971_s1 + $0x1e8] sm:$0xff] }
   0x3   :  { %194 = vmatpush.msra.mxu0 %v93_v2  ;;  %v109_v3 = vld [vmem:[%s971_s1 + $0xf8] sm:$0xff]  ;;  %487 = vmatpush.msk.msra.mxu3 %vm190_vm0, %v140_v4  ;;  %v92_v6 = vld [vmem:[%s971_s1 + $0x70] sm:$0xff]  ;;  %v91_v9 = vld [vmem:[%s971_s1 + $0x68] sm:$0xff] }
   0x4   :  { %259 = vmatpush.msra.mxu1 %v109_v3  ;;  %v108_v7 = vld [vmem:[%s971_s1 + $0xf0] sm:$0xff]  ;;  %325 = vmatpush.msra.mxu2 %v124_v1  ;;  %v107_v10 = vld [vmem:[%s971_s1 + $0xe8] sm:$0xff]  ;;  %v122_v11 = vld [vmem:[%s971_s1 + $0x160] sm:$0xff] }
   0x5   :  { %195 = vmatpush.msra.mxu0 %v92_v6  ;;  %391 = vmatpush.msra.mxu3 %v139_v8  ;;  %v138_v12 = vld [vmem:[%s971_s1 + $0x1e0] sm:$0xff]  ;;  %v137_v15 = vld [vmem:[%s971_s1 + $0x1d8] sm:$0xff]  ;;  %v136_v19 = vld [vmem:[%s971_s1 + $0x1d0] sm:$0xff] }
   0x6   :  { %260 = vmatpush.msra.mxu1 %v108_v7  ;;  %v90_v13 = vld [vmem:[%s971_s1 + $0x60] sm:$0xff]  ;;  %326 = vmatpush.msra.mxu2 %v123_v5  ;;  %v121_v16 = vld [vmem:[%s971_s1 + $0x158] sm:$0xff]  ;;  %v120_v20 = vld [vmem:[%s971_s1 + $0x150] sm:$0xff] }
   0x7   :  { %196 = vmatpush.msra.mxu0 %v91_v9  ;;  %v106_v14 = vld [vmem:[%s971_s1 + $0xe0] sm:$0xff]  ;;  %392 = vmatpush.msra.mxu3 %v138_v12  ;;  %v89_v17 = vld [vmem:[%s971_s1 + $0x58] sm:$0xff]  ;;  %v88_v21 = vld [vmem:[%s971_s1 + $0x50] sm:$0xff] }
   0x8   :  { %261 = vmatpush.msra.mxu1 %v107_v10  ;;  %327 = vmatpush.msra.mxu2 %v122_v11  ;;  %v105_v18 = vld [vmem:[%s971_s1 + $0xd8] sm:$0xff]  ;;  %v104_v22 = vld [vmem:[%s971_s1 + $0xd0] sm:$0xff]  ;;  %v135_v23 = vld [vmem:[%s971_s1 + $0x1c8] sm:$0xff] }
   0x9   :  { %197 = vmatpush.msra.mxu0 %v90_v13  ;;  %393 = vmatpush.msra.mxu3 %v137_v15  ;;  %v119_v24 = vld [vmem:[%s971_s1 + $0x148] sm:$0xff]  ;;  %v134_v27 = vld [vmem:[%s971_s1 + $0x1c0] sm:$0xff]  ;;  %v133_v31 = vld [vmem:[%s971_s1 + $0x1b8] sm:$0xff] }
   0xa   :  { %262 = vmatpush.msra.mxu1 %v106_v14  ;;  %328 = vmatpush.msra.mxu2 %v121_v16  ;;  %v87_v25 = vld [vmem:[%s971_s1 + $0x48] sm:$0xff]  ;;  %v118_v28 = vld [vmem:[%s971_s1 + $0x140] sm:$0xff]  ;;  %v117_v32 = vld [vmem:[%s971_s1 + $0x138] sm:$0xff] }
   0xb   :  { %198 = vmatpush.msra.mxu0 %v89_v17  ;;  %394 = vmatpush.msra.mxu3 %v136_v19  ;;  %v103_v26 = vld [vmem:[%s971_s1 + $0xc8] sm:$0xff]  ;;  %v86_v29 = vld [vmem:[%s971_s1 + $0x40] sm:$0xff]  ;;  %v85_v33 = vld [vmem:[%s971_s1 + $0x38] sm:$0xff] }
   0xc   :  { %263 = vmatpush.msra.mxu1 %v105_v18  ;;  %329 = vmatpush.msra.mxu2 %v120_v20  ;;  %v102_v30 = vld [vmem:[%s971_s1 + $0xc0] sm:$0xff]  ;;  %v101_v34 = vld [vmem:[%s971_s1 + $0xb8] sm:$0xff]  ;;  %v132_v35 = vld [vmem:[%s971_s1 + $0x1b0] sm:$0xff] }
   0xd   :  { %199 = vmatpush.msra.mxu0 %v88_v21  ;;  %395 = vmatpush.msra.mxu3 %v135_v23  ;;  %v116_v36 = vld [vmem:[%s971_s1 + $0x130] sm:$0xff]  ;;  %v131_v39 = vld [vmem:[%s971_s1 + $0x1a8] sm:$0xff]  ;;  %v130_v43 = vld [vmem:[%s971_s1 + $0x1a0] sm:$0xff] }
   0xe   :  { %264 = vmatpush.msra.mxu1 %v104_v22  ;;  %330 = vmatpush.msra.mxu2 %v119_v24  ;;  %v84_v37 = vld [vmem:[%s971_s1 + $0x30] sm:$0xff]  ;;  %v115_v40 = vld [vmem:[%s971_s1 + $0x128] sm:$0xff]  ;;  %v114_v44 = vld [vmem:[%s971_s1 + $0x120] sm:$0xff] }
   0xf   :  { %200 = vmatpush.msra.mxu0 %v87_v25  ;;  %396 = vmatpush.msra.mxu3 %v134_v27  ;;  %v100_v38 = vld [vmem:[%s971_s1 + $0xb0] sm:$0xff]  ;;  %v83_v41 = vld [vmem:[%s971_s1 + $0x28] sm:$0xff]  ;;  %v82_v45 = vld [vmem:[%s971_s1 + $0x20] sm:$0xff] }
  0x10   :  { %265 = vmatpush.msra.mxu1 %v103_v26  ;;  %331 = vmatpush.msra.mxu2 %v118_v28  ;;  %v99_v42 = vld [vmem:[%s971_s1 + $0xa8] sm:$0xff]  ;;  %v98_v46 = vld [vmem:[%s971_s1 + $0xa0] sm:$0xff]  ;;  %v129_v47 = vld [vmem:[%s971_s1 + $0x198] sm:$0xff] }
  0x11   :  { %201 = vmatpush.msra.mxu0 %v86_v29  ;;  %397 = vmatpush.msra.mxu3 %v133_v31  ;;  %v113_v48 = vld [vmem:[%s971_s1 + $0x118] sm:$0xff]  ;;  %v128_v51 = vld [vmem:[%s971_s1 + $0x190] sm:$0xff]  ;;  %v127_v55 = vld [vmem:[%s971_s1 + $0x188] sm:$0xff] }
  0x12   :  { %266 = vmatpush.msra.mxu1 %v102_v30  ;;  %332 = vmatpush.msra.mxu2 %v117_v32  ;;  %v81_v49 = vld [vmem:[%s971_s1 + $0x18] sm:$0xff]  ;;  %v112_v52 = vld [vmem:[%s971_s1 + $0x110] sm:$0xff]  ;;  %v111_v56 = vld [vmem:[%s971_s1 + $0x108] sm:$0xff] }
  0x13   :  { %202 = vmatpush.msra.mxu0 %v85_v33  ;;  %398 = vmatpush.msra.mxu3 %v132_v35  ;;  %v97_v50 = vld [vmem:[%s971_s1 + $0x98] sm:$0xff]  ;;  %v80_v53 = vld [vmem:[%s971_s1 + $0x10] sm:$0xff]  ;;  %v79_v57 = vld [vmem:[%s971_s1 + $0x8] sm:$0xff] }
  0x14   :  { %267 = vmatpush.msra.mxu1 %v101_v34  ;;  %333 = vmatpush.msra.mxu2 %v116_v36  ;;  %v96_v54 = vld [vmem:[%s971_s1 + $0x90] sm:$0xff]  ;;  %v95_v58 = vld [vmem:[%s971_s1 + $0x88] sm:$0xff]  ;;  %v126_v59 = vld [vmem:[%s971_s1 + $0x180] sm:$0xff] }
  0x15   :  { %203 = vmatpush.msra.mxu0 %v84_v37  ;;  %399 = vmatpush.msra.mxu3 %v131_v39  ;;  %v110_v60 = vld [vmem:[%s971_s1 + $0x100] sm:$0xff]  ;;  %v17_v61 = vld [vmem:[%s972_s0 + $0x18] sm:$0xff]  ;;  %v16_v62 = vld [vmem:[%s972_s0 + $0x10] sm:$0xff] }
  0x16   :  { %268 = vmatpush.msra.mxu1 %v100_v38  ;;  %334 = vmatpush.msra.mxu2 %v115_v40  ;;  %v78_v63 = vld [vmem:[%s971_s1] sm:$0xff]  ;;  %v15_v2 = vld [vmem:[%s972_s0 + $0x8] sm:$0xff]  ;;  %v21_v3 = vld [vmem:[%s972_s0 + $0x38] sm:$0xff] }
  0x17   :  { %204 = vmatpush.msra.mxu0 %v83_v41  ;;  %400 = vmatpush.msra.mxu3 %v130_v43  ;;  %v94_v0 = vld [vmem:[%s971_s1 + $0x80] sm:$0xff]  ;;  %v20_v4 = vld [vmem:[%s972_s0 + $0x30] sm:$0xff]  ;;  %v19_v6 = vld [vmem:[%s972_s0 + $0x28] sm:$0xff] }
  0x18   :  { %269 = vmatpush.msra.mxu1 %v99_v42  ;;  %335 = vmatpush.msra.mxu2 %v114_v44  ;;  %v14_v1 = vld [vmem:[%s972_s0] sm:$0xff]  ;;  %v25_v7 = vld [vmem:[%s972_s0 + $0x58] sm:$0xff]  ;;  %v24_v8 = vld [vmem:[%s972_s0 + $0x50] sm:$0xff] }
  0x19   :  { %205 = vmatpush.msra.mxu0 %v82_v45  ;;  %401 = vmatpush.msra.mxu3 %v129_v47  ;;  %v18_v5 = vld [vmem:[%s972_s0 + $0x20] sm:$0xff]  ;;  %v23_v10 = vld [vmem:[%s972_s0 + $0x48] sm:$0xff]  ;;  %v29_v11 = vld [vmem:[%s972_s0 + $0x78] sm:$0xff] }
  0x1a   :  { %270 = vmatpush.msra.mxu1 %v98_v46  ;;  %336 = vmatpush.msra.mxu2 %v113_v48  ;;  %v22_v9 = vld [vmem:[%s972_s0 + $0x40] sm:$0xff]  ;;  %v28_v12 = vld [vmem:[%s972_s0 + $0x70] sm:$0xff]  ;;  %v27_v14 = vld [vmem:[%s972_s0 + $0x68] sm:$0xff] }
  0x1b   :  { %206 = vmatpush.msra.mxu0 %v81_v49  ;;  %402 = vmatpush.msra.mxu3 %v128_v51  ;;  %v26_v13 = vld [vmem:[%s972_s0 + $0x60] sm:$0xff]  ;;  %v33_v15 = vld [vmem:[%s972_s0 + $0x98] sm:$0xff]  ;;  %v32_v16 = vld [vmem:[%s972_s0 + $0x90] sm:$0xff] }
  0x1c   :  { %271 = vmatpush.msra.mxu1 %v97_v50  ;;  %337 = vmatpush.msra.mxu2 %v112_v52  ;;  %v30_v17 = vld [vmem:[%s972_s0 + $0x80] sm:$0xff]  ;;  %v31_v18 = vld [vmem:[%s972_s0 + $0x88] sm:$0xff]  ;;  %v37_v19 = vld [vmem:[%s972_s0 + $0xb8] sm:$0xff] }
  0x1d   :  { %207 = vmatpush.msra.mxu0 %v80_v53  ;;  %403 = vmatpush.msra.mxu3 %v127_v55  ;;  %v36_v20 = vld [vmem:[%s972_s0 + $0xb0] sm:$0xff]  ;;  %v34_v21 = vld [vmem:[%s972_s0 + $0xa0] sm:$0xff]  ;;  %v35_v22 = vld [vmem:[%s972_s0 + $0xa8] sm:$0xff] }
  0x1e   :  { %272 = vmatpush.msra.mxu1 %v96_v54  ;;  %338 = vmatpush.msra.mxu2 %v111_v56  ;;  %v41_v23 = vld [vmem:[%s972_s0 + $0xd8] sm:$0xff]  ;;  %v40_v24 = vld [vmem:[%s972_s0 + $0xd0] sm:$0xff]  ;;  %v38_v25 = vld [vmem:[%s972_s0 + $0xc0] sm:$0xff] }
  0x1f   :  { %208 = vmatpush.msra.mxu0 %v79_v57  ;;  %404 = vmatpush.msra.mxu3 %v126_v59  ;;  %v39_v26 = vld [vmem:[%s972_s0 + $0xc8] sm:$0xff]  ;;  %v45_v27 = vld [vmem:[%s972_s0 + $0xf8] sm:$0xff]  ;;  %v44_v28 = vld [vmem:[%s972_s0 + $0xf0] sm:$0xff] }
  0x20   :  { %273 = vmatpush.msra.mxu1 %v95_v58  ;;  %339 = vmatpush.msra.mxu2 %v110_v60  ;;  %v42_v29 = vld [vmem:[%s972_s0 + $0xe0] sm:$0xff]  ;;  %v43_v30 = vld [vmem:[%s972_s0 + $0xe8] sm:$0xff]  ;;  %v49_v31 = vld [vmem:[%s972_s0 + $0x118] sm:$0xff] }
  0x21   :  { %488 = vmatmul.msk.f32.vlgmr.msra.gmra.mxu3 %vm141_vm1, %v17_v61  ;;  %340 = vmatmul.f32.vlgmr.msra.gmra.mxu2 %v16_v62  ;;  %v48_v32 = vld [vmem:[%s972_s0 + $0x110] sm:$0xff]  ;;  %v46_v33 = vld [vmem:[%s972_s0 + $0x100] sm:$0xff]  ;;  %v47_v34 = vld [vmem:[%s972_s0 + $0x108] sm:$0xff] }
  0x22   :  { %209 = vmatpush.msra.mxu0 %v78_v63  ;;  %274 = vmatpush.msra.mxu1 %v94_v0  ;;  %v53_v35 = vld [vmem:[%s972_s0 + $0x138] sm:$0xff]  ;;  %v52_v36 = vld [vmem:[%s972_s0 + $0x130] sm:$0xff]  ;;  %v50_v37 = vld [vmem:[%s972_s0 + $0x120] sm:$0xff] }
  0x23   :  { %210 = vmatmul.f32.vlgmr.msra.gmra.mxu0 %v14_v1  ;;  %275 = vmatmul.f32.vlgmr.msra.gmra.mxu1 %v15_v2  ;;  %v51_v38 = vld [vmem:[%s972_s0 + $0x128] sm:$0xff]  ;;  %v57_v39 = vld [vmem:[%s972_s0 + $0x158] sm:$0xff]  ;;  %v56_v40 = vld [vmem:[%s972_s0 + $0x150] sm:$0xff] }
  0x24   :  { %v54_v41 = vld [vmem:[%s972_s0 + $0x140] sm:$0xff]  ;;  %v55_v42 = vld [vmem:[%s972_s0 + $0x148] sm:$0xff]  ;;  %v61_v43 = vld [vmem:[%s972_s0 + $0x178] sm:$0xff] }
  0x25   :  { %v60_v44 = vld [vmem:[%s972_s0 + $0x170] sm:$0xff]  ;;  %v58_v45 = vld [vmem:[%s972_s0 + $0x160] sm:$0xff]  ;;  %v59_v46 = vld [vmem:[%s972_s0 + $0x168] sm:$0xff] }
  0x26   :  { %v65_v47 = vld [vmem:[%s972_s0 + $0x198] sm:$0xff]  ;;  %v64_v48 = vld [vmem:[%s972_s0 + $0x190] sm:$0xff]  ;;  %v62_v49 = vld [vmem:[%s972_s0 + $0x180] sm:$0xff] }
  0x27   :  { %v63_v50 = vld [vmem:[%s972_s0 + $0x188] sm:$0xff]  ;;  %v69_v51 = vld [vmem:[%s972_s0 + $0x1b8] sm:$0xff]  ;;  %v68_v52 = vld [vmem:[%s972_s0 + $0x1b0] sm:$0xff] }
  0x28   :  { %v66_v53 = vld [vmem:[%s972_s0 + $0x1a0] sm:$0xff]  ;;  %v67_v54 = vld [vmem:[%s972_s0 + $0x1a8] sm:$0xff]  ;;  %v73_v55 = vld [vmem:[%s972_s0 + $0x1d8] sm:$0xff] }
  0x29   :  { %489 = vmatmul.msk.f32.gmra.mxu3 %vm141_vm1, %v21_v3  ;;  %343 = vmatmul.f32.gmra.mxu2 %v20_v4  ;;  %v72_v56 = vld [vmem:[%s972_s0 + $0x1d0] sm:$0xff]  ;;  %v70_v57 = vld [vmem:[%s972_s0 + $0x1c0] sm:$0xff]  ;;  %v71_v58 = vld [vmem:[%s972_s0 + $0x1c8] sm:$0xff] }
  0x2a   :  { %v77_v59 = vld [vmem:[%s972_s0 + $0x1f8] sm:$0xff]  ;;  %v76_v60 = vld [vmem:[%s972_s0 + $0x1f0] sm:$0xff]  ;;  %v74_v61 = vld [vmem:[%s972_s0 + $0x1e0] sm:$0xff] }
  0x2b   :  { %213 = vmatmul.f32.gmra.mxu0 %v18_v5  ;;  %278 = vmatmul.f32.gmra.mxu1 %v19_v6  ;;  %v75_v62 = vld [vmem:[%s972_s0 + $0x1e8] sm:$0xff] }
  0x31   :  { %490 = vmatmul.msk.f32.gmra.mxu3 %vm141_vm1, %v25_v7  ;;  %346 = vmatmul.f32.gmra.mxu2 %v24_v8 }
  0x33   :  { %216 = vmatmul.f32.gmra.mxu0 %v22_v9  ;;  %281 = vmatmul.f32.gmra.mxu1 %v23_v10 }
  0x39   :  { %491 = vmatmul.msk.f32.gmra.mxu3 %vm141_vm1, %v29_v11  ;;  %349 = vmatmul.f32.gmra.mxu2 %v28_v12 }
  0x3b   :  { %219 = vmatmul.f32.gmra.mxu0 %v26_v13  ;;  %284 = vmatmul.f32.gmra.mxu1 %v27_v14 }
  0x41   :  { %492 = vmatmul.msk.f32.gmra.mxu3 %vm141_vm1, %v33_v15  ;;  %352 = vmatmul.f32.gmra.mxu2 %v32_v16 }
  0x43   :  { %222 = vmatmul.f32.gmra.mxu0 %v30_v17  ;;  %287 = vmatmul.f32.gmra.mxu1 %v31_v18 }
  0x49   :  { %493 = vmatmul.msk.f32.gmra.mxu3 %vm141_vm1, %v37_v19  ;;  %355 = vmatmul.f32.gmra.mxu2 %v36_v20 }
  0x4b   :  { %225 = vmatmul.f32.gmra.mxu0 %v34_v21  ;;  %290 = vmatmul.f32.gmra.mxu1 %v35_v22 }
  0x51   :  { %494 = vmatmul.msk.f32.gmra.mxu3 %vm141_vm1, %v41_v23  ;;  %358 = vmatmul.f32.gmra.mxu2 %v40_v24 }
  0x53   :  { %228 = vmatmul.f32.gmra.mxu0 %v38_v25  ;;  %293 = vmatmul.f32.gmra.mxu1 %v39_v26 }
  0x59   :  { %495 = vmatmul.msk.f32.gmra.mxu3 %vm141_vm1, %v45_v27  ;;  %361 = vmatmul.f32.gmra.mxu2 %v44_v28 }
  0x5b   :  { %231 = vmatmul.f32.gmra.mxu0 %v42_v29  ;;  %296 = vmatmul.f32.gmra.mxu1 %v43_v30 }
  0x61   :  { %496 = vmatmul.msk.f32.gmra.mxu3 %vm141_vm1, %v49_v31  ;;  %364 = vmatmul.f32.gmra.mxu2 %v48_v32 }
  0x63   :  { %234 = vmatmul.f32.gmra.mxu0 %v46_v33  ;;  %299 = vmatmul.f32.gmra.mxu1 %v47_v34 }
  0x69   :  { %497 = vmatmul.msk.f32.gmra.mxu3 %vm141_vm1, %v53_v35  ;;  %367 = vmatmul.f32.gmra.mxu2 %v52_v36 }
  0x6b   :  { %237 = vmatmul.f32.gmra.mxu0 %v50_v37  ;;  %302 = vmatmul.f32.gmra.mxu1 %v51_v38 }
  0x71   :  { %498 = vmatmul.msk.f32.gmra.mxu3 %vm141_vm1, %v57_v39  ;;  %370 = vmatmul.f32.gmra.mxu2 %v56_v40 }
  0x73   :  { %240 = vmatmul.f32.gmra.mxu0 %v54_v41  ;;  %305 = vmatmul.f32.gmra.mxu1 %v55_v42 }
  0x79   :  { %499 = vmatmul.msk.f32.gmra.mxu3 %vm141_vm1, %v61_v43  ;;  %373 = vmatmul.f32.gmra.mxu2 %v60_v44 }
  0x7b   :  { %243 = vmatmul.f32.gmra.mxu0 %v58_v45  ;;  %308 = vmatmul.f32.gmra.mxu1 %v59_v46 }
  0x81   :  { %500 = vmatmul.msk.f32.gmra.mxu3 %vm141_vm1, %v65_v47  ;;  %376 = vmatmul.f32.gmra.mxu2 %v64_v48 }
  0x83   :  { %246 = vmatmul.f32.gmra.mxu0 %v62_v49  ;;  %311 = vmatmul.f32.gmra.mxu1 %v63_v50 }
  0x89   :  { %501 = vmatmul.msk.f32.gmra.mxu3 %vm141_vm1, %v69_v51  ;;  %379 = vmatmul.f32.gmra.mxu2 %v68_v52 }
  0x8b   :  { %249 = vmatmul.f32.gmra.mxu0 %v66_v53  ;;  %314 = vmatmul.f32.gmra.mxu1 %v67_v54 }
  0x91   :  { %502 = vmatmul.msk.f32.gmra.mxu3 %vm141_vm1, %v73_v55  ;;  %382 = vmatmul.f32.gmra.mxu2 %v72_v56 }
  0x93   :  { %252 = vmatmul.f32.gmra.mxu0 %v70_v57  ;;  %317 = vmatmul.f32.gmra.mxu1 %v71_v58 }
  0x99   :  { %503 = vmatmul.msk.f32.gmra.mxu3 %vm141_vm1, %v77_v59  ;;  %385 = vmatmul.f32.gmra.mxu2 %v76_v60 }
  0x9b   :  { %255 = vmatmul.f32.gmra.mxu0 %v74_v61  ;;  %320 = vmatmul.f32.gmra.mxu1 %v75_v62 }
  0xa0   :  { %v211_v63 = vpop.f32.mrf.mxu0  ;;  %v276_v0 = vpop.f32.mrf.mxu1 }
  0xa1   :  { %v277_v1 = vadd.f32 %v276_v0, %v211_v63 }
  0xa4   :  { %v406_v2 = vpop.f32.mrf.mxu3  ;;  %v341_v3 = vpop.f32.mrf.mxu2 }
  0xa5   :  { %v342_v4 = vadd.f32 %v341_v3, %v277_v1 }
  0xa7   :  { %v922_v5 = vadd.f32 %v406_v2, %v342_v4 }
  0xa8   :  { %v214_v6 = vpop.f32.mrf.mxu0  ;;  %v279_v7 = vpop.f32.mrf.mxu1 }
  0xa9   :  { %v280_v8 = vadd.f32 %v279_v7, %v214_v6 }
  0xac   :  { %v409_v9 = vpop.f32.mrf.mxu3  ;;  %v344_v10 = vpop.f32.mrf.mxu2 }
  0xad   :  { %v345_v11 = vadd.f32 %v344_v10, %v280_v8 }
  0xaf   :  { %v924_v12 = vadd.f32 %v409_v9, %v345_v11 }
  0xb0   :  { %v217_v13 = vpop.f32.mrf.mxu0  ;;  %v282_v14 = vpop.f32.mrf.mxu1 }
  0xb1   :  { %v283_v15 = vadd.f32 %v282_v14, %v217_v13 }
  0xb4   :  { %v412_v16 = vpop.f32.mrf.mxu3  ;;  %v347_v17 = vpop.f32.mrf.mxu2 }
  0xb5   :  { %v348_v18 = vadd.f32 %v347_v17, %v283_v15 }
  0xb7   :  { %v926_v19 = vadd.f32 %v412_v16, %v348_v18 }
  0xb8   :  { %v220_v20 = vpop.f32.mrf.mxu0  ;;  %v285_v21 = vpop.f32.mrf.mxu1 }
  0xb9   :  { %v286_v22 = vadd.f32 %v285_v21, %v220_v20 }
  0xbc   :  { %v415_v23 = vpop.f32.mrf.mxu3  ;;  %v350_v24 = vpop.f32.mrf.mxu2 }
  0xbd   :  { %v351_v25 = vadd.f32 %v350_v24, %v286_v22 }
  0xbf   :  { %v928_v26 = vadd.f32 %v415_v23, %v351_v25 }
  0xc0   :  { %v223_v27 = vpop.f32.mrf.mxu0  ;;  %v288_v28 = vpop.f32.mrf.mxu1 }
  0xc1   :  { %v289_v29 = vadd.f32 %v288_v28, %v223_v27  ;;  %v504_v28 = vld [vmem:[%s973_s2] ss:$0 sm:$0xff] }
  0xc4   :  { %v418_v30 = vpop.f32.mrf.mxu3  ;;  %v353_v31 = vpop.f32.mrf.mxu2 }
  0xc5   :  { %v354_v32 = vadd.f32 %v353_v31, %v289_v29 }
  0xc7   :  { %v419_v33 = vadd.f32 %v418_v30, %v354_v32 }
  0xc8   :  { %v226_v34 = vpop.f32.mrf.mxu0  ;;  %v291_v35 = vpop.f32.mrf.mxu1 }
  0xc9   :  { %v454_v36 = vmax.f32 %v922_v5, %v419_v33  ;;  %v292_v37 = vadd.f32 %v291_v35, %v226_v34 }
  0xcc   :  { %v421_v38 = vpop.f32.mrf.mxu3  ;;  %v356_v39 = vpop.f32.mrf.mxu2 }
  0xcd   :  { %v357_v40 = vadd.f32 %v356_v39, %v292_v37 }
  0xcf   :  { %v931_v41 = vadd.f32 %v421_v38, %v357_v40 }
  0xd0   :  { %v229_v42 = vpop.f32.mrf.mxu0  ;;  %v294_v43 = vpop.f32.mrf.mxu1 }
  0xd1   :  { %v455_v44 = vmax.f32 %v924_v12, %v931_v41  ;;  %v295_v45 = vadd.f32 %v294_v43, %v229_v42 }
  0xd4   :  { %v424_v46 = vpop.f32.mrf.mxu3  ;;  %v359_v47 = vpop.f32.mrf.mxu2 }
  0xd5   :  { %v360_v48 = vadd.f32 %v359_v47, %v295_v45 }
  0xd7   :  { %v935_v49 = vadd.f32 %v424_v46, %v360_v48 }
  0xd8   :  { %v232_v50 = vpop.f32.mrf.mxu0  ;;  %v297_v51 = vpop.f32.mrf.mxu1 }
  0xd9   :  { %v456_v52 = vmax.f32 %v926_v19, %v935_v49  ;;  %v298_v53 = vadd.f32 %v297_v51, %v232_v50 }
  0xdc   :  { %v427_v54 = vpop.f32.mrf.mxu3  ;;  %v362_v55 = vpop.f32.mrf.mxu2 }
  0xdd   :  { %v363_v56 = vadd.f32 %v362_v55, %v298_v53 }
  0xdf   :  { %v939_v57 = vadd.f32 %v427_v54, %v363_v56 }
  0xe0   :  { %v235_v58 = vpop.f32.mrf.mxu0  ;;  %v300_v59 = vpop.f32.mrf.mxu1 }
  0xe1   :  { %v457_v60 = vmax.f32 %v928_v26, %v939_v57  ;;  %v301_v11 = vadd.f32 %v300_v59, %v235_v58 }
  0xe4   :  { %v430_v61 = vpop.f32.mrf.mxu3  ;;  %v365_v62 = vpop.f32.mrf.mxu2 }
  0xe5   :  { %v366_v16 = vadd.f32 %v365_v62, %v301_v11 }
  0xe7   :  { %v431_v21 = vadd.f32 %v430_v61, %v366_v16 }
  0xe8   :  { %v238_v63 = vpop.f32.mrf.mxu0  ;;  %v303_v0 = vpop.f32.mrf.mxu1 }
  0xe9   :  { %v304_v22 = vadd.f32 %v303_v0, %v238_v63 }
  0xec   :  { %v433_v1 = vpop.f32.mrf.mxu3  ;;  %v368_v2 = vpop.f32.mrf.mxu2 }
  0xed   :  { %v369_v30 = vadd.f32 %v368_v2, %v304_v22 }
  0xef   :  { %v434_v37 = vadd.f32 %v433_v1, %v369_v30 }
  0xf0   :  { %v241_v3 = vpop.f32.mrf.mxu0  ;;  %v306_v4 = vpop.f32.mrf.mxu1 }
  0xf1   :  { %v307_v38 = vadd.f32 %v306_v4, %v241_v3 }
  0xf4   :  { %v436_v5 = vpop.f32.mrf.mxu3  ;;  %v371_v6 = vpop.f32.mrf.mxu2 }
  0xf5   :  { %v372_v47 = vadd.f32 %v371_v6, %v307_v38 }
  0xf7   :  { %v437_v54 = vadd.f32 %v436_v5, %v372_v47 }
  0xf8   :  { %v244_v7 = vpop.f32.mrf.mxu0  ;;  %v309_v8 = vpop.f32.mrf.mxu1 }
  0xf9   :  { %v310_v55 = vadd.f32 %v309_v8, %v244_v7 }
  0xfc   :  { %v439_v9 = vpop.f32.mrf.mxu3  ;;  %v374_v10 = vpop.f32.mrf.mxu2 }
  0xfd   :  { %v375_v0 = vadd.f32 %v374_v10, %v310_v55 }
  0xff   :  { %v440_v3 = vadd.f32 %v439_v9, %v375_v0 }
 0x100   :  { %v247_v13 = vpop.f32.mrf.mxu0  ;;  %v312_v14 = vpop.f32.mrf.mxu1 }
 0x101   :  { %v313_v15 = vadd.f32 %v312_v14, %v247_v13 }
 0x104   :  { %v442_v17 = vpop.f32.mrf.mxu3  ;;  %v377_v18 = vpop.f32.mrf.mxu2 }
 0x105   :  { %v378_v20 = vadd.f32 %v377_v18, %v313_v15 }
 0x107   :  { %v443_v23 = vadd.f32 %v442_v17, %v378_v20 }
 0x108   :  { %v250_v24 = vpop.f32.mrf.mxu0  ;;  %v315_v25 = vpop.f32.mrf.mxu1 }
 0x109   :  { %v458_v27 = vmax.f32 %v431_v21, %v443_v23  ;;  %v316_v29 = vadd.f32 %v315_v25, %v250_v24 }
 0x10b   :  { %v462_v31 = vmax.f32 %v454_v36, %v458_v27 }
 0x10c   :  { %v445_v32 = vpop.f32.mrf.mxu3  ;;  %v380_v33 = vpop.f32.mrf.mxu2 }
 0x10d   :  { %v470_v34 = vadd.f32 %v504_v28, %v462_v31  ;;  %v381_v35 = vadd.f32 %v380_v33, %v316_v29 }
 0x10f   :  { %v474_v39 = vmax.f32 %v470_v34, 0.0  ;;  %v446_v40 = vadd.f32 %v445_v32, %v381_v35 }
 0x110   :  { %v253_v42 = vpop.f32.mrf.mxu0  ;;  %v318_v43 = vpop.f32.mrf.mxu1 }
 0x111   :  { %479 = vst.msk [vmem:[%s974_s3] sm:$0xff] %vm478_vm2, %v474_v39  ;;  %v459_v45 = vmax.f32 %v434_v37, %v446_v40  ;;  %v319_v46 = vadd.f32 %v318_v43, %v253_v42 }
 0x113   :  { %v463_v36 = vmax.f32 %v455_v44, %v459_v45 }
 0x114   :  { %v448_v48 = vpop.f32.mrf.mxu3  ;;  %v383_v50 = vpop.f32.mrf.mxu2 }
 0x115   :  { %v471_v51 = vadd.f32 %v504_v28, %v463_v36  ;;  %v384_v53 = vadd.f32 %v383_v50, %v319_v46 }
 0x117   :  { %v475_v56 = vmax.f32 %v471_v51, 0.0  ;;  %v449_v58 = vadd.f32 %v448_v48, %v384_v53 }
 0x118   :  { %v256_v59 = vpop.f32.mrf.mxu0  ;;  %v321_v61 = vpop.f32.mrf.mxu1 }
 0x119   :  { %480 = vst.msk [vmem:[%s974_s3 + $0x8] sm:$0xff] %vm478_vm2, %v475_v56  ;;  %v460_v62 = vmax.f32 %v437_v54, %v449_v58  ;;  %v322_v63 = vadd.f32 %v321_v61, %v256_v59 }
 0x11b   :  { %v464_v12 = vmax.f32 %v456_v52, %v460_v62 }
 0x11c   :  { %v386_v41 = vpop.f32.mrf.mxu2  ;;  %v451_v44 = vpop.f32.mrf.mxu3 }
 0x11d   :  { %v472_v1 = vadd.f32 %v504_v28, %v464_v12  ;;  %v387_v2 = vadd.f32 %v386_v41, %v322_v63 }
 0x11f   :  { %v476_v4 = vmax.f32 %v472_v1, 0.0  ;;  %v452_v5 = vadd.f32 %v451_v44, %v387_v2 }
 0x121   :  { %481 = vst.msk [vmem:[%s974_s3 + $0x10] sm:$0xff] %vm478_vm2, %v476_v4  ;;  %v461_v6 = vmax.f32 %v440_v3, %v452_v5 }
 0x123   :  { %v465_v7 = vmax.f32 %v457_v60, %v461_v6 }
 0x125   :  { %v473_v8 = vadd.f32 %v504_v28, %v465_v7 }
 0x127   :  { %v477_v19 = vmax.f32 %v473_v8, 0.0 }
 0x129   :  { %482 = vst.msk [vmem:[%s974_s3 + $0x18] sm:$0xff] %vm478_vm2, %v477_v19 }

// kernel: lenet_dropout_forward.5
= control target key start
LH: loop header
LB: loop body
LE: loop exit
PB: predicated region body
PF: predicated region fallthrough
CT: control target
= control target key end

     0   :  { %vm453_vm0 = vcmask 261120   ;;  %s2830_s0 = inlined_call_operand.<no memory space> [shape: s32[1], index: 0, kind: input, shape index: {}]   ;;  %s2831_s1 = inlined_call_operand.vmem [shape: f32[2,800], index: 1, kind: input, shape index: {}]   ;;  %s2832_s2 = inlined_call_operand.vmem [shape: f32[800,500], index: 2, kind: input, shape index: {}]   ;;  %s2833_s3 = inlined_call_operand.vmem [shape: f32[1,500], index: 3, kind: input, shape index: {}]   ;;  %s2834_s4 = inlined_call_operand.vmem [shape: f32[500,10], index: 4, kind: input, shape index: {}]   ;;  %s2835_s5 = inlined_call_operand.vmem [shape: f32[1,10], index: 5, kind: input, shape index: {}]   ;;  %s2836_s6 = inlined_call_operand.hbm [shape: f32[2,10], index: 6, kind: output, shape index: {}]  }
   0x1   :  { %v85_v0 = vld [vmem:[%s2832_s2 + $0x1e0] sm:$0xff] }
   0x2   :  { %v149_v1 = vld [vmem:[%s2832_s2 + $0x3e0] sm:$0xff]  ;;  %456 = vmatpush.msra.mxu0 %v85_v0 }
   0x3   :  { %v213_v2 = vld [vmem:[%s2832_s2 + $0x5e0] sm:$0xff]  ;;  %476 = vmatpush.msra.mxu1 %v149_v1 }
   0x4   :  { %v277_v3 = vld [vmem:[%s2832_s2 + $0x7e0] sm:$0xff]  ;;  %496 = vmatpush.msra.mxu2 %v213_v2 }
   0x5   :  { %v81_v4 = vld [vmem:[%s2832_s2 + $0x1c0] sm:$0xff]  ;;  %516 = vmatpush.msra.mxu3 %v277_v3 }
   0x6   :  { %v145_v5 = vld [vmem:[%s2832_s2 + $0x3c0] sm:$0xff]  ;;  %457 = vmatpush.msra.mxu0 %v81_v4  ;;  %v86_v4 = vld [vmem:[%s2832_s2 + $0x1e8] sm:$0xff] }
   0x7   :  { %v209_v6 = vld [vmem:[%s2832_s2 + $0x5c0] sm:$0xff]  ;;  %477 = vmatpush.msra.mxu1 %v145_v5 }
   0x8   :  { %v273_v7 = vld [vmem:[%s2832_s2 + $0x7c0] sm:$0xff]  ;;  %497 = vmatpush.msra.mxu2 %v209_v6 }
   0x9   :  { %v77_v8 = vld [vmem:[%s2832_s2 + $0x1a0] sm:$0xff]  ;;  %517 = vmatpush.msra.mxu3 %v273_v7 }
   0xa   :  { %v141_v9 = vld [vmem:[%s2832_s2 + $0x3a0] sm:$0xff]  ;;  %458 = vmatpush.msra.mxu0 %v77_v8  ;;  %v82_v8 = vld [vmem:[%s2832_s2 + $0x1c8] sm:$0xff] }
   0xb   :  { %v205_v10 = vld [vmem:[%s2832_s2 + $0x5a0] sm:$0xff]  ;;  %478 = vmatpush.msra.mxu1 %v141_v9 }
   0xc   :  { %v269_v11 = vld [vmem:[%s2832_s2 + $0x7a0] sm:$0xff]  ;;  %498 = vmatpush.msra.mxu2 %v205_v10 }
   0xd   :  { %v73_v12 = vld [vmem:[%s2832_s2 + $0x180] sm:$0xff]  ;;  %518 = vmatpush.msra.mxu3 %v269_v11 }
   0xe   :  { %v137_v13 = vld [vmem:[%s2832_s2 + $0x380] sm:$0xff]  ;;  %459 = vmatpush.msra.mxu0 %v73_v12  ;;  %v78_v12 = vld [vmem:[%s2832_s2 + $0x1a8] sm:$0xff] }
   0xf   :  { %v201_v14 = vld [vmem:[%s2832_s2 + $0x580] sm:$0xff]  ;;  %479 = vmatpush.msra.mxu1 %v137_v13 }
  0x10   :  { %v265_v15 = vld [vmem:[%s2832_s2 + $0x780] sm:$0xff]  ;;  %499 = vmatpush.msra.mxu2 %v201_v14 }
  0x11   :  { %v69_v16 = vld [vmem:[%s2832_s2 + $0x160] sm:$0xff]  ;;  %519 = vmatpush.msra.mxu3 %v265_v15 }
  0x12   :  { %v133_v17 = vld [vmem:[%s2832_s2 + $0x360] sm:$0xff]  ;;  %460 = vmatpush.msra.mxu0 %v69_v16  ;;  %v74_v16 = vld [vmem:[%s2832_s2 + $0x188] sm:$0xff] }
  0x13   :  { %v197_v18 = vld [vmem:[%s2832_s2 + $0x560] sm:$0xff]  ;;  %480 = vmatpush.msra.mxu1 %v133_v17 }
  0x14   :  { %v261_v19 = vld [vmem:[%s2832_s2 + $0x760] sm:$0xff]  ;;  %500 = vmatpush.msra.mxu2 %v197_v18 }
  0x15   :  { %v65_v20 = vld [vmem:[%s2832_s2 + $0x140] sm:$0xff]  ;;  %520 = vmatpush.msra.mxu3 %v261_v19  ;;  %v150_v19 = vld [vmem:[%s2832_s2 + $0x3e8] sm:$0xff] }
  0x16   :  { %v129_v21 = vld [vmem:[%s2832_s2 + $0x340] sm:$0xff]  ;;  %461 = vmatpush.msra.mxu0 %v65_v20 }
  0x17   :  { %v193_v22 = vld [vmem:[%s2832_s2 + $0x540] sm:$0xff]  ;;  %481 = vmatpush.msra.mxu1 %v129_v21  ;;  %v70_v21 = vld [vmem:[%s2832_s2 + $0x168] sm:$0xff] }
  0x18   :  { %v257_v23 = vld [vmem:[%s2832_s2 + $0x740] sm:$0xff]  ;;  %501 = vmatpush.msra.mxu2 %v193_v22 }
  0x19   :  { %v61_v24 = vld [vmem:[%s2832_s2 + $0x120] sm:$0xff]  ;;  %521 = vmatpush.msra.mxu3 %v257_v23  ;;  %v146_v23 = vld [vmem:[%s2832_s2 + $0x3c8] sm:$0xff] }
  0x1a   :  { %v125_v25 = vld [vmem:[%s2832_s2 + $0x320] sm:$0xff]  ;;  %462 = vmatpush.msra.mxu0 %v61_v24 }
  0x1b   :  { %v189_v26 = vld [vmem:[%s2832_s2 + $0x520] sm:$0xff]  ;;  %482 = vmatpush.msra.mxu1 %v125_v25  ;;  %v66_v25 = vld [vmem:[%s2832_s2 + $0x148] sm:$0xff] }
  0x1c   :  { %v253_v27 = vld [vmem:[%s2832_s2 + $0x720] sm:$0xff]  ;;  %502 = vmatpush.msra.mxu2 %v189_v26 }
  0x1d   :  { %v57_v28 = vld [vmem:[%s2832_s2 + $0x100] sm:$0xff]  ;;  %522 = vmatpush.msra.mxu3 %v253_v27 }
  0x1e   :  { %v121_v29 = vld [vmem:[%s2832_s2 + $0x300] sm:$0xff]  ;;  %463 = vmatpush.msra.mxu0 %v57_v28  ;;  %v142_v28 = vld [vmem:[%s2832_s2 + $0x3a8] sm:$0xff] }
  0x1f   :  { %v185_v30 = vld [vmem:[%s2832_s2 + $0x500] sm:$0xff]  ;;  %483 = vmatpush.msra.mxu1 %v121_v29  ;;  %v24_v29 = vld [vmem:[%s2831_s1 + $0x8] sm:$0x3f] }
  0x20   :  { %v249_v31 = vld [vmem:[%s2832_s2 + $0x700] sm:$0xff]  ;;  %503 = vmatpush.msra.mxu2 %v185_v30  ;;  %439 = vst [vmem:[#allocation1 + $0x20] ss:$4 sm:$0xff] %v24_v29 }
  0x21   :  { %v53_v32 = vld [vmem:[%s2832_s2 + $0xe0] sm:$0xff]  ;;  %523 = vmatpush.msra.mxu3 %v249_v31 }
  0x22   :  { %v117_v33 = vld [vmem:[%s2832_s2 + $0x2e0] sm:$0xff]  ;;  %464 = vmatpush.msra.mxu0 %v53_v32  ;;  %v62_v32 = vld [vmem:[%s2832_s2 + $0x128] sm:$0xff] }
  0x23   :  { %v181_v34 = vld [vmem:[%s2832_s2 + $0x4e0] sm:$0xff]  ;;  %484 = vmatpush.msra.mxu1 %v117_v33 }
  0x24   :  { %v245_v35 = vld [vmem:[%s2832_s2 + $0x6e0] sm:$0xff]  ;;  %504 = vmatpush.msra.mxu2 %v181_v34  ;;  %v138_v34 = vld [vmem:[%s2832_s2 + $0x388] sm:$0xff] }
  0x25   :  { %v49_v36 = vld [vmem:[%s2832_s2 + $0xc0] sm:$0xff]  ;;  %524 = vmatpush.msra.mxu3 %v245_v35 }
  0x26   :  { %v113_v37 = vld [vmem:[%s2832_s2 + $0x2c0] sm:$0xff]  ;;  %465 = vmatpush.msra.mxu0 %v49_v36 }
  0x27   :  { %v177_v38 = vld [vmem:[%s2832_s2 + $0x4c0] sm:$0xff]  ;;  %485 = vmatpush.msra.mxu1 %v113_v37  ;;  %v58_v37 = vld [vmem:[%s2832_s2 + $0x108] sm:$0xff] }
  0x28   :  { %v241_v39 = vld [vmem:[%s2832_s2 + $0x6c0] sm:$0xff]  ;;  %505 = vmatpush.msra.mxu2 %v177_v38  ;;  %v134_v38 = vld [vmem:[%s2832_s2 + $0x368] sm:$0xff] }
  0x29   :  { %v45_v40 = vld [vmem:[%s2832_s2 + $0xa0] sm:$0xff]  ;;  %525 = vmatpush.msra.mxu3 %v241_v39 }
  0x2a   :  { %v109_v41 = vld [vmem:[%s2832_s2 + $0x2a0] sm:$0xff]  ;;  %466 = vmatpush.msra.mxu0 %v45_v40 }
  0x2b   :  { %v173_v42 = vld [vmem:[%s2832_s2 + $0x4a0] sm:$0xff]  ;;  %486 = vmatpush.msra.mxu1 %v109_v41  ;;  %v54_v41 = vld [vmem:[%s2832_s2 + $0xe8] sm:$0xff] }
  0x2c   :  { %v237_v43 = vld [vmem:[%s2832_s2 + $0x6a0] sm:$0xff]  ;;  %506 = vmatpush.msra.mxu2 %v173_v42  ;;  %v130_v42 = vld [vmem:[%s2832_s2 + $0x348] sm:$0xff] }
  0x2d   :  { %v41_v44 = vld [vmem:[%s2832_s2 + $0x80] sm:$0xff]  ;;  %526 = vmatpush.msra.mxu3 %v237_v43 }
  0x2e   :  { %v105_v45 = vld [vmem:[%s2832_s2 + $0x280] sm:$0xff]  ;;  %467 = vmatpush.msra.mxu0 %v41_v44 }
  0x2f   :  { %v169_v46 = vld [vmem:[%s2832_s2 + $0x480] sm:$0xff]  ;;  %487 = vmatpush.msra.mxu1 %v105_v45  ;;  %v50_v45 = vld [vmem:[%s2832_s2 + $0xc8] sm:$0xff] }
  0x30   :  { %v233_v47 = vld [vmem:[%s2832_s2 + $0x680] sm:$0xff]  ;;  %507 = vmatpush.msra.mxu2 %v169_v46  ;;  %v126_v46 = vld [vmem:[%s2832_s2 + $0x328] sm:$0xff] }
  0x31   :  { %v37_v48 = vld [vmem:[%s2832_s2 + $0x60] sm:$0xff]  ;;  %527 = vmatpush.msra.mxu3 %v233_v47 }
  0x32   :  { %v101_v49 = vld [vmem:[%s2832_s2 + $0x260] sm:$0xff]  ;;  %468 = vmatpush.msra.mxu0 %v37_v48 }
  0x33   :  { %v165_v50 = vld [vmem:[%s2832_s2 + $0x460] sm:$0xff]  ;;  %488 = vmatpush.msra.mxu1 %v101_v49  ;;  %v46_v49 = vld [vmem:[%s2832_s2 + $0xa8] sm:$0xff] }
  0x34   :  { %v229_v51 = vld [vmem:[%s2832_s2 + $0x660] sm:$0xff]  ;;  %508 = vmatpush.msra.mxu2 %v165_v50  ;;  %v122_v50 = vld [vmem:[%s2832_s2 + $0x308] sm:$0xff] }
  0x35   :  { %v33_v52 = vld [vmem:[%s2832_s2 + $0x40] sm:$0xff]  ;;  %528 = vmatpush.msra.mxu3 %v229_v51 }
  0x36   :  { %v97_v53 = vld [vmem:[%s2832_s2 + $0x240] sm:$0xff]  ;;  %469 = vmatpush.msra.mxu0 %v33_v52 }
  0x37   :  { %v161_v54 = vld [vmem:[%s2832_s2 + $0x440] sm:$0xff]  ;;  %489 = vmatpush.msra.mxu1 %v97_v53  ;;  %v42_v53 = vld [vmem:[%s2832_s2 + $0x88] sm:$0xff] }
  0x38   :  { %v225_v55 = vld [vmem:[%s2832_s2 + $0x640] sm:$0xff]  ;;  %509 = vmatpush.msra.mxu2 %v161_v54  ;;  %v118_v54 = vld [vmem:[%s2832_s2 + $0x2e8] sm:$0xff] }
  0x39   :  { %v29_v56 = vld [vmem:[%s2832_s2 + $0x20] sm:$0xff]  ;;  %529 = vmatpush.msra.mxu3 %v225_v55 }
  0x3a   :  { %v93_v57 = vld [vmem:[%s2832_s2 + $0x220] sm:$0xff]  ;;  %470 = vmatpush.msra.mxu0 %v29_v56 }
  0x3b   :  { %v23_v58 = vld [vmem:[%s2831_s1] sm:$0xff]  ;;  %490 = vmatpush.msra.mxu1 %v93_v57  ;;  %v38_v57 = vld [vmem:[%s2832_s2 + $0x68] sm:$0xff] }
  0x3c   :  { %v157_v59 = vld [vmem:[%s2832_s2 + $0x420] sm:$0xff]  ;;  %437 = vst [vmem:[#allocation1] ss:$4 sm:$0xff] %v23_v58  ;;  %v114_v58 = vld [vmem:[%s2832_s2 + $0x2c8] sm:$0xff] }
  0x3d   :  { %v221_v60 = vld [vmem:[%s2832_s2 + $0x620] sm:$0xff]  ;;  %510 = vmatpush.msra.mxu2 %v157_v59 }
  0x3e   :  { %v25_v61 = vld [vmem:[%s2832_s2] sm:$0xff]  ;;  %530 = vmatpush.msra.mxu3 %v221_v60 }
  0x3f   :  { %v89_v62 = vld [vmem:[%s2832_s2 + $0x200] sm:$0xff]  ;;  %471 = vmatpush.msra.mxu0 %v25_v61  ;;  %v34_v61 = vld [vmem:[%s2832_s2 + $0x48] sm:$0xff] }
  0x40   :  { %v153_v63 = vld [vmem:[%s2832_s2 + $0x400] sm:$0xff]  ;;  %491 = vmatpush.msra.mxu1 %v89_v62  ;;  %v110_v62 = vld [vmem:[%s2832_s2 + $0x2a8] sm:$0xff] }
  0x41   :  { %v217_v0 = vld [vmem:[%s2832_s2 + $0x600] sm:$0xff]  ;;  %511 = vmatpush.msra.mxu2 %v153_v63 }
  0x42   :  { %v341_v1 = vld [vmem:[%s2832_s2 + $0x9e0] sm:$0xff]  ;;  %531 = vmatpush.msra.mxu3 %v217_v0 }
  0x43   :  { %v405_v2 = vld [vmem:[%s2832_s2 + $0xbe0] sm:$0xff]  ;;  %536 = vmatpush.msrb.mxu0 %v341_v1  ;;  %v1603_v17 = vld.sshfl [vmem:[#allocation1 + $0x10] sm:$0xff pattern:$0x73625140]  ;;  %v30_v1 = vld [vmem:[%s2832_s2 + $0x28] sm:$0xff] }
  0x44   :  { %v421_v3 = vld [vmem:[%s2832_s2 + $0xc60] sm:$0xff]  ;;  %556 = vmatpush.msrb.mxu1 %v405_v2  ;;  %596 = vmatpush.msrb.mxu3 %v86_v4  ;;  %v1632_v27 = vld.sshfl [vmem:[#allocation1 + $0x18] sm:$0xff pattern:$0x73625140]  ;;  %v106_v4 = vld [vmem:[%s2832_s2 + $0x288] sm:$0xff] }
  0x45   :  { %v337_v5 = vld [vmem:[%s2832_s2 + $0x9c0] sm:$0xff]  ;;  %588 = vmatpush.msrb.mxu2 %v421_v3  ;;  %v1650_v33 = vld.sshfl [vmem:[#allocation1 + $0x8] sm:$0xff pattern:$0x73625140]  ;;  %532 = vmatmul.f32.vlgmr.msra.gmra.mxu3 %v1632_v27 }
  0x46   :  { %v401_v6 = vld [vmem:[%s2832_s2 + $0xbc0] sm:$0xff]  ;;  %537 = vmatpush.msrb.mxu0 %v337_v5  ;;  %597 = vmatpush.msrb.mxu3 %v82_v8  ;;  %v1750_v2 = vld.sshfl [vmem:[#allocation1 + $0x30] sm:$0xff pattern:$0x73625140]  ;;  %v102_v8 = vld [vmem:[%s2832_s2 + $0x268] sm:$0xff] }
  0x47   :  { %v417_v7 = vld [vmem:[%s2832_s2 + $0xc40] sm:$0xff]  ;;  %557 = vmatpush.msrb.mxu1 %v401_v6  ;;  %512 = vmatmul.f32.vlgmr.msra.gmra.mxu2 %v1603_v17  ;;  %v26_v6 = vld [vmem:[%s2832_s2 + $0x8] sm:$0xff] }
  0x48   :  { %v333_v9 = vld [vmem:[%s2832_s2 + $0x9a0] sm:$0xff]  ;;  %589 = vmatpush.msrb.mxu2 %v417_v7  ;;  %598 = vmatpush.msrb.mxu3 %v78_v12  ;;  %v98_v12 = vld [vmem:[%s2832_s2 + $0x248] sm:$0xff] }
  0x49   :  { %v397_v10 = vld [vmem:[%s2832_s2 + $0xba0] sm:$0xff]  ;;  %538 = vmatpush.msrb.mxu0 %v333_v9  ;;  %492 = vmatmul.f32.vlgmr.msra.gmra.mxu1 %v1650_v33  ;;  %v278_v9 = vld [vmem:[%s2832_s2 + $0x7e8] sm:$0xff] }
  0x4a   :  { %v413_v11 = vld [vmem:[%s2832_s2 + $0xc20] sm:$0xff]  ;;  %558 = vmatpush.msrb.mxu1 %v397_v10  ;;  %599 = vmatpush.msrb.mxu3 %v74_v16  ;;  %v342_v10 = vld [vmem:[%s2832_s2 + $0x9e8] sm:$0xff] }
  0x4b   :  { %v329_v13 = vld [vmem:[%s2832_s2 + $0x980] sm:$0xff]  ;;  %590 = vmatpush.msrb.mxu2 %v413_v11  ;;  %v1777_v11 = vld.sshfl [vmem:[#allocation1 + $0x28] sm:$0xff pattern:$0x73625140] }
  0x4c   :  { %v393_v14 = vld [vmem:[%s2832_s2 + $0xb80] sm:$0xff]  ;;  %539 = vmatpush.msrb.mxu0 %v329_v13  ;;  %600 = vmatpush.msrb.mxu3 %v70_v21  ;;  %v274_v13 = vld [vmem:[%s2832_s2 + $0x7c8] sm:$0xff] }
  0x4d   :  { %v409_v15 = vld [vmem:[%s2832_s2 + $0xc00] sm:$0xff]  ;;  %559 = vmatpush.msrb.mxu1 %v393_v14  ;;  %v338_v14 = vld [vmem:[%s2832_s2 + $0x9c8] sm:$0xff] }
  0x4e   :  { %v325_v18 = vld [vmem:[%s2832_s2 + $0x960] sm:$0xff]  ;;  %591 = vmatpush.msrb.mxu2 %v409_v15  ;;  %601 = vmatpush.msrb.mxu3 %v66_v25  ;;  %v214_v15 = vld [vmem:[%s2832_s2 + $0x5e8] sm:$0xff] }
  0x4f   :  { %v389_v20 = vld [vmem:[%s2832_s2 + $0xb60] sm:$0xff]  ;;  %540 = vmatpush.msrb.mxu0 %v325_v18  ;;  %1268 = vmatmul.msk.f32.vlgmr.msrb.gmra.mxu2 %vm453_vm0, %v1750_v2 }
  0x50   :  { %v321_v22 = vld [vmem:[%s2832_s2 + $0x940] sm:$0xff]  ;;  %616 = vmatpush.msra.mxu2 %v150_v19  ;;  %560 = vmatpush.msrb.mxu1 %v389_v20 }
  0x51   :  { %v385_v24 = vld [vmem:[%s2832_s2 + $0xb40] sm:$0xff]  ;;  %541 = vmatpush.msrb.mxu0 %v321_v22  ;;  %602 = vmatpush.msrb.mxu3 %v62_v32 }
  0x52   :  { %v1630_v26 = vld.sshfl [vmem:[#allocation1] sm:$0xff pattern:$0x73625140]  ;;  %617 = vmatpush.msra.mxu2 %v146_v23  ;;  %561 = vmatpush.msrb.mxu1 %v385_v24 }
  0x53   :  { %v317_v30 = vld [vmem:[%s2832_s2 + $0x920] sm:$0xff]  ;;  %472 = vmatmul.f32.vlgmr.msra.gmra.mxu0 %v1630_v26  ;;  %603 = vmatpush.msrb.mxu3 %v58_v37 }
  0x54   :  { %v381_v31 = vld [vmem:[%s2832_s2 + $0xb20] sm:$0xff]  ;;  %618 = vmatpush.msra.mxu2 %v142_v28  ;;  %542 = vmatpush.msrb.mxu0 %v317_v30 }
  0x55   :  { %v313_v35 = vld [vmem:[%s2832_s2 + $0x900] sm:$0xff]  ;;  %562 = vmatpush.msrb.mxu1 %v381_v31  ;;  %604 = vmatpush.msrb.mxu3 %v54_v41 }
  0x56   :  { %v377_v36 = vld [vmem:[%s2832_s2 + $0xb00] sm:$0xff]  ;;  %619 = vmatpush.msra.mxu2 %v138_v34  ;;  %543 = vmatpush.msrb.mxu0 %v313_v35 }
  0x57   :  { %v309_v39 = vld [vmem:[%s2832_s2 + $0x8e0] sm:$0xff]  ;;  %563 = vmatpush.msrb.mxu1 %v377_v36  ;;  %605 = vmatpush.msrb.mxu3 %v50_v45 }
  0x58   :  { %v373_v40 = vld [vmem:[%s2832_s2 + $0xae0] sm:$0xff]  ;;  %620 = vmatpush.msra.mxu2 %v134_v38  ;;  %544 = vmatpush.msrb.mxu0 %v309_v39 }
  0x59   :  { %v305_v43 = vld [vmem:[%s2832_s2 + $0x8c0] sm:$0xff]  ;;  %564 = vmatpush.msrb.mxu1 %v373_v40  ;;  %606 = vmatpush.msrb.mxu3 %v46_v49 }
  0x5a   :  { %v369_v44 = vld [vmem:[%s2832_s2 + $0xac0] sm:$0xff]  ;;  %621 = vmatpush.msra.mxu2 %v130_v42  ;;  %545 = vmatpush.msrb.mxu0 %v305_v43 }
  0x5b   :  { %v301_v47 = vld [vmem:[%s2832_s2 + $0x8a0] sm:$0xff]  ;;  %565 = vmatpush.msrb.mxu1 %v369_v44  ;;  %607 = vmatpush.msrb.mxu3 %v42_v53 }
  0x5c   :  { %v365_v48 = vld [vmem:[%s2832_s2 + $0xaa0] sm:$0xff]  ;;  %622 = vmatpush.msra.mxu2 %v126_v46  ;;  %546 = vmatpush.msrb.mxu0 %v301_v47 }
  0x5d   :  { %v297_v51 = vld [vmem:[%s2832_s2 + $0x880] sm:$0xff]  ;;  %566 = vmatpush.msrb.mxu1 %v365_v48  ;;  %608 = vmatpush.msrb.mxu3 %v38_v57 }
  0x5e   :  { %v361_v52 = vld [vmem:[%s2832_s2 + $0xa80] sm:$0xff]  ;;  %623 = vmatpush.msra.mxu2 %v122_v50  ;;  %547 = vmatpush.msrb.mxu0 %v297_v51 }
  0x5f   :  { %v293_v55 = vld [vmem:[%s2832_s2 + $0x860] sm:$0xff]  ;;  %567 = vmatpush.msrb.mxu1 %v361_v52  ;;  %609 = vmatpush.msrb.mxu3 %v34_v61 }
  0x60   :  { %v357_v56 = vld [vmem:[%s2832_s2 + $0xa60] sm:$0xff]  ;;  %624 = vmatpush.msra.mxu2 %v118_v54  ;;  %548 = vmatpush.msrb.mxu0 %v293_v55 }
  0x61   :  { %v289_v59 = vld [vmem:[%s2832_s2 + $0x840] sm:$0xff]  ;;  %568 = vmatpush.msrb.mxu1 %v357_v56  ;;  %610 = vmatpush.msrb.mxu3 %v30_v1 }
  0x62   :  { %v353_v60 = vld [vmem:[%s2832_s2 + $0xa40] sm:$0xff]  ;;  %625 = vmatpush.msra.mxu2 %v114_v58  ;;  %549 = vmatpush.msrb.mxu0 %v289_v59 }
  0x63   :  { %v285_v63 = vld [vmem:[%s2832_s2 + $0x820] sm:$0xff]  ;;  %569 = vmatpush.msrb.mxu1 %v353_v60  ;;  %611 = vmatpush.msrb.mxu3 %v26_v6 }
  0x64   :  { %v349_v0 = vld [vmem:[%s2832_s2 + $0xa20] sm:$0xff]  ;;  %626 = vmatpush.msra.mxu2 %v110_v62  ;;  %550 = vmatpush.msrb.mxu0 %v285_v63 }
  0x65   :  { %v281_v3 = vld [vmem:[%s2832_s2 + $0x800] sm:$0xff]  ;;  %570 = vmatpush.msrb.mxu1 %v349_v0 }
  0x66   :  { %v345_v5 = vld [vmem:[%s2832_s2 + $0xa00] sm:$0xff]  ;;  %551 = vmatpush.msrb.mxu0 %v281_v3  ;;  %627 = vmatpush.msra.mxu2 %v106_v4 }
  0x67   :  { %v1764_v7 = vld.sshfl [vmem:[#allocation1 + $0x20] sm:$0xff pattern:$0x73625140]  ;;  %571 = vmatpush.msrb.mxu1 %v345_v5 }
  0x68   :  { %552 = vmatmul.f32.vlgmr.msrb.gmra.mxu0 %v1764_v7  ;;  %628 = vmatpush.msra.mxu2 %v102_v8 }
  0x69   :  { %656 = vmatpush.msra.mxu1 %v278_v9 }
  0x6a   :  { %12 = vsyncpa [#allocation5], 0  ;;  %676 = vmatpush.msra.mxu3 %v342_v10  ;;  %572 = vmatmul.f32.vlgmr.msrb.gmra.mxu1 %v1777_v11  ;;  %v94_v16 = vld [vmem:[%s2832_s2 + $0x228] sm:$0xff]  ;;  %s1033_s26 = smul.u32 2654435769, %s2830_s0  ;;  %vm1166_vm3 = vcmask 1043456  }
  0x6b   :  { %v270_v18 = vld [vmem:[%s2832_s2 + $0x7a8] sm:$0xff]  ;;  %629 = vmatpush.msra.mxu2 %v98_v12  ;;  %657 = vmatpush.msra.mxu1 %v274_v13  ;;  %vm1162_vm6 = vcmask 949248   ;;  %s1324_s22 = smov [#allocation4]   ;;  %s1259_s25 = sshll.u32 %s2836_s6, 4  ;;  %vm1250_vm7 = vcmask 74752   ;;  %s1260_s25 = int_to_ptr.hbm [resolvable:$true] %s1259_s25 }
  0x6c   :  { %v334_v19 = vld [vmem:[%s2832_s2 + $0x9a8] sm:$0xff]  ;;  %677 = vmatpush.msra.mxu3 %v338_v14  ;;  %636 = vmatpush.msra.mxu0 %v214_v15  ;;  %v87_v15 = vld [vmem:[%s2832_s2 + $0x1f0] sm:$0xff] }
  0x6d   :  { %v210_v20 = vld [vmem:[%s2832_s2 + $0x5c8] sm:$0xff]  ;;  %630 = vmatpush.msra.mxu2 %v94_v16  ;;  %658 = vmatpush.msra.mxu1 %v270_v18 }
  0x6e   :  { %v90_v21 = vld [vmem:[%s2832_s2 + $0x208] sm:$0xff]  ;;  %678 = vmatpush.msra.mxu3 %v334_v19  ;;  %637 = vmatpush.msra.mxu0 %v210_v20  ;;  %v83_v20 = vld [vmem:[%s2832_s2 + $0x1d0] sm:$0xff] }
  0x6f   :  { %v266_v22 = vld [vmem:[%s2832_s2 + $0x788] sm:$0xff]  ;;  %631 = vmatpush.msra.mxu2 %v90_v21  ;;  %612 = vmatmul.f32.vlgmr.msrb.gmra.mxu3 %v1630_v26 }
  0x70   :  { %v330_v23 = vld [vmem:[%s2832_s2 + $0x988] sm:$0xff]  ;;  %659 = vmatpush.msra.mxu1 %v266_v22  ;;  %632 = vmatmul.f32.vlgmr.msra.gmra.mxu2 %v1650_v33 }
  0x71   :  { %v406_v24 = vld [vmem:[%s2832_s2 + $0xbe8] sm:$0xff]  ;;  %679 = vmatpush.msra.mxu3 %v330_v23 }
  0x72   :  { %v262_v25 = vld [vmem:[%s2832_s2 + $0x768] sm:$0xff]  ;;  %696 = vmatpush.msrb.mxu2 %v406_v24  ;;  %v79_v24 = vld [vmem:[%s2832_s2 + $0x1b0] sm:$0xff] }
  0x73   :  { %v206_v28 = vld [vmem:[%s2832_s2 + $0x5a8] sm:$0xff]  ;;  %660 = vmatpush.msra.mxu1 %v262_v25 }
  0x74   :  { %v326_v29 = vld [vmem:[%s2832_s2 + $0x968] sm:$0xff]  ;;  %638 = vmatpush.msra.mxu0 %v206_v28 }
  0x75   :  { %v402_v30 = vld [vmem:[%s2832_s2 + $0xbc8] sm:$0xff]  ;;  %680 = vmatpush.msra.mxu3 %v326_v29 }
  0x76   :  { %v258_v31 = vld [vmem:[%s2832_s2 + $0x748] sm:$0xff]  ;;  %697 = vmatpush.msrb.mxu2 %v402_v30  ;;  %v75_v30 = vld [vmem:[%s2832_s2 + $0x190] sm:$0xff] }
  0x77   :  { %v202_v32 = vld [vmem:[%s2832_s2 + $0x588] sm:$0xff]  ;;  %661 = vmatpush.msra.mxu1 %v258_v31  ;;  %v151_v31 = vld [vmem:[%s2832_s2 + $0x3f0] sm:$0xff] }
  0x78   :  { %v322_v34 = vld [vmem:[%s2832_s2 + $0x948] sm:$0xff]  ;;  %639 = vmatpush.msra.mxu0 %v202_v32  ;;  %v71_v32 = vld [vmem:[%s2832_s2 + $0x170] sm:$0xff] }
  0x79   :  { %v398_v35 = vld [vmem:[%s2832_s2 + $0xba8] sm:$0xff]  ;;  %681 = vmatpush.msra.mxu3 %v322_v34  ;;  %v147_v34 = vld [vmem:[%s2832_s2 + $0x3d0] sm:$0xff] }
  0x7a   :  { %v254_v36 = vld [vmem:[%s2832_s2 + $0x728] sm:$0xff]  ;;  %698 = vmatpush.msrb.mxu2 %v398_v35  ;;  %v279_v35 = vld [vmem:[%s2832_s2 + $0x7f0] sm:$0xff] }
  0x7b   :  { %v198_v37 = vld [vmem:[%s2832_s2 + $0x568] sm:$0xff]  ;;  %662 = vmatpush.msra.mxu1 %v254_v36  ;;  %v67_v36 = vld [vmem:[%s2832_s2 + $0x150] sm:$0xff] }
  0x7c   :  { %v318_v38 = vld [vmem:[%s2832_s2 + $0x928] sm:$0xff]  ;;  %640 = vmatpush.msra.mxu0 %v198_v37  ;;  %v215_v37 = vld [vmem:[%s2832_s2 + $0x5f0] sm:$0xff] }
  0x7d   :  { %v394_v39 = vld [vmem:[%s2832_s2 + $0xb88] sm:$0xff]  ;;  %682 = vmatpush.msra.mxu3 %v318_v38  ;;  %v143_v38 = vld [vmem:[%s2832_s2 + $0x3b0] sm:$0xff] }
  0x7e   :  { %v250_v40 = vld [vmem:[%s2832_s2 + $0x708] sm:$0xff]  ;;  %699 = vmatpush.msrb.mxu2 %v394_v39  ;;  %v275_v39 = vld [vmem:[%s2832_s2 + $0x7d0] sm:$0xff] }
  0x7f   :  { %v194_v41 = vld [vmem:[%s2832_s2 + $0x548] sm:$0xff]  ;;  %663 = vmatpush.msra.mxu1 %v250_v40  ;;  %v63_v40 = vld [vmem:[%s2832_s2 + $0x130] sm:$0xff] }
  0x80   :  { %v314_v42 = vld [vmem:[%s2832_s2 + $0x908] sm:$0xff]  ;;  %641 = vmatpush.msra.mxu0 %v194_v41  ;;  %v211_v41 = vld [vmem:[%s2832_s2 + $0x5d0] sm:$0xff] }
  0x81   :  { %v390_v43 = vld [vmem:[%s2832_s2 + $0xb68] sm:$0xff]  ;;  %683 = vmatpush.msra.mxu3 %v314_v42  ;;  %v139_v42 = vld [vmem:[%s2832_s2 + $0x390] sm:$0xff] }
  0x82   :  { %v246_v44 = vld [vmem:[%s2832_s2 + $0x6e8] sm:$0xff]  ;;  %700 = vmatpush.msrb.mxu2 %v390_v43  ;;  %v271_v43 = vld [vmem:[%s2832_s2 + $0x7b0] sm:$0xff] }
  0x83   :  { %v190_v45 = vld [vmem:[%s2832_s2 + $0x528] sm:$0xff]  ;;  %664 = vmatpush.msra.mxu1 %v246_v44  ;;  %v59_v44 = vld [vmem:[%s2832_s2 + $0x110] sm:$0xff] }
  0x84   :  { %v310_v46 = vld [vmem:[%s2832_s2 + $0x8e8] sm:$0xff]  ;;  %642 = vmatpush.msra.mxu0 %v190_v45  ;;  %v207_v45 = vld [vmem:[%s2832_s2 + $0x5b0] sm:$0xff] }
  0x85   :  { %v386_v47 = vld [vmem:[%s2832_s2 + $0xb48] sm:$0xff]  ;;  %684 = vmatpush.msra.mxu3 %v310_v46  ;;  %v135_v46 = vld [vmem:[%s2832_s2 + $0x370] sm:$0xff] }
  0x86   :  { %v242_v48 = vld [vmem:[%s2832_s2 + $0x6c8] sm:$0xff]  ;;  %701 = vmatpush.msrb.mxu2 %v386_v47  ;;  %v267_v47 = vld [vmem:[%s2832_s2 + $0x790] sm:$0xff] }
  0x87   :  { %v186_v49 = vld [vmem:[%s2832_s2 + $0x508] sm:$0xff]  ;;  %665 = vmatpush.msra.mxu1 %v242_v48  ;;  %v55_v48 = vld [vmem:[%s2832_s2 + $0xf0] sm:$0xff] }
  0x88   :  { %v306_v50 = vld [vmem:[%s2832_s2 + $0x8c8] sm:$0xff]  ;;  %643 = vmatpush.msra.mxu0 %v186_v49  ;;  %v203_v49 = vld [vmem:[%s2832_s2 + $0x590] sm:$0xff] }
  0x89   :  { %v382_v51 = vld [vmem:[%s2832_s2 + $0xb28] sm:$0xff]  ;;  %685 = vmatpush.msra.mxu3 %v306_v50  ;;  %v131_v50 = vld [vmem:[%s2832_s2 + $0x350] sm:$0xff] }
  0x8a   :  { %v238_v52 = vld [vmem:[%s2832_s2 + $0x6a8] sm:$0xff]  ;;  %702 = vmatpush.msrb.mxu2 %v382_v51  ;;  %v263_v51 = vld [vmem:[%s2832_s2 + $0x770] sm:$0xff] }
  0x8b   :  { %v182_v53 = vld [vmem:[%s2832_s2 + $0x4e8] sm:$0xff]  ;;  %666 = vmatpush.msra.mxu1 %v238_v52  ;;  %v51_v52 = vld [vmem:[%s2832_s2 + $0xd0] sm:$0xff] }
  0x8c   :  { %v302_v54 = vld [vmem:[%s2832_s2 + $0x8a8] sm:$0xff]  ;;  %644 = vmatpush.msra.mxu0 %v182_v53  ;;  %v199_v53 = vld [vmem:[%s2832_s2 + $0x570] sm:$0xff] }
  0x8d   :  { %v378_v55 = vld [vmem:[%s2832_s2 + $0xb08] sm:$0xff]  ;;  %686 = vmatpush.msra.mxu3 %v302_v54  ;;  %v127_v54 = vld [vmem:[%s2832_s2 + $0x330] sm:$0xff] }
  0x8e   :  { %v234_v56 = vld [vmem:[%s2832_s2 + $0x688] sm:$0xff]  ;;  %703 = vmatpush.msrb.mxu2 %v378_v55  ;;  %v259_v55 = vld [vmem:[%s2832_s2 + $0x750] sm:$0xff] }
  0x8f   :  { %v298_v57 = vld [vmem:[%s2832_s2 + $0x888] sm:$0xff]  ;;  %667 = vmatpush.msra.mxu1 %v234_v56  ;;  %v47_v56 = vld [vmem:[%s2832_s2 + $0xb0] sm:$0xff] }
  0x90   :  { %v374_v58 = vld [vmem:[%s2832_s2 + $0xae8] sm:$0xff]  ;;  %687 = vmatpush.msra.mxu3 %v298_v57  ;;  %v195_v57 = vld [vmem:[%s2832_s2 + $0x550] sm:$0xff] }
  0x91   :  { %v230_v59 = vld [vmem:[%s2832_s2 + $0x668] sm:$0xff]  ;;  %704 = vmatpush.msrb.mxu2 %v374_v58  ;;  %v123_v58 = vld [vmem:[%s2832_s2 + $0x310] sm:$0xff] }
  0x92   :  { %v178_v60 = vld [vmem:[%s2832_s2 + $0x4c8] sm:$0xff]  ;;  %668 = vmatpush.msra.mxu1 %v230_v59  ;;  %v255_v59 = vld [vmem:[%s2832_s2 + $0x730] sm:$0xff] }
  0x93   :  { %v294_v61 = vld [vmem:[%s2832_s2 + $0x868] sm:$0xff]  ;;  %645 = vmatpush.msra.mxu0 %v178_v60  ;;  %v43_v60 = vld [vmem:[%s2832_s2 + $0x90] sm:$0xff] }
  0x94   :  { %v370_v62 = vld [vmem:[%s2832_s2 + $0xac8] sm:$0xff]  ;;  %688 = vmatpush.msra.mxu3 %v294_v61  ;;  %v191_v61 = vld [vmem:[%s2832_s2 + $0x530] sm:$0xff] }
  0x95   :  { %v226_v63 = vld [vmem:[%s2832_s2 + $0x648] sm:$0xff]  ;;  %705 = vmatpush.msrb.mxu2 %v370_v62  ;;  %v119_v62 = vld [vmem:[%s2832_s2 + $0x2f0] sm:$0xff] }
  0x96   :  { %v174_v0 = vld [vmem:[%s2832_s2 + $0x4a8] sm:$0xff]  ;;  %669 = vmatpush.msra.mxu1 %v226_v63  ;;  %v251_v63 = vld [vmem:[%s2832_s2 + $0x710] sm:$0xff] }
  0x97   :  { %v290_v1 = vld [vmem:[%s2832_s2 + $0x848] sm:$0xff]  ;;  %646 = vmatpush.msra.mxu0 %v174_v0  ;;  %v39_v0 = vld [vmem:[%s2832_s2 + $0x70] sm:$0xff] }
  0x98   :  { %v366_v3 = vld [vmem:[%s2832_s2 + $0xaa8] sm:$0xff]  ;;  %689 = vmatpush.msra.mxu3 %v290_v1  ;;  %v187_v1 = vld [vmem:[%s2832_s2 + $0x510] sm:$0xff] }
  0x99   :  { %v222_v4 = vld [vmem:[%s2832_s2 + $0x628] sm:$0xff]  ;;  %706 = vmatpush.msrb.mxu2 %v366_v3  ;;  %v115_v3 = vld [vmem:[%s2832_s2 + $0x2d0] sm:$0xff] }
  0x9a   :  { %v170_v5 = vld [vmem:[%s2832_s2 + $0x488] sm:$0xff]  ;;  %670 = vmatpush.msra.mxu1 %v222_v4  ;;  %v247_v4 = vld [vmem:[%s2832_s2 + $0x6f0] sm:$0xff] }
  0x9b   :  { %v286_v6 = vld [vmem:[%s2832_s2 + $0x828] sm:$0xff]  ;;  %647 = vmatpush.msra.mxu0 %v170_v5  ;;  %v35_v5 = vld [vmem:[%s2832_s2 + $0x50] sm:$0xff] }
  0x9c   :  { %v362_v8 = vld [vmem:[%s2832_s2 + $0xa88] sm:$0xff]  ;;  %690 = vmatpush.msra.mxu3 %v286_v6  ;;  %v183_v6 = vld [vmem:[%s2832_s2 + $0x4f0] sm:$0xff] }
  0x9d   :  { %v218_v9 = vld [vmem:[%s2832_s2 + $0x608] sm:$0xff]  ;;  %707 = vmatpush.msrb.mxu2 %v362_v8  ;;  %v111_v8 = vld [vmem:[%s2832_s2 + $0x2b0] sm:$0xff] }
  0x9e   :  { %v282_v10 = vld [vmem:[%s2832_s2 + $0x808] sm:$0xff]  ;;  %671 = vmatpush.msra.mxu1 %v218_v9  ;;  %v243_v9 = vld [vmem:[%s2832_s2 + $0x6d0] sm:$0xff] }
  0x9f   :  { %v166_v12 = vld [vmem:[%s2832_s2 + $0x468] sm:$0xff]  ;;  %691 = vmatpush.msra.mxu3 %v282_v10  ;;  %672 = vmatmul.f32.vlgmr.msra.gmra.mxu1 %v1632_v27  ;;  %v31_v10 = vld [vmem:[%s2832_s2 + $0x30] sm:$0xff] }
  0xa0   :  { %v358_v13 = vld [vmem:[%s2832_s2 + $0xa68] sm:$0xff]  ;;  %648 = vmatpush.msra.mxu0 %v166_v12  ;;  %736 = vmatpush.msrb.mxu1 %v87_v15  ;;  %v179_v12 = vld [vmem:[%s2832_s2 + $0x4d0] sm:$0xff] }
  0xa1   :  { %v422_v14 = vld [vmem:[%s2832_s2 + $0xc68] sm:$0xff]  ;;  %708 = vmatpush.msrb.mxu2 %v358_v13  ;;  %692 = vmatmul.f32.vlgmr.msra.gmra.mxu3 %v1764_v7  ;;  %v107_v13 = vld [vmem:[%s2832_s2 + $0x290] sm:$0xff] }
  0xa2   :  { %v162_v16 = vld [vmem:[%s2832_s2 + $0x448] sm:$0xff]  ;;  %728 = vmatpush.msrb.mxu3 %v422_v14  ;;  %737 = vmatpush.msrb.mxu1 %v83_v20  ;;  %v239_v14 = vld [vmem:[%s2832_s2 + $0x6b0] sm:$0xff] }
  0xa3   :  { %v354_v18 = vld [vmem:[%s2832_s2 + $0xa48] sm:$0xff]  ;;  %649 = vmatpush.msra.mxu0 %v162_v16  ;;  %v27_v15 = vld [vmem:[%s2832_s2 + $0x10] sm:$0xff] }
  0xa4   :  { %v418_v19 = vld [vmem:[%s2832_s2 + $0xc48] sm:$0xff]  ;;  %709 = vmatpush.msrb.mxu2 %v354_v18  ;;  %738 = vmatpush.msrb.mxu1 %v79_v24  ;;  %v175_v16 = vld [vmem:[%s2832_s2 + $0x4b0] sm:$0xff] }
  0xa5   :  { %v158_v21 = vld [vmem:[%s2832_s2 + $0x428] sm:$0xff]  ;;  %729 = vmatpush.msrb.mxu3 %v418_v19  ;;  %v103_v18 = vld [vmem:[%s2832_s2 + $0x270] sm:$0xff] }
  0xa6   :  { %v350_v22 = vld [vmem:[%s2832_s2 + $0xa28] sm:$0xff]  ;;  %650 = vmatpush.msra.mxu0 %v158_v21  ;;  %739 = vmatpush.msrb.mxu1 %v75_v30  ;;  %v235_v19 = vld [vmem:[%s2832_s2 + $0x690] sm:$0xff] }
  0xa7   :  { %v414_v23 = vld [vmem:[%s2832_s2 + $0xc28] sm:$0xff]  ;;  %710 = vmatpush.msrb.mxu2 %v350_v22  ;;  %v343_v20 = vld [vmem:[%s2832_s2 + $0x9f0] sm:$0xff] }
  0xa8   :  { %v154_v25 = vld [vmem:[%s2832_s2 + $0x408] sm:$0xff]  ;;  %730 = vmatpush.msrb.mxu3 %v414_v23  ;;  %740 = vmatpush.msrb.mxu1 %v71_v32  ;;  %v171_v21 = vld [vmem:[%s2832_s2 + $0x490] sm:$0xff] }
  0xa9   :  { %v346_v28 = vld [vmem:[%s2832_s2 + $0xa08] sm:$0xff]  ;;  %651 = vmatpush.msra.mxu0 %v154_v25  ;;  %v99_v22 = vld [vmem:[%s2832_s2 + $0x250] sm:$0xff] }
  0xaa   :  { %v410_v29 = vld [vmem:[%s2832_s2 + $0xc08] sm:$0xff]  ;;  %711 = vmatpush.msrb.mxu2 %v346_v28  ;;  %652 = vmatmul.f32.vlgmr.msra.gmra.mxu0 %v1603_v17  ;;  %v231_v23 = vld [vmem:[%s2832_s2 + $0x670] sm:$0xff] }
  0xab   :  { %731 = vmatpush.msrb.mxu3 %v410_v29  ;;  %712 = vmatmul.f32.vlgmr.msrb.gmra.mxu2 %v1777_v11  ;;  %v339_v24 = vld [vmem:[%s2832_s2 + $0x9d0] sm:$0xff] }
  0xac   :  { %1269 = vmatmul.msk.f32.vlgmr.msrb.gmra.mxu3 %vm453_vm0, %v1750_v2  ;;  %796 = vmatpush.msra.mxu2 %v279_v35  ;;  %v167_v25 = vld [vmem:[%s2832_s2 + $0x470] sm:$0xff] }
  0xad   :  { %756 = vmatpush.msra.mxu3 %v151_v31  ;;  %741 = vmatpush.msrb.mxu1 %v67_v36  ;;  %v95_v28 = vld [vmem:[%s2832_s2 + $0x230] sm:$0xff] }
  0xae   :  { %776 = vmatpush.msrb.mxu0 %v215_v37  ;;  %797 = vmatpush.msra.mxu2 %v275_v39  ;;  %v227_v29 = vld [vmem:[%s2832_s2 + $0x650] sm:$0xff] }
  0xaf   :  { %757 = vmatpush.msra.mxu3 %v147_v34  ;;  %742 = vmatpush.msrb.mxu1 %v63_v40  ;;  %v335_v30 = vld [vmem:[%s2832_s2 + $0x9b0] sm:$0xff] }
  0xb0   :  { %777 = vmatpush.msrb.mxu0 %v211_v41  ;;  %798 = vmatpush.msra.mxu2 %v271_v43  ;;  %v163_v31 = vld [vmem:[%s2832_s2 + $0x450] sm:$0xff] }
  0xb1   :  { %758 = vmatpush.msra.mxu3 %v143_v38  ;;  %743 = vmatpush.msrb.mxu1 %v59_v44  ;;  %v91_v32 = vld [vmem:[%s2832_s2 + $0x210] sm:$0xff] }
  0xb2   :  { %778 = vmatpush.msrb.mxu0 %v207_v45  ;;  %799 = vmatpush.msra.mxu2 %v267_v47  ;;  %v223_v34 = vld [vmem:[%s2832_s2 + $0x630] sm:$0xff] }
  0xb3   :  { %759 = vmatpush.msra.mxu3 %v139_v42  ;;  %744 = vmatpush.msrb.mxu1 %v55_v48  ;;  %v331_v35 = vld [vmem:[%s2832_s2 + $0x990] sm:$0xff]  ;;  %v88_v42 = vld [vmem:[%s2832_s2 + $0x1f8] sm:$0xff] }
  0xb4   :  { %779 = vmatpush.msrb.mxu0 %v203_v49  ;;  %800 = vmatpush.msra.mxu2 %v263_v51  ;;  %v159_v36 = vld [vmem:[%s2832_s2 + $0x430] sm:$0xff]  ;;  %v80_v49 = vld [vmem:[%s2832_s2 + $0x1b8] sm:$0xff] }
  0xb5   :  { %760 = vmatpush.msra.mxu3 %v135_v46  ;;  %745 = vmatpush.msrb.mxu1 %v51_v52  ;;  %v407_v37 = vld [vmem:[%s2832_s2 + $0xbf0] sm:$0xff]  ;;  %v84_v46 = vld [vmem:[%s2832_s2 + $0x1d8] sm:$0xff] }
  0xb6   :  { %780 = vmatpush.msrb.mxu0 %v199_v53  ;;  %801 = vmatpush.msra.mxu2 %v259_v55  ;;  %v219_v38 = vld [vmem:[%s2832_s2 + $0x610] sm:$0xff]  ;;  %v76_v53 = vld [vmem:[%s2832_s2 + $0x198] sm:$0xff] }
  0xb7   :  { %761 = vmatpush.msra.mxu3 %v131_v50  ;;  %746 = vmatpush.msrb.mxu1 %v47_v56  ;;  %v327_v39 = vld [vmem:[%s2832_s2 + $0x970] sm:$0xff]  ;;  %v152_v56 = vld [vmem:[%s2832_s2 + $0x3f8] sm:$0xff] }
  0xb8   :  { %781 = vmatpush.msrb.mxu0 %v195_v57  ;;  %802 = vmatpush.msra.mxu2 %v255_v59  ;;  %v155_v40 = vld [vmem:[%s2832_s2 + $0x410] sm:$0xff]  ;;  %v68_v59 = vld [vmem:[%s2832_s2 + $0x158] sm:$0xff] }
  0xb9   :  { %762 = vmatpush.msra.mxu3 %v127_v54  ;;  %747 = vmatpush.msrb.mxu1 %v43_v60  ;;  %v403_v41 = vld [vmem:[%s2832_s2 + $0xbd0] sm:$0xff]  ;;  %v148_v60 = vld [vmem:[%s2832_s2 + $0x3d8] sm:$0xff] }
  0xba   :  { %782 = vmatpush.msrb.mxu0 %v191_v61  ;;  %803 = vmatpush.msra.mxu2 %v251_v63  ;;  %v323_v43 = vld [vmem:[%s2832_s2 + $0x950] sm:$0xff]  ;;  %v64_v63 = vld [vmem:[%s2832_s2 + $0x138] sm:$0xff] }
  0xbb   :  { %763 = vmatpush.msra.mxu3 %v123_v58  ;;  %748 = vmatpush.msrb.mxu1 %v39_v0  ;;  %v423_v44 = vld [vmem:[%s2832_s2 + $0xc70] sm:$0xff] }
  0xbc   :  { %783 = vmatpush.msrb.mxu0 %v187_v1  ;;  %804 = vmatpush.msra.mxu2 %v247_v4  ;;  %v399_v45 = vld [vmem:[%s2832_s2 + $0xbb0] sm:$0xff]  ;;  %v140_v4 = vld [vmem:[%s2832_s2 + $0x398] sm:$0xff] }
  0xbd   :  { %764 = vmatpush.msra.mxu3 %v119_v62  ;;  %749 = vmatpush.msrb.mxu1 %v35_v5  ;;  %v319_v47 = vld [vmem:[%s2832_s2 + $0x930] sm:$0xff] }
  0xbe   :  { %784 = vmatpush.msrb.mxu0 %v183_v6  ;;  %805 = vmatpush.msra.mxu2 %v243_v9  ;;  %v395_v48 = vld [vmem:[%s2832_s2 + $0xb90] sm:$0xff]  ;;  %v136_v9 = vld [vmem:[%s2832_s2 + $0x378] sm:$0xff] }
  0xbf   :  { %765 = vmatpush.msra.mxu3 %v115_v3  ;;  %750 = vmatpush.msrb.mxu1 %v31_v10  ;;  %v315_v50 = vld [vmem:[%s2832_s2 + $0x910] sm:$0xff]  ;;  %v60_v3 = vld [vmem:[%s2832_s2 + $0x118] sm:$0xff] }
  0xc0   :  { %785 = vmatpush.msrb.mxu0 %v179_v12  ;;  %806 = vmatpush.msra.mxu2 %v239_v14  ;;  %v415_v51 = vld [vmem:[%s2832_s2 + $0xc30] sm:$0xff]  ;;  %v132_v14 = vld [vmem:[%s2832_s2 + $0x358] sm:$0xff] }
  0xc1   :  { %766 = vmatpush.msra.mxu3 %v111_v8  ;;  %751 = vmatpush.msrb.mxu1 %v27_v15  ;;  %v391_v52 = vld [vmem:[%s2832_s2 + $0xb70] sm:$0xff]  ;;  %v56_v8 = vld [vmem:[%s2832_s2 + $0xf8] sm:$0xff] }
  0xc2   :  { %786 = vmatpush.msrb.mxu0 %v175_v16  ;;  %807 = vmatpush.msra.mxu2 %v235_v19  ;;  %v311_v54 = vld [vmem:[%s2832_s2 + $0x8f0] sm:$0xff]  ;;  %v128_v19 = vld [vmem:[%s2832_s2 + $0x338] sm:$0xff] }
  0xc3   :  { %767 = vmatpush.msra.mxu3 %v107_v13  ;;  %816 = vmatpush.msra.mxu1 %v343_v20  ;;  %v387_v55 = vld [vmem:[%s2832_s2 + $0xb50] sm:$0xff]  ;;  %v52_v13 = vld [vmem:[%s2832_s2 + $0xd8] sm:$0xff] }
  0xc4   :  { %787 = vmatpush.msrb.mxu0 %v171_v21  ;;  %808 = vmatpush.msra.mxu2 %v231_v23  ;;  %v307_v57 = vld [vmem:[%s2832_s2 + $0x8d0] sm:$0xff]  ;;  %v124_v23 = vld [vmem:[%s2832_s2 + $0x318] sm:$0xff] }
  0xc5   :  { %768 = vmatpush.msra.mxu3 %v103_v18  ;;  %817 = vmatpush.msra.mxu1 %v339_v24  ;;  %v383_v58 = vld [vmem:[%s2832_s2 + $0xb30] sm:$0xff]  ;;  %v48_v18 = vld [vmem:[%s2832_s2 + $0xb8] sm:$0xff] }
  0xc6   :  { %788 = vmatpush.msrb.mxu0 %v167_v25  ;;  %809 = vmatpush.msra.mxu2 %v227_v29  ;;  %v303_v61 = vld [vmem:[%s2832_s2 + $0x8b0] sm:$0xff]  ;;  %v216_v25 = vld [vmem:[%s2832_s2 + $0x5f8] sm:$0xff] }
  0xc7   :  { %769 = vmatpush.msra.mxu3 %v99_v22  ;;  %818 = vmatpush.msra.mxu1 %v335_v30  ;;  %v379_v62 = vld [vmem:[%s2832_s2 + $0xb10] sm:$0xff]  ;;  %v44_v22 = vld [vmem:[%s2832_s2 + $0x98] sm:$0xff] }
  0xc8   :  { %789 = vmatpush.msrb.mxu0 %v163_v31  ;;  %810 = vmatpush.msra.mxu2 %v223_v34  ;;  %v299_v0 = vld [vmem:[%s2832_s2 + $0x890] sm:$0xff]  ;;  %v120_v29 = vld [vmem:[%s2832_s2 + $0x2f8] sm:$0xff] }
  0xc9   :  { %770 = vmatpush.msra.mxu3 %v95_v28  ;;  %819 = vmatpush.msra.mxu1 %v331_v35  ;;  %v375_v1 = vld [vmem:[%s2832_s2 + $0xaf0] sm:$0xff]  ;;  %v40_v28 = vld [vmem:[%s2832_s2 + $0x78] sm:$0xff] }
  0xca   :  { %790 = vmatpush.msrb.mxu0 %v159_v36  ;;  %811 = vmatpush.msra.mxu2 %v219_v38  ;;  %v295_v5 = vld [vmem:[%s2832_s2 + $0x870] sm:$0xff]  ;;  %v212_v31 = vld [vmem:[%s2832_s2 + $0x5d8] sm:$0xff] }
  0xcb   :  { %771 = vmatpush.msra.mxu3 %v91_v32  ;;  %820 = vmatpush.msra.mxu1 %v327_v39  ;;  %v371_v6 = vld [vmem:[%s2832_s2 + $0xad0] sm:$0xff]  ;;  %v116_v32 = vld [vmem:[%s2832_s2 + $0x2d8] sm:$0xff] }
  0xcc   :  { %772 = vmatmul.f32.vlgmr.msra.gmra.mxu3 %v1650_v33  ;;  %791 = vmatpush.msrb.mxu0 %v155_v40  ;;  %v419_v33 = vld [vmem:[%s2832_s2 + $0xc50] sm:$0xff]  ;;  %v32_v35 = vld [vmem:[%s2832_s2 + $0x38] sm:$0xff] }
  0xcd   :  { %836 = vmatpush.msrb.mxu3 %v407_v37  ;;  %876 = vmatpush.msrb.mxu2 %v88_v42  ;;  %v291_v10 = vld [vmem:[%s2832_s2 + $0x850] sm:$0xff]  ;;  %v112_v36 = vld [vmem:[%s2832_s2 + $0x2b8] sm:$0xff] }
  0xce   :  { %821 = vmatpush.msra.mxu1 %v323_v43  ;;  %868 = vmatpush.msra.mxu0 %v423_v44  ;;  %v367_v12 = vld [vmem:[%s2832_s2 + $0xab0] sm:$0xff]  ;;  %v208_v37 = vld [vmem:[%s2832_s2 + $0x5b8] sm:$0xff] }
  0xcf   :  { %837 = vmatpush.msrb.mxu3 %v403_v41  ;;  %877 = vmatpush.msrb.mxu2 %v84_v46  ;;  %v287_v15 = vld [vmem:[%s2832_s2 + $0x830] sm:$0xff]  ;;  %v280_v38 = vld [vmem:[%s2832_s2 + $0x7f8] sm:$0xff] }
  0xd0   :  { %822 = vmatpush.msra.mxu1 %v319_v47  ;;  %869 = vmatpush.msra.mxu0 %v419_v33  ;;  %v363_v16 = vld [vmem:[%s2832_s2 + $0xa90] sm:$0xff]  ;;  %v28_v39 = vld [vmem:[%s2832_s2 + $0x18] sm:$0xff] }
  0xd1   :  { %838 = vmatpush.msrb.mxu3 %v399_v45  ;;  %752 = vmatmul.f32.vlgmr.msrb.gmra.mxu1 %v1630_v26  ;;  %v411_v26 = vld [vmem:[%s2832_s2 + $0xc10] sm:$0xff]  ;;  %v108_v40 = vld [vmem:[%s2832_s2 + $0x298] sm:$0xff] }
  0xd2   :  { %812 = vmatmul.f32.vlgmr.msra.gmra.mxu2 %v1632_v27  ;;  %823 = vmatpush.msra.mxu1 %v315_v50  ;;  %v72_v27 = vld [vmem:[%s2832_s2 + $0x178] sm:$0xff]  ;;  %v283_v20 = vld [vmem:[%s2832_s2 + $0x810] sm:$0xff] }
  0xd3   :  { %839 = vmatpush.msrb.mxu3 %v395_v48  ;;  %878 = vmatpush.msrb.mxu2 %v80_v49  ;;  %v359_v21 = vld [vmem:[%s2832_s2 + $0xa70] sm:$0xff]  ;;  %v344_v41 = vld [vmem:[%s2832_s2 + $0x9f8] sm:$0xff] }
  0xd4   :  { %870 = vmatpush.msra.mxu0 %v415_v51  ;;  %824 = vmatpush.msra.mxu1 %v311_v54  ;;  %v355_v24 = vld [vmem:[%s2832_s2 + $0xa50] sm:$0xff]  ;;  %v276_v42 = vld [vmem:[%s2832_s2 + $0x7d8] sm:$0xff] }
  0xd5   :  { %840 = vmatpush.msrb.mxu3 %v391_v52  ;;  %879 = vmatpush.msrb.mxu2 %v76_v53  ;;  %v351_v30 = vld [vmem:[%s2832_s2 + $0xa30] sm:$0xff]  ;;  %v104_v43 = vld [vmem:[%s2832_s2 + $0x278] sm:$0xff] }
  0xd6   :  { %871 = vmatpush.msra.mxu0 %v411_v26  ;;  %825 = vmatpush.msra.mxu1 %v307_v57  ;;  %v347_v34 = vld [vmem:[%s2832_s2 + $0xa10] sm:$0xff]  ;;  %v340_v44 = vld [vmem:[%s2832_s2 + $0x9d8] sm:$0xff]  ;;  %v1020_v57 = vlaneseq }
  0xd7   :  { %841 = vmatpush.msrb.mxu3 %v387_v55  ;;  %792 = vmatmul.f32.vlgmr.msrb.gmra.mxu0 %v1603_v17  ;;  %v144_v17 = vld [vmem:[%s2832_s2 + $0x3b8] sm:$0xff] }
  0xd8   :  { %880 = vmatpush.msrb.mxu2 %v72_v27  ;;  %896 = vmatpush.msrb.mxu0 %v152_v56  ;;  %v200_v45 = vld [vmem:[%s2832_s2 + $0x578] sm:$0xff] }
  0xd9   :  { %842 = vmatpush.msrb.mxu3 %v383_v58  ;;  %826 = vmatpush.msra.mxu1 %v303_v61  ;;  %v100_v46 = vld [vmem:[%s2832_s2 + $0x258] sm:$0xff] }
  0xda   :  { %881 = vmatpush.msrb.mxu2 %v68_v59  ;;  %897 = vmatpush.msrb.mxu0 %v148_v60  ;;  %v336_v47 = vld [vmem:[%s2832_s2 + $0x9b8] sm:$0xff] }
  0xdb   :  { %843 = vmatpush.msrb.mxu3 %v379_v62  ;;  %827 = vmatpush.msra.mxu1 %v299_v0  ;;  %v268_v33 = vld [vmem:[%s2832_s2 + $0x798] sm:$0xff] }
  0xdc   :  { %882 = vmatpush.msrb.mxu2 %v64_v63  ;;  %898 = vmatpush.msrb.mxu0 %v144_v17  ;;  %v196_v48 = vld [vmem:[%s2832_s2 + $0x558] sm:$0xff] }
  0xdd   :  { %844 = vmatpush.msrb.mxu3 %v375_v1  ;;  %828 = vmatpush.msra.mxu1 %v295_v5  ;;  %v96_v49 = vld [vmem:[%s2832_s2 + $0x238] sm:$0xff]  ;;  %v1021_v1 = vshrl.u32 %v1020_v57, 7 }
  0xde   :  { %883 = vmatpush.msrb.mxu2 %v60_v3  ;;  %899 = vmatpush.msrb.mxu0 %v140_v4  ;;  %v332_v50 = vld [vmem:[%s2832_s2 + $0x998] sm:$0xff] }
  0xdf   :  { %845 = vmatpush.msrb.mxu3 %v371_v6  ;;  %829 = vmatpush.msra.mxu1 %v291_v10  ;;  %v264_v51 = vld [vmem:[%s2832_s2 + $0x778] sm:$0xff] }
  0xe0   :  { %884 = vmatpush.msrb.mxu2 %v56_v8  ;;  %900 = vmatpush.msrb.mxu0 %v136_v9  ;;  %v192_v52 = vld [vmem:[%s2832_s2 + $0x538] sm:$0xff] }
  0xe1   :  { %846 = vmatpush.msrb.mxu3 %v367_v12  ;;  %830 = vmatpush.msra.mxu1 %v287_v15  ;;  %v92_v53 = vld [vmem:[%s2832_s2 + $0x218] sm:$0xff] }
  0xe2   :  { %885 = vmatpush.msrb.mxu2 %v52_v13  ;;  %901 = vmatpush.msrb.mxu0 %v132_v14  ;;  %v328_v54 = vld [vmem:[%s2832_s2 + $0x978] sm:$0xff]  ;;  %v2511_v13 = vand.u32 127, %v1020_v57  ;;  %v2513_v14 = vmul.u32 500, %v1021_v1  ;;  %v1295_v57 = vld.sshfl [vmem:[#allocation1 + $0x8] sm:$0xff pattern:$0x73625140] }
  0xe3   :  { %847 = vmatpush.msrb.mxu3 %v363_v16  ;;  %831 = vmatpush.msra.mxu1 %v283_v20  ;;  %v260_v26 = vld [vmem:[%s2832_s2 + $0x758] sm:$0xff] }
  0xe4   :  { %886 = vmatpush.msrb.mxu2 %v48_v18  ;;  %902 = vmatpush.msrb.mxu0 %v128_v19  ;;  %v408_v55 = vld [vmem:[%s2832_s2 + $0xbf8] sm:$0xff] }
  0xe5   :  { %832 = vmatmul.f32.vlgmr.msra.gmra.mxu1 %v1764_v7  ;;  %848 = vmatpush.msrb.mxu3 %v359_v21  ;;  %v36_v7 = vld [vmem:[%s2832_s2 + $0x58] sm:$0xff] }
  0xe6   :  { %887 = vmatpush.msrb.mxu2 %v44_v22  ;;  %903 = vmatpush.msrb.mxu0 %v124_v23  ;;  %v324_v27 = vld [vmem:[%s2832_s2 + $0x958] sm:$0xff] }
  0xe7   :  { %849 = vmatpush.msrb.mxu3 %v355_v24  ;;  %916 = vmatpush.msrb.mxu1 %v216_v25  ;;  %v188_v56 = vld [vmem:[%s2832_s2 + $0x518] sm:$0xff]  ;;  %v1028_v24 = vadd.s32 %v2513_v14, %v2511_v13 }
  0xe8   :  { %888 = vmatpush.msrb.mxu2 %v40_v28  ;;  %904 = vmatpush.msrb.mxu0 %v120_v29  ;;  %v256_v58 = vld [vmem:[%s2832_s2 + $0x738] sm:$0xff]  ;;  %v2550_v29 = vstv %s1033_s26 }
  0xe9   :  { %850 = vmatpush.msrb.mxu3 %v351_v30  ;;  %917 = vmatpush.msrb.mxu1 %v212_v31  ;;  %v404_v59 = vld [vmem:[%s2832_s2 + $0xbd8] sm:$0xff] }
  0xea   :  { %889 = vmatpush.msrb.mxu2 %v36_v7  ;;  %905 = vmatpush.msrb.mxu0 %v116_v32  ;;  %v320_v60 = vld [vmem:[%s2832_s2 + $0x938] sm:$0xff]  ;;  %v2564_v32 = vld [vmem:[%s2833_s3] sm:$0xf] }
  0xeb   :  { %851 = vmatpush.msrb.mxu3 %v347_v34  ;;  %1270 = vmatmul.msk.f32.vlgmr.msra.gmra.mxu0 %vm453_vm0, %v1750_v2  ;;  %v204_v2 = vld [vmem:[%s2832_s2 + $0x598] sm:$0xff] }
  0xec   :  { %890 = vmatpush.msrb.mxu2 %v32_v35  ;;  %906 = vmatpush.msrb.mxu0 %v112_v36  ;;  %v184_v61 = vld [vmem:[%s2832_s2 + $0x4f8] sm:$0xff]  ;;  %v1035_v36 = vadd.s32 %v2550_v29, %v1028_v24 }
  0xed   :  { %852 = vmatmul.f32.vlgmr.msrb.gmra.mxu3 %v1777_v11  ;;  %918 = vmatpush.msrb.mxu1 %v208_v37  ;;  %v272_v11 = vld [vmem:[%s2832_s2 + $0x7b8] sm:$0xff]  ;;  %v1291_v37 = vld.sshfl [vmem:[#allocation1] sm:$0xff pattern:$0x73625140] }
  0xee   :  { %936 = vmatpush.msra.mxu3 %v280_v38  ;;  %891 = vmatpush.msrb.mxu2 %v28_v39  ;;  %v252_v62 = vld [vmem:[%s2832_s2 + $0x718] sm:$0xff] }
  0xef   :  { %907 = vmatpush.msrb.mxu0 %v108_v40  ;;  %919 = vmatpush.msrb.mxu1 %v204_v2  ;;  %v400_v63 = vld [vmem:[%s2832_s2 + $0xbb8] sm:$0xff] }
  0xf0   :  { %956 = vmatpush.msra.mxu2 %v344_v41  ;;  %937 = vmatpush.msra.mxu3 %v276_v42  ;;  %v316_v17 = vld [vmem:[%s2832_s2 + $0x918] sm:$0xff]  ;;  %v427_v41 = vperm.slane %v2564_v32, 0 }
  0xf1   :  { %908 = vmatpush.msrb.mxu0 %v104_v43  ;;  %920 = vmatpush.msrb.mxu1 %v200_v45  ;;  %v180_v0 = vld [vmem:[%s2832_s2 + $0x4d8] sm:$0xff]  ;;  %v473_v43 = vpop.f32.mrf.mxu0  ;;  %v1024_v45 = vadd.s32 128, %v2511_v13 }
  0xf2   :  { %957 = vmatpush.msra.mxu2 %v340_v44  ;;  %938 = vmatpush.msra.mxu3 %v272_v11  ;;  %v248_v3 = vld [vmem:[%s2832_s2 + $0x6f8] sm:$0xff]  ;;  %v1272_v11 = vshrl.u32 %v1035_v36, 16 }
  0xf3   :  { %909 = vmatpush.msrb.mxu0 %v100_v46  ;;  %921 = vmatpush.msrb.mxu1 %v196_v48  ;;  %v396_v4 = vld [vmem:[%s2832_s2 + $0xb98] sm:$0xff] }
  0xf4   :  { %958 = vmatpush.msra.mxu2 %v336_v47  ;;  %939 = vmatpush.msra.mxu3 %v268_v33  ;;  %v312_v5 = vld [vmem:[%s2832_s2 + $0x8f8] sm:$0xff]  ;;  %v1292_v33 = vld.sshfl [vmem:[#allocation1 + $0x10] sm:$0xff pattern:$0x73625140] }
  0xf5   :  { %910 = vmatpush.msrb.mxu0 %v96_v49  ;;  %922 = vmatpush.msrb.mxu1 %v192_v52  ;;  %v176_v6 = vld [vmem:[%s2832_s2 + $0x4b8] sm:$0xff]  ;;  %v474_v49 = vadd.f32 %v473_v43, %v427_v41  ;;  %v493_v52 = vpop.f32.mrf.mxu1 }
  0xf6   :  { %959 = vmatpush.msra.mxu2 %v332_v50  ;;  %940 = vmatpush.msra.mxu3 %v264_v51  ;;  %v244_v8 = vld [vmem:[%s2832_s2 + $0x6d8] sm:$0xff]  ;;  %v1109_v51 = vld [vmem:[%s2834_s4 + $0x70] sm:$0xff] }
  0xf7   :  { %911 = vmatpush.msrb.mxu0 %v92_v53  ;;  %923 = vmatpush.msrb.mxu1 %v188_v56  ;;  %v392_v9 = vld [vmem:[%s2832_s2 + $0xb78] sm:$0xff]  ;;  %v1108_v56 = vld [vmem:[%s2834_s4 + $0x68] sm:$0xff] }
  0xf8   :  { %960 = vmatpush.msra.mxu2 %v328_v54  ;;  %941 = vmatpush.msra.mxu3 %v260_v26  ;;  %v308_v10 = vld [vmem:[%s2832_s2 + $0x8d8] sm:$0xff]  ;;  %v1047_v26 = vxor.u32 %v1272_v11, %v1035_v36  ;;  %v1121_v11 = vld [vmem:[%s2834_s4 + $0xd0] sm:$0xff] }
  0xf9   :  { %976 = vmatpush.msra.mxu0 %v408_v55  ;;  %924 = vmatpush.msrb.mxu1 %v184_v61  ;;  %v172_v12 = vld [vmem:[%s2832_s2 + $0x498] sm:$0xff]  ;;  %v1029_v55 = vadd.s32 %v2513_v14, %v1024_v45  ;;  %v1107_v61 = vld [vmem:[%s2834_s4 + $0x60] sm:$0xff] }
  0xfa   :  { %961 = vmatpush.msra.mxu2 %v324_v27  ;;  %942 = vmatpush.msra.mxu3 %v256_v58  ;;  %v240_v15 = vld [vmem:[%s2832_s2 + $0x6b8] sm:$0xff]  ;;  %v1294_v27 = vld.sshfl [vmem:[#allocation1 + $0x20] sm:$0xff pattern:$0x73625140] }
  0xfb   :  { %977 = vmatpush.msra.mxu0 %v404_v59  ;;  %925 = vmatpush.msrb.mxu1 %v180_v0  ;;  %v388_v16 = vld [vmem:[%s2832_s2 + $0xb58] sm:$0xff]  ;;  %v1051_v0 = vmul.u32 2246822507, %v1047_v26  ;;  %v1036_v1 = vadd.s32 %v2550_v29, %v1029_v55 }
  0xfc   :  { %962 = vmatpush.msra.mxu2 %v320_v60  ;;  %943 = vmatpush.msra.mxu3 %v252_v62  ;;  %v304_v18 = vld [vmem:[%s2832_s2 + $0x8b8] sm:$0xff]  ;;  %v494_v60 = vadd.f32 %v493_v52, %v474_v49  ;;  %v513_v62 = vpop.f32.mrf.mxu2  ;;  %v1119_v52 = vld [vmem:[%s2834_s4 + $0xc0] sm:$0xff] }
  0xfd   :  { %978 = vmatpush.msra.mxu0 %v400_v63  ;;  %926 = vmatpush.msrb.mxu1 %v176_v6  ;;  %v168_v19 = vld [vmem:[%s2832_s2 + $0x478] sm:$0xff] }
  0xfe   :  { %963 = vmatpush.msra.mxu2 %v316_v17  ;;  %944 = vmatpush.msra.mxu3 %v248_v3  ;;  %v236_v20 = vld [vmem:[%s2832_s2 + $0x698] sm:$0xff] }
  0xff   :  { %979 = vmatpush.msra.mxu0 %v396_v4  ;;  %v384_v21 = vld [vmem:[%s2832_s2 + $0xb38] sm:$0xff]  ;;  %927 = vmatpush.msrb.mxu1 %v172_v12  ;;  %v533_v4 = vpop.f32.mrf.mxu3  ;;  %v1273_v12 = vshrl.u32 %v1036_v1, 16 }
 0x100   :  { %964 = vmatpush.msra.mxu2 %v312_v5  ;;  %945 = vmatpush.msra.mxu3 %v244_v8  ;;  %v300_v22 = vld [vmem:[%s2832_s2 + $0x898] sm:$0xff]  ;;  %v514_v8 = vadd.f32 %v513_v62, %v494_v60 }
 0x101   :  { %980 = vmatpush.msra.mxu0 %v392_v9  ;;  %v164_v23 = vld [vmem:[%s2832_s2 + $0x458] sm:$0xff]  ;;  %928 = vmatpush.msrb.mxu1 %v168_v19  ;;  %v1105_v9 = vld [vmem:[%s2834_s4 + $0x50] sm:$0xff]  ;;  %v1296_v19 = vld.sshfl [vmem:[#allocation1 + $0x28] sm:$0xff pattern:$0x73625140] }
 0x102   :  { %965 = vmatpush.msra.mxu2 %v308_v10  ;;  %946 = vmatpush.msra.mxu3 %v240_v15  ;;  %v232_v25 = vld [vmem:[%s2832_s2 + $0x678] sm:$0xff]  ;;  %v1276_v10 = vshrl.u32 %v1051_v0, 13  ;;  %v1104_v15 = vld [vmem:[%s2834_s4 + $0x48] sm:$0xff] }
 0x103   :  { %981 = vmatpush.msra.mxu0 %v388_v16  ;;  %v380_v28 = vld [vmem:[%s2832_s2 + $0xb18] sm:$0xff]  ;;  %929 = vmatpush.msrb.mxu1 %v164_v23  ;;  %v1125_v23 = vld [vmem:[%s2834_s4 + $0xf0] sm:$0xff] }
 0x104   :  { %966 = vmatpush.msra.mxu2 %v304_v18  ;;  %947 = vmatpush.msra.mxu3 %v236_v20  ;;  %v160_v30 = vld [vmem:[%s2832_s2 + $0x438] sm:$0xff]  ;;  %v553_v18 = vpop.f32.mrf.mxu0  ;;  %v534_v20 = vadd.f32 %v533_v4, %v514_v8  ;;  %v1063_v24 = vxor.u32 %v1276_v10, %v1051_v0  ;;  %v1116_v0 = vld [vmem:[%s2834_s4 + $0xa8] sm:$0xff]  ;;  %v1115_v4 = vld [vmem:[%s2834_s4 + $0xa0] sm:$0xff] }
 0x105   :  { %982 = vmatpush.msra.mxu0 %v384_v21  ;;  %v228_v31 = vld [vmem:[%s2832_s2 + $0x658] sm:$0xff]  ;;  %892 = vmatmul.f32.vlgmr.msrb.gmra.mxu2 %v1291_v37  ;;  %v1297_v21 = vld.sshfl [vmem:[#allocation1 + $0x30] sm:$0xff pattern:$0x73625140] }
 0x106   :  { %967 = vmatpush.msra.mxu2 %v300_v22  ;;  %v296_v7 = vld [vmem:[%s2832_s2 + $0x878] sm:$0xff]  ;;  %948 = vmatpush.msra.mxu3 %v232_v25  ;;  %v1103_v22 = vld [vmem:[%s2834_s4 + $0x40] sm:$0xff]  ;;  %v1048_v25 = vxor.u32 %v1273_v12, %v1036_v1  ;;  %v1101_v37 = vld [vmem:[%s2834_s4 + $0x30] sm:$0xff] }
 0x107   :  { %983 = vmatpush.msra.mxu0 %v380_v28  ;;  %v376_v34 = vld [vmem:[%s2832_s2 + $0xaf8] sm:$0xff]  ;;  %930 = vmatpush.msrb.mxu1 %v160_v30  ;;  %v554_v28 = vadd.f32 %v553_v18, %v534_v20  ;;  %v593_v30 = vpop.f32.mrf.mxu2  ;;  %v613_v36 = vpop.f32.mrf.mxu3  ;;  %v1113_v12 = vld [vmem:[%s2834_s4 + $0x90] sm:$0xff]  ;;  %v1112_v18 = vld [vmem:[%s2834_s4 + $0x88] sm:$0xff] }
 0x108   :  { %v156_v35 = vld [vmem:[%s2832_s2 + $0x418] sm:$0xff]  ;;  %949 = vmatpush.msra.mxu3 %v228_v31  ;;  %968 = vmatpush.msra.mxu2 %v296_v7  ;;  %v1124_v7 = vld [vmem:[%s2834_s4 + $0xe8] sm:$0xff]  ;;  %v1111_v20 = vld [vmem:[%s2834_s4 + $0x80] sm:$0xff] }
 0x109   :  { %v224_v38 = vld [vmem:[%s2832_s2 + $0x638] sm:$0xff]  ;;  %984 = vmatpush.msra.mxu0 %v376_v34  ;;  %931 = vmatpush.msrb.mxu1 %v156_v35  ;;  %v573_v34 = vpop.f32.mrf.mxu1  ;;  %v428_v35 = vperm.slane %v2564_v32, 1 }
 0x10a   :  { %v292_v39 = vld [vmem:[%s2832_s2 + $0x858] sm:$0xff]  ;;  %950 = vmatpush.msra.mxu3 %v224_v38  ;;  %932 = vmatmul.f32.vlgmr.msrb.gmra.mxu1 %v1292_v33  ;;  %v1123_v38 = vld [vmem:[%s2834_s4 + $0xe0] sm:$0xff]  ;;  %v574_v41 = vadd.f32 %v573_v34, %v554_v28  ;;  %v1137_v28 = vld [vmem:[%s2834_s4 + $0x150] sm:$0xff] }
 0x10b   :  { %v372_v40 = vld [vmem:[%s2832_s2 + $0xad8] sm:$0xff]  ;;  %969 = vmatpush.msra.mxu2 %v292_v39  ;;  %912 = vmatmul.f32.vlgmr.msrb.gmra.mxu0 %v1295_v57  ;;  %v1067_v39 = vmul.u32 3266489909, %v1063_v24  ;;  %v614_v43 = vadd.f32 %v613_v36, %v428_v35  ;;  %v1139_v24 = vld [vmem:[%s2834_s4 + $0x160] sm:$0xff]  ;;  %v1133_v34 = vld [vmem:[%s2834_s4 + $0x130] sm:$0xff]  ;;  %v1025_v35 = vadd.s32 256, %v2511_v13 }
 0x10c   :  { %v220_v42 = vld [vmem:[%s2832_s2 + $0x618] sm:$0xff]  ;;  %985 = vmatpush.msra.mxu0 %v372_v40  ;;  %v1052_v40 = vmul.u32 2246822507, %v1048_v25  ;;  %v1132_v36 = vld [vmem:[%s2834_s4 + $0x128] sm:$0xff] }
 0x10d   :  { %v288_v2 = vld [vmem:[%s2832_s2 + $0x838] sm:$0xff]  ;;  %951 = vmatpush.msra.mxu3 %v220_v42  ;;  %v1100_v42 = vld [vmem:[%s2834_s4 + $0x28] sm:$0xff]  ;;  %v1280_v45 = vshrl.u32 %v1067_v39, 16 }
 0x10e   :  { %v368_v44 = vld [vmem:[%s2832_s2 + $0xab8] sm:$0xff]  ;;  %970 = vmatpush.msra.mxu2 %v288_v2 }
 0x10f   :  { %v1110_v46 = vld [vmem:[%s2834_s4 + $0x78] sm:$0xff]  ;;  %986 = vmatpush.msra.mxu0 %v368_v44  ;;  %v1099_v44 = vld [vmem:[%s2834_s4 + $0x20] sm:$0xff]  ;;  %v633_v49 = vpop.f32.mrf.mxu2 }
 0x110   :  { %v284_v47 = vld [vmem:[%s2832_s2 + $0x818] sm:$0xff]  ;;  %1170 = vmatpush.msrb.mxu3 %v1110_v46  ;;  %v1277_v46 = vshrl.u32 %v1052_v40, 13 }
 0x111   :  { %v364_v48 = vld [vmem:[%s2832_s2 + $0xa98] sm:$0xff]  ;;  %971 = vmatpush.msra.mxu2 %v284_v47  ;;  %v594_v47 = vadd.f32 %v593_v30, %v574_v41  ;;  %v1136_v30 = vld [vmem:[%s2834_s4 + $0x148] sm:$0xff]  ;;  %v1129_v41 = vld [vmem:[%s2834_s4 + $0x110] sm:$0xff] }
 0x112   :  { %v1293_v50 = vld.sshfl [vmem:[#allocation1 + $0x18] sm:$0xff pattern:$0x73625140]  ;;  %987 = vmatpush.msra.mxu0 %v364_v48  ;;  %972 = vmatmul.f32.vlgmr.msra.gmra.mxu2 %v1294_v27  ;;  %v1120_v48 = vld [vmem:[%s2834_s4 + $0xc8] sm:$0xff]  ;;  %v1064_v26 = vxor.u32 %v1277_v46, %v1052_v40  ;;  %v1155_v46 = vld [vmem:[%s2834_s4 + $0x1e0] sm:$0xff] }
 0x113   :  { %952 = vmatmul.f32.vlgmr.msra.gmra.mxu3 %v1293_v50  ;;  %v360_v53 = vld [vmem:[%s2832_s2 + $0xa78] sm:$0xff]  ;;  %v634_v50 = vadd.f32 %v633_v49, %v614_v43  ;;  %v1016_v55 = vmax.f32 %v594_v47, 0.0  ;;  %v1096_v27 = vld [vmem:[%s2834_s4 + $0x8] sm:$0xff]  ;;  %v1127_v43 = vld [vmem:[%s2834_s4 + $0x100] sm:$0xff]  ;;  %v429_v47 = vperm.slane %v2564_v32, 2 }
 0x114   :  { %v424_v54 = vld [vmem:[%s2832_s2 + $0xc78] sm:$0xff]  ;;  %1171 = vmatpush.msrb.mxu3 %v1109_v51  ;;  %988 = vmatpush.msra.mxu0 %v360_v53  ;;  %v1097_v51 = vld [vmem:[%s2834_s4 + $0x10] sm:$0xff]  ;;  %v1079_v53 = vxor.u32 %v1280_v45, %v1067_v39 }
 0x115   :  { %v356_v58 = vld [vmem:[%s2832_s2 + $0xa58] sm:$0xff]  ;;  %1008 = vmatpush.msra.mxu1 %v424_v54 }
 0x116   :  { %v420_v59 = vld [vmem:[%s2832_s2 + $0xc58] sm:$0xff]  ;;  %1172 = vmatpush.msrb.mxu3 %v1108_v56  ;;  %989 = vmatpush.msra.mxu0 %v356_v58  ;;  %vm1083_vm1 = vcmp.ge.s32.totalorder %v1079_v53, 0 }
 0x117   :  { %v352_v63 = vld [vmem:[%s2832_s2 + $0xa38] sm:$0xff]  ;;  %1009 = vmatpush.msra.mxu1 %v420_v59  ;;  %v1095_v59 = vld [vmem:[%s2834_s4] sm:$0xff] }
 0x118   :  { %v416_v17 = vld [vmem:[%s2832_s2 + $0xc38] sm:$0xff]  ;;  %1173 = vmatpush.msrb.mxu3 %v1107_v61  ;;  %990 = vmatpush.msra.mxu0 %v352_v63  ;;  %v1117_v61 = vld [vmem:[%s2834_s4 + $0xb0] sm:$0xff]  ;;  %v1068_v63 = vmul.u32 3266489909, %v1064_v26 }
 0x119   :  { %v1106_v3 = vld [vmem:[%s2834_s4 + $0x58] sm:$0xff]  ;;  %1010 = vmatpush.msra.mxu1 %v416_v17  ;;  %v1087_v17 = vmul.f32 2.0, %v1016_v55 }
 0x11a   :  { %v348_v5 = vld [vmem:[%s2832_s2 + $0xa18] sm:$0xff]  ;;  %1174 = vmatpush.msrb.mxu3 %v1106_v3 }
 0x11b   :  { %v412_v6 = vld [vmem:[%s2832_s2 + $0xc18] sm:$0xff]  ;;  %991 = vmatpush.msra.mxu0 %v348_v5  ;;  %s1257_s2 = sshll.u32 %s1324_s22, 4  ;;  %s1258_s2 = int_to_ptr.vmem [resolvable:$true] %s1257_s2 }
 0x11c   :  { %1011 = vmatpush.msra.mxu1 %v412_v6  ;;  %v1126_v16 = vld [vmem:[%s2834_s4 + $0xf8] sm:$0xff]  ;;  %992 = vmatmul.f32.vlgmr.msra.gmra.mxu0 %v1296_v19  ;;  %v673_v60 = vpop.f32.mrf.mxu1  ;;  %v1281_v6 = vshrl.u32 %v1068_v63, 16 }
 0x11d   :  { %1175 = vmatpush.msrb.mxu3 %v1105_v9  ;;  %1271 = vmatmul.msk.f32.vlgmr.msra.gmra.mxu1 %vm453_vm0, %v1297_v21  ;;  %v1102_v31 = vld [vmem:[%s2834_s4 + $0x38] sm:$0xff] }
 0x11e   :  { %1190 = vmatpush.msrb.mxu1 %v1126_v16  ;;  %v1122_v2 = vld [vmem:[%s2834_s4 + $0xd8] sm:$0xff]  ;;  %v1080_v16 = vxor.u32 %v1281_v6, %v1068_v63 }
 0x11f   :  { %1176 = vmatpush.msrb.mxu3 %v1104_v15  ;;  %v1098_v33 = vld [vmem:[%s2834_s4 + $0x18] sm:$0xff] }
 0x120   :  { %1191 = vmatpush.msrb.mxu1 %v1125_v23  ;;  %v1118_v57 = vld [vmem:[%s2834_s4 + $0xb8] sm:$0xff]  ;;  %vm1084_vm2 = vcmp.ge.s32.totalorder %v1080_v16, 0  ;;  %v1140_v23 = vld [vmem:[%s2834_s4 + $0x168] sm:$0xff] }
 0x121   :  { %1177 = vmatpush.msrb.mxu3 %v1103_v22  ;;  %v1114_v9 = vld [vmem:[%s2834_s4 + $0x98] sm:$0xff]  ;;  %v1141_v22 = vld [vmem:[%s2834_s4 + $0x170] sm:$0xff] }
 0x122   :  { %1192 = vmatpush.msrb.mxu1 %v1124_v7  ;;  %v1142_v21 = vld [vmem:[%s2834_s4 + $0x178] sm:$0xff] }
 0x123   :  { %1178 = vmatpush.msrb.mxu3 %v1102_v31  ;;  %1210 = vmatpush.msrb.mxu2 %v1142_v21  ;;  %v1138_v25 = vld [vmem:[%s2834_s4 + $0x158] sm:$0xff]  ;;  %v1135_v31 = vld [vmem:[%s2834_s4 + $0x140] sm:$0xff] }
 0x124   :  { %1193 = vmatpush.msrb.mxu1 %v1123_v38  ;;  %v693_v54 = vpop.f32.mrf.mxu3  ;;  %v1134_v7 = vld [vmem:[%s2834_s4 + $0x138] sm:$0xff]  ;;  %v1131_v38 = vld [vmem:[%s2834_s4 + $0x120] sm:$0xff] }
 0x125   :  { %1179 = vmatpush.msrb.mxu3 %v1101_v37  ;;  %1211 = vmatpush.msrb.mxu2 %v1141_v22  ;;  %v1030_v37 = vadd.s32 %v2513_v14, %v1025_v35  ;;  %v1130_v40 = vld [vmem:[%s2834_s4 + $0x118] sm:$0xff] }
 0x126   :  { %1194 = vmatpush.msrb.mxu1 %v1122_v2  ;;  %v1128_v2 = vld [vmem:[%s2834_s4 + $0x108] sm:$0xff] }
 0x127   :  { %1180 = vmatpush.msrb.mxu3 %v1100_v42  ;;  %v653_v56 = vpop.f32.mrf.mxu0  ;;  %1212 = vmatpush.msrb.mxu2 %v1140_v23  ;;  %v1037_v39 = vadd.s32 %v2550_v29, %v1030_v37  ;;  %v430_v23 = vperm.slane %v2564_v32, 3 }
 0x128   :  { %1195 = vmatpush.msrb.mxu1 %v1121_v11  ;;  %v654_v58 = vadd.f32 %v653_v56, %v634_v50  ;;  %v1156_v11 = vld [vmem:[%s2834_s4 + $0x1e8] sm:$0xff]  ;;  %v1153_v50 = vld [vmem:[%s2834_s4 + $0x1d0] sm:$0xff] }
 0x129   :  { %1181 = vmatpush.msrb.mxu3 %v1099_v44  ;;  %1213 = vmatpush.msrb.mxu2 %v1139_v24  ;;  %v1274_v42 = vshrl.u32 %v1037_v39, 16  ;;  %v1157_v44 = vld [vmem:[%s2834_s4 + $0x1f0] sm:$0xf] }
 0x12a   :  { %1196 = vmatpush.msrb.mxu1 %v1120_v48  ;;  %v674_v62 = vadd.f32 %v673_v60, %v654_v58  ;;  %1287 = vmatpush.msk.msrb.mxu0 %vm1166_vm3, %v1157_v44  ;;  %v1152_v58 = vld [vmem:[%s2834_s4 + $0x1c8] sm:$0xff] }
 0x12b   :  { %1182 = vmatpush.msrb.mxu3 %v1098_v33  ;;  %1214 = vmatpush.msrb.mxu2 %v1138_v25  ;;  %v1049_v45 = vxor.u32 %v1274_v42, %v1037_v39  ;;  %v1154_v33 = vld [vmem:[%s2834_s4 + $0x1d8] sm:$0xff] }
 0x12c   :  { %1197 = vmatpush.msrb.mxu1 %v1119_v52  ;;  %v694_v1 = vadd.f32 %v693_v54, %v674_v62  ;;  %1232 = vmatpush.msrb.mxu0 %v1156_v11 }
 0x12d   :  { %1183 = vmatpush.msrb.mxu3 %v1097_v51  ;;  %1215 = vmatpush.msrb.mxu2 %v1137_v28  ;;  %v1053_v49 = vmul.u32 2246822507, %v1049_v45 }
 0x12e   :  { %1198 = vmatpush.msrb.mxu1 %v1118_v57  ;;  %v713_v3 = vpop.f32.mrf.mxu2  ;;  %1233 = vmatpush.msrb.mxu0 %v1155_v46 }
 0x12f   :  { %1184 = vmatpush.msrb.mxu3 %v1096_v27  ;;  %v714_v5 = vadd.f32 %v713_v3, %v694_v1  ;;  %v733_v8 = vpop.f32.mrf.mxu3  ;;  %1216 = vmatpush.msrb.mxu2 %v1136_v30  ;;  %v1278_v53 = vshrl.u32 %v1053_v49, 13 }
 0x130   :  { %1199 = vmatpush.msrb.mxu1 %v1117_v61  ;;  %1234 = vmatpush.msrb.mxu0 %v1154_v33  ;;  %v1151_v61 = vld [vmem:[%s2834_s4 + $0x1c0] sm:$0xff] }
 0x131   :  { %1185 = vmatpush.msrb.mxu3 %v1095_v59  ;;  %v734_v10 = vadd.f32 %v733_v8, %v714_v5  ;;  %1217 = vmatpush.msrb.mxu2 %v1135_v31  ;;  %v1065_v55 = vxor.u32 %v1278_v53, %v1053_v49  ;;  %v1149_v5 = vld [vmem:[%s2834_s4 + $0x1b0] sm:$0xff] }
 0x132   :  { %1284 = vmatmul.msk.f32.vlgmr.msrb.gmra.mxu3 %vm1083_vm1, %v1087_v17  ;;  %1200 = vmatpush.msrb.mxu1 %v1116_v0  ;;  %v1150_v17 = vld [vmem:[%s2834_s4 + $0x1b8] sm:$0xff]  ;;  %v1026_v0 = vadd.s32 384, %v2511_v13  ;;  %v1147_v13 = vld [vmem:[%s2834_s4 + $0x1a0] sm:$0xff] }
 0x133   :  { %v1017_v15 = vmax.f32 %v734_v10, 0.0  ;;  %1218 = vmatpush.msrb.mxu2 %v1134_v7  ;;  %1235 = vmatpush.msrb.mxu0 %v1153_v50  ;;  %v1069_v57 = vmul.u32 3266489909, %v1065_v55 }
 0x134   :  { %1201 = vmatpush.msrb.mxu1 %v1115_v4  ;;  %v1031_v10 = vadd.s32 %v2513_v14, %v1026_v0  ;;  %v1145_v14 = vld [vmem:[%s2834_s4 + $0x190] sm:$0xff] }
 0x135   :  { %v1088_v19 = vmul.f32 2.0, %v1017_v15  ;;  %1219 = vmatpush.msrb.mxu2 %v1133_v34  ;;  %1236 = vmatpush.msrb.mxu0 %v1152_v58  ;;  %v1282_v62 = vshrl.u32 %v1069_v57, 16 }
 0x136   :  { %1202 = vmatpush.msrb.mxu1 %v1114_v9  ;;  %v1148_v9 = vld [vmem:[%s2834_s4 + $0x1a8] sm:$0xff]  ;;  %v1038_v16 = vadd.s32 %v2550_v29, %v1031_v10  ;;  %v1143_v29 = vld [vmem:[%s2834_s4 + $0x180] sm:$0xff] }
 0x137   :  { %1220 = vmatpush.msrb.mxu2 %v1132_v36  ;;  %1237 = vmatpush.msrb.mxu0 %v1151_v61  ;;  %v1081_v6 = vxor.u32 %v1282_v62, %v1069_v57 }
 0x138   :  { %1203 = vmatpush.msrb.mxu1 %v1113_v12 }
 0x139   :  { %1221 = vmatpush.msrb.mxu2 %v1131_v38  ;;  %1238 = vmatpush.msrb.mxu0 %v1150_v17  ;;  %vm1085_vm4 = vcmp.ge.s32.totalorder %v1081_v6, 0 }
 0x13a   :  { %1204 = vmatpush.msrb.mxu1 %v1112_v18  ;;  %v1146_v18 = vld [vmem:[%s2834_s4 + $0x198] sm:$0xff] }
 0x13b   :  { %1222 = vmatpush.msrb.mxu2 %v1130_v40  ;;  %1239 = vmatpush.msrb.mxu0 %v1149_v5 }
 0x13c   :  { %1205 = vmatpush.msrb.mxu1 %v1111_v20  ;;  %v1144_v20 = vld [vmem:[%s2834_s4 + $0x188] sm:$0xff] }
 0x13d   :  { %1285 = vmatmul.msk.f32.vlgmr.msrb.gmra.mxu1 %vm1084_vm2, %v1088_v19  ;;  %1223 = vmatpush.msrb.mxu2 %v1129_v41  ;;  %v1275_v19 = vshrl.u32 %v1038_v16, 16 }
 0x13e   :  { %1240 = vmatpush.msrb.mxu0 %v1148_v9 }
 0x13f   :  { %1224 = vmatpush.msrb.mxu2 %v1128_v2  ;;  %v1050_v21 = vxor.u32 %v1275_v19, %v1038_v16 }
 0x140   :  { %1241 = vmatpush.msrb.mxu0 %v1147_v13 }
 0x141   :  { %1225 = vmatpush.msrb.mxu2 %v1127_v43  ;;  %v1054_v22 = vmul.u32 2246822507, %v1050_v21 }
 0x142   :  { %1242 = vmatpush.msrb.mxu0 %v1146_v18 }
 0x143   :  { %v1279_v24 = vshrl.u32 %v1054_v22, 13 }
 0x144   :  { %1243 = vmatpush.msrb.mxu0 %v1145_v14 }
 0x145   :  { %v1066_v30 = vxor.u32 %v1279_v24, %v1054_v22 }
 0x146   :  { %1244 = vmatpush.msrb.mxu0 %v1144_v20 }
 0x147   :  { %v1070_v35 = vmul.u32 3266489909, %v1066_v30 }
 0x148   :  { %1245 = vmatpush.msrb.mxu0 %v1143_v29 }
 0x149   :  { %v1283_v40 = vshrl.u32 %v1070_v35, 16 }
 0x14b   :  { %v1082_v44 = vxor.u32 %v1283_v40, %v1070_v35 }
 0x14d   :  { %vm1086_vm5 = vcmp.ge.s32.totalorder %v1082_v44, 0 }
 0x14e   :  { %v753_v48 = vpop.f32.mrf.mxu1 }
 0x14f   :  { %v754_v51 = vadd.f32 %v753_v48, %v429_v47  ;;  %v773_v52 = vpop.f32.mrf.mxu3  ;;  %v1290_v47 = vld [vmem:[%s2835_s5] ss:$0 sm:$0xff] }
 0x151   :  { %v774_v54 = vadd.f32 %v773_v52, %v754_v51 }
 0x154   :  { %v793_v26 = vpop.f32.mrf.mxu0 }
 0x155   :  { %v794_v27 = vadd.f32 %v793_v26, %v774_v54  ;;  %v813_v56 = vpop.f32.mrf.mxu2 }
 0x157   :  { %v814_v60 = vadd.f32 %v813_v56, %v794_v27 }
 0x162   :  { %v833_v59 = vpop.f32.mrf.mxu1 }
 0x163   :  { %v834_v63 = vadd.f32 %v833_v59, %v814_v60 }
 0x168   :  { %v873_v3 = vpop.f32.mrf.mxu0 }
 0x170   :  { %v853_v1 = vpop.f32.mrf.mxu3 }
 0x171   :  { %v854_v4 = vadd.f32 %v853_v1, %v834_v63 }
 0x173   :  { %v874_v8 = vadd.f32 %v873_v3, %v854_v4 }
 0x175   :  { %v1018_v12 = vmax.f32 %v874_v8, 0.0 }
 0x177   :  { %v1089_v15 = vmul.f32 2.0, %v1018_v12 }
 0x179   :  { %1286 = vmatmul.msk.f32.vlgmr.msrb.gmra.mxu2 %vm1085_vm4, %v1089_v15 }
 0x187   :  { %v933_v31 = vpop.f32.mrf.mxu1 }
 0x188   :  { %v893_v25 = vpop.f32.mrf.mxu2  ;;  %v913_v7 = vpop.f32.mrf.mxu0 }
 0x189   :  { %v894_v28 = vadd.f32 %v893_v25, %v430_v23 }
 0x18b   :  { %v914_v34 = vadd.f32 %v913_v7, %v894_v28 }
 0x18d   :  { %v934_v36 = vadd.f32 %v933_v31, %v914_v34 }
 0x195   :  { %v973_v39 = vpop.f32.mrf.mxu2 }
 0x196   :  { %v953_v37 = vpop.f32.mrf.mxu3 }
 0x197   :  { %v954_v38 = vadd.f32 %v953_v37, %v934_v36 }
 0x199   :  { %v974_v41 = vadd.f32 %v973_v39, %v954_v38  ;;  %v993_v42 = vpop.f32.mrf.mxu0 }
 0x19a   :  { %v1013_v43 = vpop.f32.mrf.mxu1 }
 0x19b   :  { %v994_v2 = vadd.f32 %v993_v42, %v974_v41 }
 0x19d   :  { %v1014_v11 = vadd.f32 %v1013_v43, %v994_v2 }
 0x19f   :  { %v1019_v32 = vmax.f32 %v1014_v11, 0.0 }
 0x1a1   :  { %v1090_v45 = vmul.f32 2.0, %v1019_v32 }
 0x1a3   :  { %v1094_v46 = vsel %vm1086_vm5, %v1090_v45, 0.0 }
 0x1a4   :  { %1288 = vmatmul.msk.f32.vlgmr.msrb.gmra.mxu0 %vm1162_vm6, %v1094_v46 }
 0x1b5   :  { %v1187_v33 = vpop.f32.mrf.mxu3 }
 0x1b6   :  { %v1188_v49 = vadd.f32 %v1290_v47, %v1187_v33 }
 0x1ba   :  { %v1207_v48 = vpop.f32.mrf.mxu1 }
 0x1bb   :  { %v1208_v51 = vadd.f32 %v1207_v48, %v1188_v49 }
 0x1fc   :  { %v1227_v50 = vpop.f32.mrf.mxu2 }
 0x1fd   :  { %v1228_v52 = vadd.f32 %v1227_v50, %v1208_v51 }
 0x221   :  { %v1247_v53 = vpop.f32.mrf.mxu0 }
 0x222   :  { %v1248_v54 = vadd.f32 %v1247_v53, %v1228_v52 }
 0x224   :  { %1251 = vst.msk [vmem:[#allocation4] sm:$0x3] %vm1250_vm7, %v1248_v54 }
 0x225   :  { %1262 = dma.vmem_to_hbm [thread:$0]  %s1258_s2, 32, %s1260_s25, [#allocation5]  }
 0x226   :  { %1322 = dma.done.wait [#allocation5], 32  }
 0x227   :  { %1323 = vsyncadd [#allocation5], 4294967264 }
 0x228   :  { %1267 = vsyncpa [#allocation5], 1 }

</bundles_post_ra>
